<compile_context>
chip_gen: v6e
topology: v6e:2x2x1
jax: 0.10.0
libtpu: 0.0.40
codegen_flags: <defaults>
</compile_context>

<pallas_src>
import jax
import jax.numpy as jnp
from jax import lax
from jax.experimental import pallas as pl
from jax.experimental.pallas import tpu as pltpu

# ----- hyper-parameters (mirror the module's __init__ / args) -----------------
WORD_DIM = 300            # self.WORD_DIM
MAX_SENT_LEN = 240        # self.MAX_SENT_LEN
KW = 3                    # self.FILTERS[0]
L_OUT = MAX_SENT_LEN - KW + 1   # 238 = conv output length = max-pool window
FILTER_NUM = 16           # args.filter_num (small)
NHID = 32                 # args.nhid (small)
NUM_TASKS = 3             # len(taskcla)
NUM_CLASSES = 5           # n for every (t, n) in taskcla
VOC_SIZE = 50
BATCH = 2
BL = BATCH * MAX_SENT_LEN           # 480 stacked rows (batch along M)
HEAD_PAD = 128                      # lane-dense padded head output width

_vmem_spec = pl.BlockSpec(memory_space=pltpu.MemorySpace.VMEM)


# ----- fused Pallas kernel -----------------------------------------------------
def fused_forward_kernel(ids_ref, table_ref, wconv_ref, bconv_ref, gc1_ref,
                         w1_ref, b1_ref, g1_ref, w2_ref, b2_ref, g2_ref,
                         wl_ref, bl_ref, out_ref):
    """Embedding + Conv1d + ReLU + max-pool + HAT gates + MLP + all heads.

    ids_ref:   [KW, B*L, 1] int32  (ids_ref[k][i] = token id at stacked row i+k)
    table_ref: [VOC, D]     f32    frozen embedding table
    wconv_ref: [KW, D, F]   f32    (wconv[k,d,f] == torch conv1d weight[f,0,k*D+d])
    bconv_ref: [1, F];  gc1_ref: [1, F]
    w1_ref: [F, H]; b1_ref/g1_ref: [1, H]; w2_ref: [H, H]; b2_ref/g2_ref: [1, H]
    wl_ref: [H, HEAD_PAD]; bl_ref: [1, HEAD_PAD]   (flattened, zero-padded heads)
    out_ref: [B, HEAD_PAD]  f32    (column t*C + c = task-t logit c)
    """
    table = table_ref[...]                                       # [VOC, D]
    iota_v = lax.broadcasted_iota(jnp.int32, (BL, VOC_SIZE), 1)  # [B*L, VOC]

    # Conv1d as KW shifted matmuls; embedding folded into the filters so the
    # big [B*L, D] activation is never formed:  conv = sum_k onehot_k @ (T @ Wk)
    conv = None
    for k in range(KW):
        tw = jnp.dot(table, wconv_ref[k],
                     preferred_element_type=jnp.float32)          # [VOC, F]
        oh = (ids_ref[k] == iota_v).astype(jnp.float32)           # [B*L, VOC]
        contrib = jnp.dot(oh, tw,
                          preferred_element_type=jnp.float32)     # [B*L, F]
        conv = contrib if conv is None else conv + contrib

    conv = jnp.maximum(conv + bconv_ref[...], 0.0)                # bias + ReLU

    # Per-sentence max-pool over the L_OUT valid window positions.  Rows with
    # in-sentence position >= L_OUT carry cross-sentence garbage -> mask to 0
    # (safe: ReLU output is >= 0, so the valid max is unchanged).
    pos = lax.broadcasted_iota(jnp.int32, (MAX_SENT_LEN, FILTER_NUM), 0)
    valid = pos < L_OUT
    pooled_rows = []
    for b in range(BATCH):
        seg = conv[b * MAX_SENT_LEN:(b + 1) * MAX_SENT_LEN]       # aligned slice
        seg = jnp.where(valid, seg, 0.0)
        pooled_rows.append(jnp.max(seg, axis=0, keepdims=True))   # [1, F]
    pooled = jnp.concatenate(pooled_rows, axis=0)                 # [B, F]

    # gc1 gate + MLP + all task heads in one lane-dense matmul.
    h = pooled * gc1_ref[...]
    h = jnp.maximum(jnp.dot(h, w1_ref[...],
                            preferred_element_type=jnp.float32) + b1_ref[...],
                    0.0) * g1_ref[...]
    h = jnp.maximum(jnp.dot(h, w2_ref[...],
                            preferred_element_type=jnp.float32) + b2_ref[...],
                    0.0) * g2_ref[...]
    out_ref[...] = jnp.dot(h, wl_ref[...],
                           preferred_element_type=jnp.float32) + bl_ref[...]


def fused_forward(ids_sh, table, wconv, bconv, gc1, w1, b1, g1, w2, b2, g2,
                  wl_flat, bl_flat):
    return pl.pallas_call(
        fused_forward_kernel,
        out_shape=jax.ShapeDtypeStruct((BATCH, HEAD_PAD), jnp.float32),
        in_specs=[_vmem_spec] * 13,
        out_specs=_vmem_spec,
    )(ids_sh, table, wconv, bconv, gc1, w1, b1, g1, w2, b2, g2, wl_flat, bl_flat)


# ----- parameters (deterministic synthetic init) -------------------------------
def _flatten_heads(w_last, b_last):
    """[T,H,C]/[T,1,C] -> lane-dense, zero-padded [H,HEAD_PAD]/[1,HEAD_PAD]."""
    tc = NUM_TASKS * NUM_CLASSES
    wl = jnp.transpose(w_last, (1, 0, 2)).reshape(NHID, tc)
    bl = b_last.reshape(1, tc)
    wl = jnp.pad(wl, ((0, 0), (0, HEAD_PAD - tc)))
    bl = jnp.pad(bl, ((0, 0), (0, HEAD_PAD - tc)))
    return wl, bl


def init_params(key):
    ks = jax.random.split(key, 18)
    f32 = jnp.float32
    p = {}
    p['emb_table'] = jax.random.normal(ks[0], (VOC_SIZE, WORD_DIM), f32)
    p['wconv'] = jax.random.normal(ks[1], (KW, WORD_DIM, FILTER_NUM), f32) / jnp.sqrt(KW * WORD_DIM)
    p['bconv'] = jax.random.normal(ks[2], (1, FILTER_NUM), f32) * 0.01
    p['w1'] = jax.random.normal(ks[3], (FILTER_NUM, NHID), f32) / jnp.sqrt(FILTER_NUM)
    p['b1'] = jax.random.normal(ks[4], (1, NHID), f32) * 0.01
    p['w2'] = jax.random.normal(ks[5], (NHID, NHID), f32) / jnp.sqrt(NHID)
    p['b2'] = jax.random.normal(ks[6], (1, NHID), f32) * 0.01
    # per-task heads (mcl.last and ac.last)
    p['mcl_w_last'] = jax.random.normal(ks[7], (NUM_TASKS, NHID, NUM_CLASSES), f32) / jnp.sqrt(NHID)
    p['mcl_b_last'] = jax.random.normal(ks[8], (NUM_TASKS, 1, NUM_CLASSES), f32) * 0.01
    p['ac_w_last'] = jax.random.normal(ks[9], (NUM_TASKS, NHID, NUM_CLASSES), f32) / jnp.sqrt(NHID)
    p['ac_b_last'] = jax.random.normal(ks[10], (NUM_TASKS, 1, NUM_CLASSES), f32) * 0.01
    # HAT mask embeddings
    p['mcl_ec1'] = jax.random.normal(ks[11], (NUM_TASKS, FILTER_NUM), f32)
    p['mcl_efc1'] = jax.random.normal(ks[12], (NUM_TASKS, NHID), f32)
    p['mcl_efc2'] = jax.random.normal(ks[13], (NUM_TASKS, NHID), f32)
    p['mcl_efc3'] = jax.random.normal(ks[14], (NUM_TASKS, NHID), f32)
    p['ac_ec1'] = jax.random.normal(ks[15], (NUM_TASKS, FILTER_NUM), f32)
    p['ac_efc1'] = jax.random.normal(ks[16], (NUM_TASKS, NHID), f32)
    p['ac_efc2'] = jax.random.normal(ks[17], (NUM_TASKS, NHID), f32)
    p['ac_efc3'] = jax.random.normal(jax.random.fold_in(key, 99), (NUM_TASKS, NHID), f32)
    # precomputed lane-dense head weights (done once, not per forward)
    p['mcl_wl_flat'], p['mcl_bl_flat'] = _flatten_heads(p['mcl_w_last'], p['mcl_b_last'])
    p['ac_wl_flat'], p['ac_bl_flat'] = _flatten_heads(p['ac_w_last'], p['ac_b_last'])
    return p


# ----- mask() (HAT gates) — tiny elementwise, plain JAX glue --------------------
def make_masks(p, t, s, smax, phase, note):
    sig = jax.nn.sigmoid
    mcl = [p['mcl_ec1'][t], p['mcl_efc1'][t], p['mcl_efc2'][t], p['mcl_efc3'][t]]
    ac = [p['ac_ec1'][t], p['ac_efc1'][t], p['ac_efc2'][t], p['ac_efc3'][t]]
    if t > 0:
        if phase == 'ac':
            return [sig(s * e) for e in ac]
        if phase == 'mcl':
            ac_g = [sig(smax * e) for e in ac]
            mcl_g = [sig(s * e) for e in mcl]
            if 'max' in note:
                return [jnp.maximum(m, a) for m, a in zip(mcl_g, ac_g)]
            if 'norm' in note:
                return mcl_g
    elif t == 0:
        if phase == 'ac':
            return [jnp.ones_like(e) for e in ac]
        if phase == 'mcl':
            return [sig(s * e) for e in mcl]
    raise NotImplementedError


# ----- full forward (single fused Pallas kernel for the hot path) ---------------
def net_forward(params, t, x_ids, s=1.0, phase='mcl', smax=400.0, note='max'):
    gc1, gfc1, gfc2, gfc3 = make_masks(params, t, s, smax, phase, note)

    # window-shifted token ids (tiny int32 layout plumbing; replaces the big
    # XLA embedding gather of the previous version)
    ids_flat = x_ids.reshape(BL).astype(jnp.int32)
    ids_sh = jnp.stack([jnp.roll(ids_flat, -k) for k in range(KW)], axis=0)
    ids_sh = ids_sh.reshape(KW, BL, 1)

    if phase == 'mcl':
        wl, bl = params['mcl_wl_flat'], params['mcl_bl_flat']
    else:
        wl, bl = params['ac_wl_flat'], params['ac_bl_flat']

    out = fused_forward(ids_sh, params['emb_table'], params['wconv'],
                        params['bconv'], gc1.reshape(1, FILTER_NUM),
                        params['w1'], params['b1'], gfc1.reshape(1, NHID),
                        params['w2'], params['b2'], gfc2.reshape(1, NHID),
                        wl, bl)                                    # [B, HEAD_PAD]

    y = [out[:, ti * NUM_CLASSES:(ti + 1) * NUM_CLASSES] for ti in range(NUM_TASKS)]
    return y, [gc1, gfc1, gfc2, gfc3]


# ----- pure-JAX reference for verification --------------------------------------
def reference_forward(params, t, x_ids, s=1.0, phase='mcl', smax=400.0, note='max'):
    gc1, gfc1, gfc2, gfc3 = make_masks(params, t, s, smax, phase, note)
    emb = params['emb_table'][x_ids].astype(jnp.float32)
    conv = jnp.zeros((BATCH, L_OUT, FILTER_NUM), jnp.float32)
    for k in range(KW):
        conv = conv + jnp.einsum('bld,df->blf', emb[:, k:k + L_OUT, :],
                                 params['wconv'][k])
    conv = jax.nn.relu(conv + params['bconv'][0][None, None, :])
    h = conv.max(axis=1) * gc1[None, :]
    h = jax.nn.relu(h @ params['w1'] + params['b1']) * gfc1[None, :]
    h = jax.nn.relu(h @ params['w2'] + params['b2']) * gfc2[None, :]
    wl, bl = ((params['mcl_w_last'], params['mcl_b_last']) if phase == 'mcl'
              else (params['ac_w_last'], params['ac_b_last']))
    logits = jnp.einsum('bh,thc->tbc', h, wl) + bl
    return [logits[i] for i in range(NUM_TASKS)], [gc1, gfc1, gfc2, gfc3]


if __name__ == "__main__":
    key = jax.random.PRNGKey(0)
    pkey, xkey = jax.random.split(key)
    params = init_params(pkey)
    x = jax.random.randint(xkey, (BATCH, MAX_SENT_LEN), 0, VOC_SIZE, dtype=jnp.int32)

    t_task = 1
    y, masks = net_forward(params, t_task, x, s=1.0, phase='mcl', smax=400.0, note='max')
    y = [jax.block_until_ready(o) for o in y]

    y_ref, _ = reference_forward(params, t_task, x, s=1.0, phase='mcl',
                                 smax=400.0, note='max')
    for out, ref in zip(y, y_ref):
        assert out.shape == (BATCH, NUM_CLASSES)
        if not jnp.allclose(out, ref, rtol=1e-2, atol=1e-2):
            raise AssertionError("Pallas output mismatch vs JAX reference")

    print("KERNEL_OK")
</pallas_src>

<mosaic_0001>
module attributes {stable_mosaic.version = 11 : i64} {
  func.func @fused_forward_kernel(%arg0: memref<3x480x1xi32, #tpu.memory_space<vmem>>, %arg1: memref<50x300xf32, #tpu.memory_space<vmem>>, %arg2: memref<3x300x16xf32, #tpu.memory_space<vmem>>, %arg3: memref<1x16xf32, #tpu.memory_space<vmem>>, %arg4: memref<1x16xf32, #tpu.memory_space<vmem>>, %arg5: memref<16x32xf32, #tpu.memory_space<vmem>>, %arg6: memref<1x32xf32, #tpu.memory_space<vmem>>, %arg7: memref<1x32xf32, #tpu.memory_space<vmem>>, %arg8: memref<32x32xf32, #tpu.memory_space<vmem>>, %arg9: memref<1x32xf32, #tpu.memory_space<vmem>>, %arg10: memref<1x32xf32, #tpu.memory_space<vmem>>, %arg11: memref<32x128xf32, #tpu.memory_space<vmem>>, %arg12: memref<1x128xf32, #tpu.memory_space<vmem>>, %arg13: memref<2x128xf32, #tpu.memory_space<vmem>>) attributes {dimension_semantics = [], scalar_prefetch = 0 : i64, scratch_operands = 0 : i64, tpu.core_type = #tpu.core_type<tc>} {
    %c0 = arith.constant 0 : index
    %c0_0 = arith.constant 0 : index
    %0 = vector.load %arg1[%c0, %c0_0] : memref<50x300xf32, #tpu.memory_space<vmem>>, vector<50x300xf32>
    %1 = tpu.iota {dimensions = array<i32: 1>} : vector<480x50xi32>
    %c0_1 = arith.constant 0 : index
    %c0_2 = arith.constant 0 : index
    %c0_3 = arith.constant 0 : index
    %2 = vector.load %arg2[%c0_1, %c0_2, %c0_3] : memref<3x300x16xf32, #tpu.memory_space<vmem>>, vector<1x300x16xf32>
    %3 = vector.shape_cast %2 : vector<1x300x16xf32> to vector<300x16xf32>
    %cst = arith.constant dense<0.000000e+00> : vector<50x16xf32>
    %4 = tpu.matmul %0, %3, %cst {dimension_numbers = #tpu.dot_dimension_numbers<[1], [0], [0], [1], [0, 0, 1, 1], [], []>} : vector<50x300xf32>, vector<300x16xf32>, vector<50x16xf32> -> vector<50x16xf32>
    %c0_4 = arith.constant 0 : index
    %c0_5 = arith.constant 0 : index
    %c0_6 = arith.constant 0 : index
    %5 = vector.load %arg0[%c0_4, %c0_5, %c0_6] : memref<3x480x1xi32, #tpu.memory_space<vmem>>, vector<1x480x1xi32>
    %6 = vector.shape_cast %5 : vector<1x480x1xi32> to vector<480x1xi32>
    %7 = vector.broadcast %6 : vector<480x1xi32> to vector<480x50xi32>
    %8 = arith.cmpi eq, %7, %1 : vector<480x50xi32>
    %9 = arith.extui %8 : vector<480x50xi1> to vector<480x50xi32>
    %10 = arith.sitofp %9 : vector<480x50xi32> to vector<480x50xf32>
    %cst_7 = arith.constant dense<0.000000e+00> : vector<480x16xf32>
    %11 = tpu.matmul %10, %4, %cst_7 {dimension_numbers = #tpu.dot_dimension_numbers<[1], [0], [0], [1], [0, 0, 1, 1], [], []>} : vector<480x50xf32>, vector<50x16xf32>, vector<480x16xf32> -> vector<480x16xf32>
    %c1 = arith.constant 1 : index
    %c0_8 = arith.constant 0 : index
    %c0_9 = arith.constant 0 : index
    %12 = vector.load %arg2[%c1, %c0_8, %c0_9] : memref<3x300x16xf32, #tpu.memory_space<vmem>>, vector<1x300x16xf32>
    %13 = vector.shape_cast %12 : vector<1x300x16xf32> to vector<300x16xf32>
    %cst_10 = arith.constant dense<0.000000e+00> : vector<50x16xf32>
    %14 = tpu.matmul %0, %13, %cst_10 {dimension_numbers = #tpu.dot_dimension_numbers<[1], [0], [0], [1], [0, 0, 1, 1], [], []>} : vector<50x300xf32>, vector<300x16xf32>, vector<50x16xf32> -> vector<50x16xf32>
    %c1_11 = arith.constant 1 : index
    %c0_12 = arith.constant 0 : index
    %c0_13 = arith.constant 0 : index
    %15 = vector.load %arg0[%c1_11, %c0_12, %c0_13] : memref<3x480x1xi32, #tpu.memory_space<vmem>>, vector<1x480x1xi32>
    %16 = vector.shape_cast %15 : vector<1x480x1xi32> to vector<480x1xi32>
    %17 = vector.broadcast %16 : vector<480x1xi32> to vector<480x50xi32>
    %18 = arith.cmpi eq, %17, %1 : vector<480x50xi32>
    %19 = arith.extui %18 : vector<480x50xi1> to vector<480x50xi32>
    %20 = arith.sitofp %19 : vector<480x50xi32> to vector<480x50xf32>
    %cst_14 = arith.constant dense<0.000000e+00> : vector<480x16xf32>
    %21 = tpu.matmul %20, %14, %cst_14 {dimension_numbers = #tpu.dot_dimension_numbers<[1], [0], [0], [1], [0, 0, 1, 1], [], []>} : vector<480x50xf32>, vector<50x16xf32>, vector<480x16xf32> -> vector<480x16xf32>
    %22 = arith.addf %11, %21 : vector<480x16xf32>
    %c2 = arith.constant 2 : index
    %c0_15 = arith.constant 0 : index
    %c0_16 = arith.constant 0 : index
    %23 = vector.load %arg2[%c2, %c0_15, %c0_16] : memref<3x300x16xf32, #tpu.memory_space<vmem>>, vector<1x300x16xf32>
    %24 = vector.shape_cast %23 : vector<1x300x16xf32> to vector<300x16xf32>
    %cst_17 = arith.constant dense<0.000000e+00> : vector<50x16xf32>
    %25 = tpu.matmul %0, %24, %cst_17 {dimension_numbers = #tpu.dot_dimension_numbers<[1], [0], [0], [1], [0, 0, 1, 1], [], []>} : vector<50x300xf32>, vector<300x16xf32>, vector<50x16xf32> -> vector<50x16xf32>
    %c2_18 = arith.constant 2 : index
    %c0_19 = arith.constant 0 : index
    %c0_20 = arith.constant 0 : index
    %26 = vector.load %arg0[%c2_18, %c0_19, %c0_20] : memref<3x480x1xi32, #tpu.memory_space<vmem>>, vector<1x480x1xi32>
    %27 = vector.shape_cast %26 : vector<1x480x1xi32> to vector<480x1xi32>
    %28 = vector.broadcast %27 : vector<480x1xi32> to vector<480x50xi32>
    %29 = arith.cmpi eq, %28, %1 : vector<480x50xi32>
    %30 = arith.extui %29 : vector<480x50xi1> to vector<480x50xi32>
    %31 = arith.sitofp %30 : vector<480x50xi32> to vector<480x50xf32>
    %cst_21 = arith.constant dense<0.000000e+00> : vector<480x16xf32>
    %32 = tpu.matmul %31, %25, %cst_21 {dimension_numbers = #tpu.dot_dimension_numbers<[1], [0], [0], [1], [0, 0, 1, 1], [], []>} : vector<480x50xf32>, vector<50x16xf32>, vector<480x16xf32> -> vector<480x16xf32>
    %33 = arith.addf %22, %32 : vector<480x16xf32>
    %c0_22 = arith.constant 0 : index
    %c0_23 = arith.constant 0 : index
    %34 = vector.load %arg3[%c0_22, %c0_23] : memref<1x16xf32, #tpu.memory_space<vmem>>, vector<1x16xf32>
    %35 = vector.broadcast %34 : vector<1x16xf32> to vector<480x16xf32>
    %36 = arith.addf %33, %35 : vector<480x16xf32>
    %cst_24 = arith.constant 0.000000e+00 : f32
    %37 = vector.broadcast %cst_24 : f32 to vector<480x16xf32>
    %38 = arith.maximumf %36, %37 : vector<480x16xf32>
    %39 = tpu.iota {dimensions = array<i32: 0>} : vector<240x16xi32>
    %c238_i32 = arith.constant 238 : i32
    %40 = vector.broadcast %c238_i32 : i32 to vector<240x16xi32>
    %41 = arith.cmpi slt, %39, %40 : vector<240x16xi32>
    %42 = vector.extract_strided_slice %38 {offsets = [0, 0], sizes = [240, 16], strides = [1, 1]} : vector<480x16xf32> to vector<240x16xf32>
    %cst_25 = arith.constant 0.000000e+00 : f32
    %43 = vector.broadcast %cst_25 : f32 to vector<240x16xf32>
    %44 = arith.select %41, %42, %43 : vector<240x16xi1>, vector<240x16xf32>
    %cst_26 = arith.constant dense<0xFF800000> : vector<16xf32>
    %45 = vector.multi_reduction <maximumf>, %44, %cst_26 [0] : vector<240x16xf32> to vector<16xf32>
    %46 = vector.shape_cast %45 : vector<16xf32> to vector<1x16xf32>
    %47 = vector.extract_strided_slice %38 {offsets = [240, 0], sizes = [240, 16], strides = [1, 1]} : vector<480x16xf32> to vector<240x16xf32>
    %cst_27 = arith.constant 0.000000e+00 : f32
    %48 = vector.broadcast %cst_27 : f32 to vector<240x16xf32>
    %49 = arith.select %41, %47, %48 : vector<240x16xi1>, vector<240x16xf32>
    %cst_28 = arith.constant dense<0xFF800000> : vector<16xf32>
    %50 = vector.multi_reduction <maximumf>, %49, %cst_28 [0] : vector<240x16xf32> to vector<16xf32>
    %51 = vector.shape_cast %50 : vector<16xf32> to vector<1x16xf32>
    %52 = tpu.concatenate %46, %51 in 0 : vector<1x16xf32>, vector<1x16xf32> -> vector<2x16xf32>
    %c0_29 = arith.constant 0 : index
    %c0_30 = arith.constant 0 : index
    %53 = vector.load %arg4[%c0_29, %c0_30] : memref<1x16xf32, #tpu.memory_space<vmem>>, vector<1x16xf32>
    %54 = vector.broadcast %53 : vector<1x16xf32> to vector<2x16xf32>
    %55 = arith.mulf %52, %54 : vector<2x16xf32>
    %c0_31 = arith.constant 0 : index
    %c0_32 = arith.constant 0 : index
    %56 = vector.load %arg5[%c0_31, %c0_32] : memref<16x32xf32, #tpu.memory_space<vmem>>, vector<16x32xf32>
    %cst_33 = arith.constant dense<0.000000e+00> : vector<2x32xf32>
    %57 = tpu.matmul %55, %56, %cst_33 {dimension_numbers = #tpu.dot_dimension_numbers<[1], [0], [0], [1], [0, 0, 1, 1], [], []>} : vector<2x16xf32>, vector<16x32xf32>, vector<2x32xf32> -> vector<2x32xf32>
    %c0_34 = arith.constant 0 : index
    %c0_35 = arith.constant 0 : index
    %58 = vector.load %arg6[%c0_34, %c0_35] : memref<1x32xf32, #tpu.memory_space<vmem>>, vector<1x32xf32>
    %59 = vector.broadcast %58 : vector<1x32xf32> to vector<2x32xf32>
    %60 = arith.addf %57, %59 : vector<2x32xf32>
    %cst_36 = arith.constant 0.000000e+00 : f32
    %61 = vector.broadcast %cst_36 : f32 to vector<2x32xf32>
    %62 = arith.maximumf %60, %61 : vector<2x32xf32>
    %c0_37 = arith.constant 0 : index
    %c0_38 = arith.constant 0 : index
    %63 = vector.load %arg7[%c0_37, %c0_38] : memref<1x32xf32, #tpu.memory_space<vmem>>, vector<1x32xf32>
    %64 = vector.broadcast %63 : vector<1x32xf32> to vector<2x32xf32>
    %65 = arith.mulf %62, %64 : vector<2x32xf32>
    %c0_39 = arith.constant 0 : index
    %c0_40 = arith.constant 0 : index
    %66 = vector.load %arg8[%c0_39, %c0_40] : memref<32x32xf32, #tpu.memory_space<vmem>>, vector<32x32xf32>
    %cst_41 = arith.constant dense<0.000000e+00> : vector<2x32xf32>
    %67 = tpu.matmul %65, %66, %cst_41 {dimension_numbers = #tpu.dot_dimension_numbers<[1], [0], [0], [1], [0, 0, 1, 1], [], []>} : vector<2x32xf32>, vector<32x32xf32>, vector<2x32xf32> -> vector<2x32xf32>
    %c0_42 = arith.constant 0 : index
    %c0_43 = arith.constant 0 : index
    %68 = vector.load %arg9[%c0_42, %c0_43] : memref<1x32xf32, #tpu.memory_space<vmem>>, vector<1x32xf32>
    %69 = vector.broadcast %68 : vector<1x32xf32> to vector<2x32xf32>
    %70 = arith.addf %67, %69 : vector<2x32xf32>
    %cst_44 = arith.constant 0.000000e+00 : f32
    %71 = vector.broadcast %cst_44 : f32 to vector<2x32xf32>
    %72 = arith.maximumf %70, %71 : vector<2x32xf32>
    %c0_45 = arith.constant 0 : index
    %c0_46 = arith.constant 0 : index
    %73 = vector.load %arg10[%c0_45, %c0_46] : memref<1x32xf32, #tpu.memory_space<vmem>>, vector<1x32xf32>
    %74 = vector.broadcast %73 : vector<1x32xf32> to vector<2x32xf32>
    %75 = arith.mulf %72, %74 : vector<2x32xf32>
    %c0_47 = arith.constant 0 : index
    %c0_48 = arith.constant 0 : index
    %76 = vector.load %arg11[%c0_47, %c0_48] : memref<32x128xf32, #tpu.memory_space<vmem>>, vector<32x128xf32>
    %cst_49 = arith.constant dense<0.000000e+00> : vector<2x128xf32>
    %77 = tpu.matmul %75, %76, %cst_49 {dimension_numbers = #tpu.dot_dimension_numbers<[1], [0], [0], [1], [0, 0, 1, 1], [], []>} : vector<2x32xf32>, vector<32x128xf32>, vector<2x128xf32> -> vector<2x128xf32>
    %c0_50 = arith.constant 0 : index
    %c0_51 = arith.constant 0 : index
    %78 = vector.load %arg12[%c0_50, %c0_51] : memref<1x128xf32, #tpu.memory_space<vmem>>, vector<1x128xf32>
    %79 = vector.broadcast %78 : vector<1x128xf32> to vector<2x128xf32>
    %80 = arith.addf %77, %79 : vector<2x128xf32>
    %c0_52 = arith.constant 0 : index
    %c0_53 = arith.constant 0 : index
    %81 = vector.load %arg13[%c0_52, %c0_53] : memref<2x128xf32, #tpu.memory_space<vmem>>, vector<2x128xf32>
    tpu.vector_store %arg13[%c0_52, %c0_53], %80 {strides = array<i32>} : memref<2x128xf32, #tpu.memory_space<vmem>>, vector<2x128xf32>,
    return
  }
}

</mosaic_0001>

<bundles_post_ra>
// kernel: tpu_custom_call.1
= control target key start
LH: loop header
LB: loop body
LE: loop exit
PB: predicated region body
PF: predicated region fallthrough
CT: control target
= control target key end

     0   :  { %v5965_v3 = vmov 0   ;;  %v8833_v11 = vmov 0.0   ;;  %vm128_vm0 = vcmask 1043456   ;;  %vm5967_vm1 = vmmov 0   ;;  %s8818_s0 = inlined_call_operand.vmem [shape: s32[3,480,1], index: 0, kind: input, shape index: {}]   ;;  %s8819_s1 = inlined_call_operand.vmem [shape: f32[50,300], index: 1, kind: input, shape index: {}]   ;;  %s8820_s2 = inlined_call_operand.vmem [shape: f32[3,300,16], index: 2, kind: input, shape index: {}]   ;;  %s8821_s3 = inlined_call_operand.vmem [shape: f32[1,16], index: 3, kind: input, shape index: {}]   ;;  %s8822_s4 = inlined_call_operand.vmem [shape: f32[1,16], index: 4, kind: input, shape index: {}]   ;;  %s8823_s5 = inlined_call_operand.vmem [shape: f32[16,32], index: 5, kind: input, shape index: {}]   ;;  %s8824_s6 = inlined_call_operand.vmem [shape: f32[1,32], index: 6, kind: input, shape index: {}]   ;;  %s8825_s7 = inlined_call_operand.vmem [shape: f32[1,32], index: 7, kind: input, shape index: {}]   ;;  %s8826_s8 = inlined_call_operand.vmem [shape: f32[32,32], index: 8, kind: input, shape index: {}]   ;;  %s8827_s9 = inlined_call_operand.vmem [shape: f32[1,32], index: 9, kind: input, shape index: {}]   ;;  %s8828_s10 = inlined_call_operand.vmem [shape: f32[1,32], index: 10, kind: input, shape index: {}]   ;;  %s8829_s11 = inlined_call_operand.vmem [shape: f32[32,128], index: 11, kind: input, shape index: {}]   ;;  %s8830_s12 = inlined_call_operand.vmem [shape: f32[1,128], index: 12, kind: input, shape index: {}]   ;;  %s8831_s13 = inlined_call_operand.hbm [shape: f32[2,128], index: 13, kind: output, shape index: {}]  }
   0x1   :  { %v99_v0 = vld [vmem:[%s8820_s2 + $0xf8] sm:$0xff]  ;;  %v4573_v1 = vld [vmem:[%s8818_s0 + $0x1f0] sm:$0xff]  ;;  %v4571_v2 = vld [vmem:[%s8818_s0 + $0x1e0] sm:$0xff]  ;;  %5921 = vset.pattern.permute.xlu1 %v5965_v3  ;;  %5920 = vset.pattern.permute.xlu0 %v5965_v3  ;;  %vm106_vm2 = vcmask 359424  }
   0x2   :  { %v83_v4 = vld [vmem:[%s8820_s2 + $0x78] sm:$0xff]  ;;  %v98_v5 = vld [vmem:[%s8820_s2 + $0xf0] sm:$0xff]  ;;  %5050 = vmatprep.subr.mxu0 %v99_v0  ;;  %1062 = vperm.xlu1 %5921, %v4573_v1   ;;  %v97_v7 = vld [vmem:[%s8820_s2 + $0xe8] sm:$0xff] }
   0x3   :  { %v82_v6 = vld [vmem:[%s8820_s2 + $0x70] sm:$0xff]  ;;  %1056 = vperm.xlu0 %5920, %v4571_v2   ;;  %5051 = vmatpush3.msra.mxu0 %v83_v4  ;;  %v4574_v8 = vld [vmem:[%s8818_s0 + $0x1f8] sm:$0xff]  ;;  %v4572_v9 = vld [vmem:[%s8818_s0 + $0x1e8] sm:$0xff] }
   0x4   :  { %5052 = vmatprep.subr.mxu0 %v98_v5  ;;  %v81_v10 = vld [vmem:[%s8820_s2 + $0x68] sm:$0xff]  ;;  %5462 = vmatprep.subr.mxu1 %v8833_v11  ;;  %v96_v12 = vld [vmem:[%s8820_s2 + $0xe0] sm:$0xff]  ;;  %v95_v15 = vld [vmem:[%s8820_s2 + $0xd8] sm:$0xff] }
   0x5   :  { %5053 = vmatpush3.msra.mxu0 %v82_v6  ;;  %5474 = vmatprep.mubr.msk.f32.mxu1 %vm5967_vm1, %v8833_v11  ;;  %v80_v13 = vld [vmem:[%s8820_s2 + $0x60] sm:$0xff]  ;;  %v105_v14 = vld [vmem:[%s8820_s2 + $0x128] sm:$0xf]  ;;  %v79_v18 = vld [vmem:[%s8820_s2 + $0x58] sm:$0xff] }
   0x6   :  { %5054 = vmatprep.subr.mxu0 %v97_v7  ;;  %1065 = vperm.xlu1 %5921, %v4574_v8   ;;  %v4576_v16 = vld [vmem:[%s8818_s0 + $0x208] sm:$0xff]  ;;  %v4575_v17 = vld [vmem:[%s8818_s0 + $0x200] sm:$0xff]  ;;  %v94_v19 = vld [vmem:[%s8820_s2 + $0xd0] sm:$0xff] }
   0x7   :  { %1059 = vperm.xlu0 %5920, %v4572_v9   ;;  %5055 = vmatpush3.msra.mxu0 %v81_v10  ;;  %v104_v20 = vld [vmem:[%s8820_s2 + $0x120] sm:$0xff]  ;;  %v78_v21 = vld [vmem:[%s8820_s2 + $0x50] sm:$0xff]  ;;  %v93_v22 = vld [vmem:[%s8820_s2 + $0xc8] sm:$0xff] }
   0x8   :  { %5056 = vmatprep.subr.mxu0 %v96_v12  ;;  %5463 = vmatpush3.msk.msra.mxu1 %vm128_vm0, %v105_v14  ;;  %v4578_v23 = vld [vmem:[%s8818_s0 + $0x218] sm:$0xff]  ;;  %v4577_v24 = vld [vmem:[%s8818_s0 + $0x210] sm:$0xff]  ;;  %v77_v25 = vld [vmem:[%s8820_s2 + $0x48] sm:$0xff] }
   0x9   :  { %5057 = vmatpush3.msra.mxu0 %v80_v13  ;;  %5464 = vmatprep.subr.mxu1 %v8833_v11  ;;  %v92_v26 = vld [vmem:[%s8820_s2 + $0xc0] sm:$0xff]  ;;  %v103_v27 = vld [vmem:[%s8820_s2 + $0x118] sm:$0xff]  ;;  %v4580_v30 = vld [vmem:[%s8818_s0 + $0x228] sm:$0xff] }
   0xa   :  { %5058 = vmatprep.subr.mxu0 %v95_v15  ;;  %1071 = vperm.xlu1 %5921, %v4576_v16   ;;  %v76_v28 = vld [vmem:[%s8820_s2 + $0x40] sm:$0xff]  ;;  %v91_v29 = vld [vmem:[%s8820_s2 + $0xb8] sm:$0xff]  ;;  %v102_v33 = vld [vmem:[%s8820_s2 + $0x110] sm:$0xff] }
   0xb   :  { %1068 = vperm.xlu0 %5920, %v4575_v17   ;;  %5059 = vmatpush3.msra.mxu0 %v79_v18  ;;  %v4579_v31 = vld [vmem:[%s8818_s0 + $0x220] sm:$0xff]  ;;  %v75_v32 = vld [vmem:[%s8820_s2 + $0x38] sm:$0xff]  ;;  %v90_v34 = vld [vmem:[%s8820_s2 + $0xb0] sm:$0xff] }
   0xc   :  { %5060 = vmatprep.subr.mxu0 %v94_v19  ;;  %5465 = vmatpush3.msra.mxu1 %v104_v20  ;;  %v74_v35 = vld [vmem:[%s8820_s2 + $0x30] sm:$0xff]  ;;  %v101_v36 = vld [vmem:[%s8820_s2 + $0x108] sm:$0xff]  ;;  %v4582_v38 = vld [vmem:[%s8818_s0 + $0x238] sm:$0xff] }
   0xd   :  { %5061 = vmatpush3.msra.mxu0 %v78_v21  ;;  %5466 = vmatprep.subr.mxu1 %v8833_v11  ;;  %v89_v37 = vld [vmem:[%s8820_s2 + $0xa8] sm:$0xff]  ;;  %v4581_v39 = vld [vmem:[%s8818_s0 + $0x230] sm:$0xff]  ;;  %v100_v41 = vld [vmem:[%s8820_s2 + $0x100] sm:$0xff] }
   0xe   :  { %5062 = vmatprep.subr.mxu0 %v93_v22  ;;  %1077 = vperm.xlu1 %5921, %v4578_v23   ;;  %v73_v40 = vld [vmem:[%s8820_s2 + $0x28] sm:$0xff]  ;;  %v88_v42 = vld [vmem:[%s8820_s2 + $0xa0] sm:$0xff]  ;;  %v6180_v45 = vld [vmem:[%s8819_s1 + $0x10] sm:$0xff] }
   0xf   :  { %1074 = vperm.xlu0 %5920, %v4577_v24   ;;  %5063 = vmatpush3.msra.mxu0 %v77_v25  ;;  %v4556_v43 = vld [vmem:[%s8820_s2 + $0x228] sm:$0xff]  ;;  %v72_v44 = vld [vmem:[%s8820_s2 + $0x20] sm:$0xff]  ;;  %v87_v46 = vld [vmem:[%s8820_s2 + $0x98] sm:$0xff] }
  0x10   :  { %5064 = vmatprep.subr.mxu0 %v92_v26  ;;  %5467 = vmatpush3.msra.mxu1 %v103_v27  ;;  %v4540_v47 = vld [vmem:[%s8820_s2 + $0x1a8] sm:$0xff]  ;;  %v4555_v49 = vld [vmem:[%s8820_s2 + $0x220] sm:$0xff]  ;;  %v71_v51 = vld [vmem:[%s8820_s2 + $0x18] sm:$0xff] }
  0x11   :  { %5065 = vmatpush3.msra.mxu0 %v76_v28  ;;  %5468 = vmatprep.subr.mxu1 %v8833_v11  ;;  %v4584_v48 = vld [vmem:[%s8818_s0 + $0x248] sm:$0xff]  ;;  %v4583_v50 = vld [vmem:[%s8818_s0 + $0x240] sm:$0xff]  ;;  %v86_v53 = vld [vmem:[%s8820_s2 + $0x90] sm:$0xff] }
  0x12   :  { %5066 = vmatprep.subr.mxu0 %v91_v29  ;;  %1083 = vperm.xlu1 %5921, %v4580_v30   ;;  %v4539_v52 = vld [vmem:[%s8820_s2 + $0x1a0] sm:$0xff]  ;;  %v4554_v54 = vld [vmem:[%s8820_s2 + $0x218] sm:$0xff]  ;;  %v70_v55 = vld [vmem:[%s8820_s2 + $0x10] sm:$0xff] }
  0x13   :  { %1080 = vperm.xlu0 %5920, %v4579_v31   ;;  %5067 = vmatpush3.msra.mxu0 %v75_v32  ;;  %v4538_v56 = vld [vmem:[%s8820_s2 + $0x198] sm:$0xff]  ;;  %v85_v57 = vld [vmem:[%s8820_s2 + $0x88] sm:$0xff]  ;;  %v4553_v58 = vld [vmem:[%s8820_s2 + $0x210] sm:$0xff] }
  0x14   :  { %5469 = vmatpush3.msra.mxu1 %v102_v33  ;;  %5068 = vmatprep.subr.mxu0 %v90_v34  ;;  %v4586_v59 = vld [vmem:[%s8818_s0 + $0x258] sm:$0xff]  ;;  %v4585_v60 = vld [vmem:[%s8818_s0 + $0x250] sm:$0xff]  ;;  %v69_v61 = vld [vmem:[%s8820_s2 + $0x8] sm:$0xff] }
  0x15   :  { %5470 = vmatprep.subr.mxu1 %v8833_v11  ;;  %5069 = vmatpush3.msra.mxu0 %v74_v35  ;;  %v4537_v62 = vld [vmem:[%s8820_s2 + $0x190] sm:$0xff]  ;;  %v84_v63 = vld [vmem:[%s8820_s2 + $0x80] sm:$0xff]  ;;  %v6241_v0 = vld [vmem:[%s8819_s1 + $0x28] sm:$0xff] }
  0x16   :  { %5471 = vmatpush3.msra.mxu1 %v101_v36  ;;  %5070 = vmatprep.subr.mxu0 %v89_v37  ;;  %v4552_v1 = vld [vmem:[%s8820_s2 + $0x208] sm:$0xff]  ;;  %v68_v2 = vld [vmem:[%s8820_s2] sm:$0xff]  ;;  %v4550_v13 = vld [vmem:[%s8820_s2 + $0x1f8] sm:$0xff] }
  0x17   :  { %5472 = vmatprep.subr.mxu1 %v8833_v11  ;;  %1089 = vperm.xlu1 %5921, %v4582_v38   ;;  %v6254_v3 = vld [vmem:[%s8819_s1 + $0x8] sm:$0xff]  ;;  %v6262_v5 = vld [vmem:[%s8819_s1] sm:$0xff]  ;;  %v4534_v14 = vld [vmem:[%s8820_s2 + $0x178] sm:$0xff] }
  0x18   :  { %1086 = vperm.xlu0 %5920, %v4581_v39   ;;  %5071 = vmatpush3.msra.mxu0 %v73_v40  ;;  %v4536_v4 = vld [vmem:[%s8820_s2 + $0x188] sm:$0xff]  ;;  %v4551_v6 = vld [vmem:[%s8820_s2 + $0x200] sm:$0xff]  ;;  %v6301_v15 = vld [vmem:[%s8819_s1 + $0x18] sm:$0xff] }
  0x19   :  { %5473 = vmatpush3.msra.mxu1 %v100_v41  ;;  %5072 = vmatprep.subr.mxu0 %v88_v42  ;;  %v4588_v7 = vld [vmem:[%s8818_s0 + $0x268] sm:$0xff]  ;;  %v4587_v8 = vld [vmem:[%s8818_s0 + $0x260] sm:$0xff]  ;;  %v4549_v16 = vld [vmem:[%s8820_s2 + $0x1f0] sm:$0xff] }
  0x1a   :  { %5116 = vmatprep.subr.mxu1 %v4556_v43  ;;  %5073 = vmatpush3.msra.mxu0 %v72_v44  ;;  %v4535_v9 = vld [vmem:[%s8820_s2 + $0x180] sm:$0xff]  ;;  %v4590_v17 = vld [vmem:[%s8818_s0 + $0x278] sm:$0xff]  ;;  %v4589_v18 = vld [vmem:[%s8818_s0 + $0x270] sm:$0xff] }
  0x1b   :  { %5475 = vmatmul.mubr.msk.f32.vlgmr.msra.gmra.mxu1 %vm106_vm2, %v6180_v45  ;;  %5074 = vmatprep.subr.mxu0 %v87_v46  ;;  %v6283_v10 = vld [vmem:[%s8819_s1 + $0x20] sm:$0xff]  ;;  %v4533_v19 = vld [vmem:[%s8820_s2 + $0x170] sm:$0xff]  ;;  %v6322_v20 = vld [vmem:[%s8819_s1 + $0x38] sm:$0xff] }
  0x1c   :  { %5117 = vmatpush3.msra.mxu1 %v4540_v47  ;;  %1095 = vperm.xlu1 %5921, %v4584_v48   ;;  %v6288_v12 = vld [vmem:[%s8819_s1 + $0x40] sm:$0xff]  ;;  %v6327_v21 = vld [vmem:[%s8819_s1 + $0x58] sm:$0xff]  ;;  %v4548_v22 = vld [vmem:[%s8820_s2 + $0x1e8] sm:$0xff] }
  0x1d   :  { %5118 = vmatprep.subr.mxu1 %v4555_v49  ;;  %1092 = vperm.xlu0 %5920, %v4583_v50   ;;  %v4532_v23 = vld [vmem:[%s8820_s2 + $0x168] sm:$0xff]  ;;  %v6340_v24 = vld [vmem:[%s8819_s1 + $0x30] sm:$0xff]  ;;  %v4547_v25 = vld [vmem:[%s8820_s2 + $0x1e0] sm:$0xff] }
  0x1e   :  { %5075 = vmatpush3.msra.mxu0 %v71_v51  ;;  %5119 = vmatpush3.msra.mxu1 %v4539_v52  ;;  %v333_v26 = vld [vmem:[%s8818_s0 + $0x8] sm:$0xff]  ;;  %v332_v27 = vld [vmem:[%s8818_s0] sm:$0xff]  ;;  %v6361_v29 = vld [vmem:[%s8819_s1 + $0x50] sm:$0xff] }
  0x1f   :  { %5076 = vmatprep.subr.mxu0 %v86_v53  ;;  %5120 = vmatprep.subr.mxu1 %v4554_v54  ;;  %v4531_v28 = vld [vmem:[%s8820_s2 + $0x160] sm:$0xff]  ;;  %v6366_v30 = vld [vmem:[%s8819_s1 + $0x70] sm:$0xff]  ;;  %v4546_v31 = vld [vmem:[%s8820_s2 + $0x1d8] sm:$0xff] }
  0x20   :  { %5077 = vmatpush3.msra.mxu0 %v70_v55  ;;  %5121 = vmatpush3.msra.mxu1 %v4538_v56  ;;  %v4530_v32 = vld [vmem:[%s8820_s2 + $0x158] sm:$0xff]  ;;  %v6379_v33 = vld [vmem:[%s8819_s1 + $0x48] sm:$0xff]  ;;  %v4545_v34 = vld [vmem:[%s8820_s2 + $0x1d0] sm:$0xff] }
  0x21   :  { %5078 = vmatprep.subr.mxu0 %v85_v57  ;;  %5122 = vmatprep.subr.mxu1 %v4553_v58  ;;  %v335_v35 = vld [vmem:[%s8818_s0 + $0x18] sm:$0xff]  ;;  %v334_v36 = vld [vmem:[%s8818_s0 + $0x10] sm:$0xff]  ;;  %v6400_v38 = vld [vmem:[%s8819_s1 + $0x88] sm:$0xff] }
  0x22   :  { %1101 = vperm.xlu1 %5921, %v4586_v59   ;;  %1098 = vperm.xlu0 %5920, %v4585_v60   ;;  %v4529_v37 = vld [vmem:[%s8820_s2 + $0x150] sm:$0xff]  ;;  %v4544_v39 = vld [vmem:[%s8820_s2 + $0x1c8] sm:$0xff]  ;;  %v4562_v42 = vld [vmem:[%s8820_s2 + $0x258] sm:$0xf] }
  0x23   :  { %5079 = vmatpush3.msra.mxu0 %v69_v61  ;;  %5477 = vmatprep.mubr.msk.f32.mxu1 %vm5967_vm1, %v8833_v11  ;;  %v6410_v40 = vld [vmem:[%s8819_s1 + $0x68] sm:$0xff]  ;;  %v4543_v43 = vld [vmem:[%s8820_s2 + $0x1c0] sm:$0xff]  ;;  %v4542_v50 = vld [vmem:[%s8820_s2 + $0x1b8] sm:$0xff] }
  0x24   :  { %5123 = vmatpush3.msra.mxu1 %v4537_v62  ;;  %5080 = vmatprep.subr.mxu0 %v84_v63  ;;  %v4528_v41 = vld [vmem:[%s8820_s2 + $0x148] sm:$0xff]  ;;  %v6427_v44 = vld [vmem:[%s8819_s1 + $0x60] sm:$0xff] }
  0x25   :  { %5478 = vmatmul.mubr.msk.f32.gmra.mxu1 %vm106_vm2, %v6241_v0  ;;  %5124 = vmatprep.subr.mxu1 %v4552_v1  ;;  %v337_v46 = vld [vmem:[%s8818_s0 + $0x28] sm:$0xff]  ;;  %v336_v47 = vld [vmem:[%s8818_s0 + $0x20] sm:$0xff] }
  0x26   :  { %5081 = vmatpush3.msra.mxu0 %v68_v2  ;;  %196 = vmatprep.mubr.f32.mxu0 %v6254_v3  ;;  %v4527_v48 = vld [vmem:[%s8820_s2 + $0x140] sm:$0xff] }
  0x27   :  { %5125 = vmatpush3.msra.mxu1 %v4536_v4  ;;  %197 = vmatmul.mubr.f32.vlgmr.msra.gmra.mxu0 %v6262_v5  ;;  %v6444_v49 = vld [vmem:[%s8819_s1 + $0xa0] sm:$0x3] }
  0x28   :  { %5126 = vmatprep.subr.mxu1 %v4551_v6  ;;  %1107 = vperm.xlu1 %5921, %v4588_v7  }
  0x29   :  { %1104 = vperm.xlu0 %5920, %v4587_v8   ;;  %5480 = vmatprep.mubr.msk.f32.mxu1 %vm5967_vm1, %v8833_v11 }
  0x2a   :  { %5127 = vmatpush3.msra.mxu1 %v4535_v9  ;;  %201 = vmatprep.mubr.f32.mxu0 %v6283_v10 }
  0x2b   :  { %5481 = vmatmul.mubr.msk.f32.gmra.mxu1 %vm106_vm2, %v6288_v12  ;;  %5128 = vmatprep.subr.mxu1 %v4550_v13 }
  0x2c   :  { %5129 = vmatpush3.msra.mxu1 %v4534_v14  ;;  %202 = vmatmul.mubr.f32.gmra.mxu0 %v6301_v15 }
  0x2d   :  { %5130 = vmatprep.subr.mxu1 %v4549_v16  ;;  %1113 = vperm.xlu1 %5921, %v4590_v17  }
  0x2e   :  { %1110 = vperm.xlu0 %5920, %v4589_v18   ;;  %5483 = vmatprep.mubr.msk.f32.mxu1 %vm5967_vm1, %v8833_v11 }
  0x2f   :  { %5131 = vmatpush3.msra.mxu1 %v4533_v19  ;;  %206 = vmatprep.mubr.f32.mxu0 %v6322_v20 }
  0x30   :  { %5484 = vmatmul.mubr.msk.f32.gmra.mxu1 %vm106_vm2, %v6327_v21  ;;  %5132 = vmatprep.subr.mxu1 %v4548_v22 }
  0x31   :  { %5133 = vmatpush3.msra.mxu1 %v4532_v23  ;;  %207 = vmatmul.mubr.f32.gmra.mxu0 %v6340_v24 }
  0x32   :  { %5134 = vmatprep.subr.mxu1 %v4547_v25  ;;  %396 = vperm.xlu1 %5921, %v333_v26  }
  0x33   :  { %393 = vperm.xlu0 %5920, %v332_v27   ;;  %5486 = vmatprep.mubr.msk.f32.mxu1 %vm5967_vm1, %v8833_v11 }
  0x34   :  { %5135 = vmatpush3.msra.mxu1 %v4531_v28  ;;  %211 = vmatprep.mubr.f32.mxu0 %v6361_v29 }
  0x35   :  { %5487 = vmatmul.mubr.msk.f32.gmra.mxu1 %vm106_vm2, %v6366_v30  ;;  %5136 = vmatprep.subr.mxu1 %v4546_v31 }
  0x36   :  { %5137 = vmatpush3.msra.mxu1 %v4530_v32  ;;  %212 = vmatmul.mubr.f32.gmra.mxu0 %v6379_v33 }
  0x37   :  { %5138 = vmatprep.subr.mxu1 %v4545_v34  ;;  %402 = vperm.xlu1 %5921, %v335_v35  }
  0x38   :  { %399 = vperm.xlu0 %5920, %v334_v36   ;;  %5489 = vmatprep.mubr.msk.f32.mxu1 %vm5967_vm1, %v8833_v11 }
  0x39   :  { %5139 = vmatpush3.msra.mxu1 %v4529_v37  ;;  %5495 = vmatprep.subr.mxu0 %v8833_v11 }
  0x3a   :  { %5490 = vmatmul.mubr.msk.f32.gmra.mxu1 %vm106_vm2, %v6400_v38  ;;  %5140 = vmatprep.subr.mxu1 %v4544_v39 }
  0x3b   :  { %216 = vmatprep.mubr.f32.mxu0 %v6410_v40  ;;  %5141 = vmatpush3.msra.mxu1 %v4528_v41 }
  0x3c   :  { %5496 = vmatpush3.msk.msra.mxu0 %vm128_vm0, %v4562_v42  ;;  %5142 = vmatprep.subr.mxu1 %v4543_v43 }
  0x3d   :  { %217 = vmatmul.mubr.f32.gmra.mxu0 %v6427_v44  ;;  %408 = vperm.xlu1 %5921, %v337_v46  }
  0x3e   :  { %18 = vsyncpa [#allocation3], 0  ;;  %405 = vperm.xlu0 %5920, %v336_v47   ;;  %5492 = vmatprep.mubr.msk.f32.mxu1 %vm5967_vm1, %v8833_v11  ;;  %v6454_v51 = vld [vmem:[%s8819_s1 + $0x80] sm:$0xff]  ;;  %v4526_v52 = vld [vmem:[%s8820_s2 + $0x138] sm:$0xff]  ;;  %v8832_v27 = vlaneseq  ;;  %vm1415_vm3 = vcmask 408576   ;;  %vm1596_vm6 = vcmask 1041408  }
  0x3f   :  { %5143 = vmatpush3.msra.mxu1 %v4527_v48  ;;  %5497 = vmatprep.subr.mxu0 %v8833_v11  ;;  %v4561_v53 = vld [vmem:[%s8820_s2 + $0x250] sm:$0xff]  ;;  %v6471_v55 = vld [vmem:[%s8819_s1 + $0x78] sm:$0xff]  ;;  %v4560_v59 = vld [vmem:[%s8820_s2 + $0x248] sm:$0xff]  ;;  %s5968_s14 = smov [#allocation2]  }
  0x40   :  { %v4541_v54 = vld [vmem:[%s8820_s2 + $0x1b0] sm:$0xff]  ;;  %5493 = vmatmul.mubr.msk.f32.gmra.mxu1 %vm106_vm2, %v6444_v49  ;;  %5144 = vmatprep.subr.mxu1 %v4542_v50  ;;  %v339_v56 = vld [vmem:[%s8818_s0 + $0x38] sm:$0xff]  ;;  %v4559_v61 = vld [vmem:[%s8820_s2 + $0x240] sm:$0xff]  ;;  %s4449_s15 = sshll.u32 %s5968_s14, 4  ;;  %s4450_s15 = int_to_ptr.vmem [resolvable:$true] %s4449_s15 }
  0x41   :  { %221 = vmatprep.mubr.f32.mxu0 %v6454_v51  ;;  %5145 = vmatpush3.msra.mxu1 %v4526_v52  ;;  %v338_v57 = vld [vmem:[%s8818_s0 + $0x30] sm:$0xff]  ;;  %v64_v60 = vld [vmem:[%s8819_s1 + $0x98] sm:$0x3]  ;;  %v341_v62 = vld [vmem:[%s8818_s0 + $0x48] sm:$0xff]  ;;  %p5948_p1 = scmp.lt.s32.totalorder %s4450_s15, %s4450_s15 }
  0x42   :  { %5498 = vmatpush3.msra.mxu0 %v4561_v53  ;;  %5146 = vmatprep.subr.mxu1 %v4541_v54  ;;  %v4525_v58 = vld [vmem:[%s8820_s2 + $0x130] sm:$0xff]  ;;  %v340_v1 = vld [vmem:[%s8818_s0 + $0x40] sm:$0xff]  ;;  %v4558_v2 = vld [vmem:[%s8820_s2 + $0x238] sm:$0xff] }
  0x43   :  { %222 = vmatmul.mubr.f32.gmra.mxu0 %v6471_v55  ;;  %5499 = vmatprep.subr.mxu0 %v8833_v11  ;;  %v63_v63 = vld [vmem:[%s8819_s1 + $0x90] sm:$0x3]  ;;  %v343_v4 = vld [vmem:[%s8818_s0 + $0x58] sm:$0xff]  ;;  %v345_v6 = vld [vmem:[%s8818_s0 + $0x68] sm:$0xff] }
  0x44   :  { %414 = vperm.xlu1 %5921, %v339_v56   ;;  %411 = vperm.xlu0 %5920, %v338_v57   ;;  %v344_v7 = vld [vmem:[%s8818_s0 + $0x60] sm:$0xff]  ;;  %v346_v8 = vld [vmem:[%s8818_s0 + $0x70] sm:$0xff]  ;;  %v4592_v13 = vld [vmem:[%s8818_s0 + $0x288] sm:$0xff] }
  0x45   :  { %5147 = vmatpush3.msra.mxu1 %v4525_v58  ;;  %858 = vmatprep.mubr.f32.mxu1 %v6254_v3  ;;  %v4557_v3 = vld [vmem:[%s8820_s2 + $0x230] sm:$0xff]  ;;  %v348_v9 = vld [vmem:[%s8818_s0 + $0x80] sm:$0xff]  ;;  %v351_v14 = vld [vmem:[%s8818_s0 + $0x98] sm:$0xff] }
  0x46   :  { %5500 = vmatpush3.msra.mxu0 %v4560_v59  ;;  %859 = vmatmul.mubr.f32.vlgmr.msra.gmra.mxu1 %v6262_v5  ;;  %v342_v5 = vld [vmem:[%s8818_s0 + $0x50] sm:$0xff]  ;;  %v352_v16 = vld [vmem:[%s8818_s0 + $0xa0] sm:$0xff]  ;;  %v4594_v17 = vld [vmem:[%s8818_s0 + $0x298] sm:$0xff] }
  0x47   :  { %5501 = vmatprep.subr.mxu0 %v8833_v11  ;;  %226 = vmatprep.mubr.f32.mxu0 %v64_v60  ;;  %v353_v18 = vld [vmem:[%s8818_s0 + $0xa8] sm:$0xff]  ;;  %v4595_v19 = vld [vmem:[%s8818_s0 + $0x2a0] sm:$0xff]  ;;  %v355_v22 = vld [vmem:[%s8818_s0 + $0xb8] sm:$0xff] }
  0x48   :  { %5502 = vmatpush3.msra.mxu0 %v4559_v61  ;;  %420 = vperm.xlu1 %5921, %v341_v62   ;;  %v4597_v23 = vld [vmem:[%s8818_s0 + $0x2b0] sm:$0xff]  ;;  %v4598_v25 = vld [vmem:[%s8818_s0 + $0x2b8] sm:$0xff]  ;;  %v357_v26 = vld [vmem:[%s8818_s0 + $0xc8] sm:$0xff] }
  0x49   :  { %227 = vmatmul.mubr.f32.gmra.mxu0 %v63_v63  ;;  %5503 = vmatprep.subr.mxu0 %v8833_v11  ;;  %v4599_v28 = vld [vmem:[%s8818_s0 + $0x2c0] sm:$0xff]  ;;  %v4600_v32 = vld [vmem:[%s8818_s0 + $0x2c8] sm:$0xff]  ;;  %v359_v34 = vld [vmem:[%s8818_s0 + $0xd8] sm:$0xff] }
  0x4a   :  { %417 = vperm.xlu0 %5920, %v340_v1   ;;  %863 = vmatprep.mubr.f32.mxu1 %v6283_v10  ;;  %v4591_v10 = vld [vmem:[%s8818_s0 + $0x280] sm:$0xff]  ;;  %v4601_v37 = vld [vmem:[%s8818_s0 + $0x2d0] sm:$0xff]  ;;  %v4602_v41 = vld [vmem:[%s8818_s0 + $0x2d8] sm:$0xff] }
  0x4b   :  { %5504 = vmatpush3.msra.mxu0 %v4558_v2  ;;  %864 = vmatmul.mubr.f32.gmra.mxu1 %v6301_v15  ;;  %v4593_v15 = vld [vmem:[%s8818_s0 + $0x290] sm:$0xff]  ;;  %v360_v39 = vld [vmem:[%s8818_s0 + $0xe0] sm:$0xff]  ;;  %v361_v43 = vld [vmem:[%s8818_s0 + $0xe8] sm:$0xff] }
  0x4c   :  { %5505 = vmatprep.subr.mxu0 %v8833_v11  ;;  %5507 = vmatprep.mubr.msk.f32.mxu0 %vm5967_vm1, %v8833_v11  ;;  %v4603_v46 = vld [vmem:[%s8818_s0 + $0x2e0] sm:$0xff]  ;;  %v362_v48 = vld [vmem:[%s8818_s0 + $0xf0] sm:$0xff]  ;;  %v4604_v50 = vld [vmem:[%s8818_s0 + $0x2e8] sm:$0xff] }
  0x4d   :  { %5506 = vmatpush3.msra.mxu0 %v4557_v3  ;;  %426 = vperm.xlu1 %5921, %v343_v4   ;;  %v363_v52 = vld [vmem:[%s8818_s0 + $0xf8] sm:$0xff]  ;;  %v4605_v53 = vld [vmem:[%s8818_s0 + $0x2f0] sm:$0xff]  ;;  %v365_v58 = vld [vmem:[%s8818_s0 + $0x108] sm:$0xff] }
  0x4e   :  { %5508 = vmatmul.mubr.msk.f32.vlgmr.msra.gmra.mxu0 %vm106_vm2, %v6180_v45  ;;  %423 = vperm.xlu0 %5920, %v342_v5   ;;  %v347_v45 = vld [vmem:[%s8818_s0 + $0x78] sm:$0xff]  ;;  %v4607_v61 = vld [vmem:[%s8818_s0 + $0x300] sm:$0xff]  ;;  %v366_v62 = vld [vmem:[%s8818_s0 + $0x110] sm:$0xff] }
  0x4f   :  { %868 = vmatprep.mubr.f32.mxu1 %v6322_v20  ;;  %5510 = vmatprep.mubr.msk.f32.mxu0 %vm5967_vm1, %v8833_v11  ;;  %v354_v20 = vld [vmem:[%s8818_s0 + $0xb0] sm:$0xff]  ;;  %v4606_v57 = vld [vmem:[%s8818_s0 + $0x2f8] sm:$0xff]  ;;  %v4608_v1 = vld [vmem:[%s8818_s0 + $0x308] sm:$0xff] }
  0x50   :  { %869 = vmatmul.mubr.f32.gmra.mxu1 %v6340_v24  ;;  %v356_v24 = vld [vmem:[%s8818_s0 + $0xc0] sm:$0xff]  ;;  %v367_v3 = vld [vmem:[%s8818_s0 + $0x118] sm:$0xff]  ;;  %v4609_v4 = vld [vmem:[%s8818_s0 + $0x310] sm:$0xff] }
  0x51   :  { %432 = vperm.xlu1 %5921, %v345_v6   ;;  %873 = vmatprep.mubr.f32.mxu1 %v6361_v29  ;;  %v358_v29 = vld [vmem:[%s8818_s0 + $0xd0] sm:$0xff]  ;;  %v368_v5 = vld [vmem:[%s8818_s0 + $0x120] sm:$0xff] }
  0x52   :  { %5511 = vmatmul.mubr.msk.f32.gmra.mxu0 %vm106_vm2, %v6241_v0  ;;  %429 = vperm.xlu0 %5920, %v344_v7   ;;  %v349_v0 = vld [vmem:[%s8818_s0 + $0x88] sm:$0xff] }
  0x53   :  { %5513 = vmatprep.mubr.msk.f32.mxu0 %vm5967_vm1, %v8833_v11 }
  0x54   :  { %874 = vmatmul.mubr.f32.gmra.mxu1 %v6379_v33 }
  0x55   :  { %438 = vperm.xlu1 %5921, %v347_v45   ;;  %878 = vmatprep.mubr.f32.mxu1 %v6410_v40  ;;  %v4610_v45 = vld [vmem:[%s8818_s0 + $0x318] sm:$0xff] }
  0x56   :  { %5514 = vmatmul.mubr.msk.f32.gmra.mxu0 %vm106_vm2, %v6288_v12  ;;  %435 = vperm.xlu0 %5920, %v346_v8   ;;  %v350_v12 = vld [vmem:[%s8818_s0 + $0x90] sm:$0xff]  ;;  %v369_v8 = vld [vmem:[%s8818_s0 + $0x128] sm:$0xff] }
  0x57   :  { %5516 = vmatprep.mubr.msk.f32.mxu0 %vm5967_vm1, %v8833_v11 }
  0x58   :  { %879 = vmatmul.mubr.f32.gmra.mxu1 %v6427_v44 }
  0x59   :  { %444 = vperm.xlu1 %5921, %v349_v0   ;;  %883 = vmatprep.mubr.f32.mxu1 %v6454_v51 }
  0x5a   :  { %5517 = vmatmul.mubr.msk.f32.gmra.mxu0 %vm106_vm2, %v6327_v21  ;;  %441 = vperm.xlu0 %5920, %v348_v9   ;;  %v4596_v21 = vld [vmem:[%s8818_s0 + $0x2a8] sm:$0xff] }
  0x5b   :  { %5519 = vmatprep.mubr.msk.f32.mxu0 %vm5967_vm1, %v8833_v11 }
  0x5c   :  { %884 = vmatmul.mubr.f32.gmra.mxu1 %v6471_v55  ;;  %v364_v55 = vld [vmem:[%s8818_s0 + $0x100] sm:$0xff] }
  0x5d   :  { %1116 = vperm.xlu1 %5921, %v4591_v10   ;;  %888 = vmatprep.mubr.f32.mxu1 %v64_v60  ;;  %v4611_v10 = vld [vmem:[%s8818_s0 + $0x320] sm:$0xff] }
  0x5e   :  { %5520 = vmatmul.mubr.msk.f32.gmra.mxu0 %vm106_vm2, %v6366_v30  ;;  %447 = vperm.xlu0 %5920, %v350_v12   ;;  %v6631_v30 = vand.u32 127, %v8832_v27  ;;  %v370_v12 = vld [vmem:[%s8818_s0 + $0x130] sm:$0xff] }
  0x5f   :  { %5522 = vmatprep.mubr.msk.f32.mxu0 %vm5967_vm1, %v8833_v11 }
  0x60   :  { %889 = vmatmul.mubr.f32.gmra.mxu1 %v63_v63 }
  0x61   :  { %1119 = vperm.xlu1 %5921, %v4592_v13  }
  0x62   :  { %5523 = vmatmul.mubr.msk.f32.gmra.mxu0 %vm106_vm2, %v6400_v38  ;;  %450 = vperm.xlu0 %5920, %v351_v14   ;;  %v4612_v14 = vld [vmem:[%s8818_s0 + $0x328] sm:$0xff] }
  0x63   :  { %5525 = vmatprep.mubr.msk.f32.mxu0 %vm5967_vm1, %v8833_v11 }
  0x65   :  { %1122 = vperm.xlu1 %5921, %v4593_v15  }
  0x66   :  { %5526 = vmatmul.mubr.msk.f32.gmra.mxu0 %vm106_vm2, %v6444_v49  ;;  %453 = vperm.xlu0 %5920, %v352_v16   ;;  %v371_v16 = vld [vmem:[%s8818_s0 + $0x138] sm:$0xff] }
  0x69   :  { %1125 = vperm.xlu1 %5921, %v4594_v17   ;;  %v4613_v17 = vld [vmem:[%s8818_s0 + $0x330] sm:$0xff] }
  0x6a   :  { %456 = vperm.xlu0 %5920, %v353_v18   ;;  %v372_v18 = vld [vmem:[%s8818_s0 + $0x140] sm:$0xff] }
  0x6d   :  { %1128 = vperm.xlu1 %5921, %v4595_v19  }
  0x6e   :  { %459 = vperm.xlu0 %5920, %v354_v20  }
  0x71   :  { %1131 = vperm.xlu1 %5921, %v4596_v21   ;;  %v4614_v21 = vld [vmem:[%s8818_s0 + $0x338] sm:$0xff] }
  0x72   :  { %462 = vperm.xlu0 %5920, %v355_v22   ;;  %v373_v22 = vld [vmem:[%s8818_s0 + $0x148] sm:$0xff] }
  0x75   :  { %1134 = vperm.xlu1 %5921, %v4597_v23  }
  0x76   :  { %465 = vperm.xlu0 %5920, %v356_v24  }
  0x79   :  { %1137 = vperm.xlu1 %5921, %v4598_v25   ;;  %v4615_v25 = vld [vmem:[%s8818_s0 + $0x340] sm:$0xff] }
  0x7a   :  { %468 = vperm.xlu0 %5920, %v357_v26   ;;  %v374_v26 = vld [vmem:[%s8818_s0 + $0x150] sm:$0xff] }
  0x7d   :  { %1140 = vperm.xlu1 %5921, %v4599_v28   ;;  %v6633_v31 = vpop.permute.xlu1 %1062  ;;  %v4616_v28 = vld [vmem:[%s8818_s0 + $0x348] sm:$0xff] }
  0x7e   :  { %471 = vperm.xlu0 %5920, %v358_v29   ;;  %v1057_v33 = vpop.permute.xlu0 %1056  ;;  %vm1237_vm9 = vcmp.eq.s32.totalorder %v6633_v31, %v6631_v30 }
  0x7f   :  { %vm1235_vm4 = vcmp.eq.s32.totalorder %v1057_v33, %v6631_v30  ;;  %v375_v33 = vld [vmem:[%s8818_s0 + $0x158] sm:$0xff] }
  0x80   :  { %v4631_v35 = vsel %vm1235_vm4, 1.0, %v8833_v11 }
  0x81   :  { %1143 = vperm.xlu1 %5921, %v4600_v32   ;;  %v6643_v36 = vpop.permute.xlu1 %1065  ;;  %5542 = vmatprep.mubr.msk.f32.mxu0 %vm1415_vm3, %v4631_v35 }
  0x82   :  { %474 = vperm.xlu0 %5920, %v359_v34   ;;  %v6649_v38 = vpop.permute.xlu0 %1059  ;;  %v4617_v34 = vld [vmem:[%s8818_s0 + $0x350] sm:$0xff]  ;;  %vm1238_vm11 = vcmp.eq.s32.totalorder %v6643_v36, %v6631_v30 }
  0x83   :  { %vm1236_vm7 = vcmp.eq.s32.totalorder %v6649_v38, %v6631_v30 }
  0x85   :  { %1146 = vperm.xlu1 %5921, %v4601_v37   ;;  %v6654_v40 = vpop.permute.xlu1 %1071  ;;  %v376_v37 = vld [vmem:[%s8818_s0 + $0x160] sm:$0xff] }
  0x86   :  { %477 = vperm.xlu0 %5920, %v360_v39   ;;  %v6659_v42 = vpop.permute.xlu0 %1068  ;;  %vm1240_vm15 = vcmp.eq.s32.totalorder %v6654_v40, %v6631_v30 }
  0x87   :  { %vm1239_vm13 = vcmp.eq.s32.totalorder %v6659_v42, %v6631_v30 }
  0x89   :  { %1149 = vperm.xlu1 %5921, %v4602_v41   ;;  %v6664_v44 = vpop.permute.xlu1 %1077  ;;  %v4618_v41 = vld [vmem:[%s8818_s0 + $0x358] sm:$0xff] }
  0x8a   :  { %480 = vperm.xlu0 %5920, %v361_v43   ;;  %v6669_v47 = vpop.permute.xlu0 %1074  ;;  %v377_v43 = vld [vmem:[%s8818_s0 + $0x168] sm:$0xff] }
  0x8d   :  { %1152 = vperm.xlu1 %5921, %v4603_v46   ;;  %v6674_v49 = vpop.permute.xlu1 %1083 }
  0x8e   :  { %483 = vperm.xlu0 %5920, %v362_v48   ;;  %v6679_v51 = vpop.permute.xlu0 %1080 }
  0x91   :  { %1155 = vperm.xlu1 %5921, %v4604_v50   ;;  %v4619_v50 = vld [vmem:[%s8818_s0 + $0x360] sm:$0xff] }
  0x92   :  { %486 = vperm.xlu0 %5920, %v363_v52   ;;  %v6687_v54 = vpop.permute.xlu1 %1089  ;;  %v378_v52 = vld [vmem:[%s8818_s0 + $0x170] sm:$0xff] }
  0x93   :  { %8844 = vst [vmem:[#allocation5_spill] sm:$0xff] %v6687_v54  ;;  %v6692_v56 = vpop.permute.xlu0 %1086 }
  0x95   :  { %1158 = vperm.xlu1 %5921, %v4605_v53  }
  0x96   :  { %489 = vperm.xlu0 %5920, %v364_v55  }
  0x97   :  { %v6700_v59 = vpop.permute.xlu1 %1095 }
  0x98   :  { %8845 = vst [vmem:[#allocation6_spill] sm:$0xff] %v6700_v59  ;;  %v6702_v60 = vpop.permute.xlu0 %1092 }
  0x99   :  { %8846 = vst [vmem:[#allocation7_spill] sm:$0xff] %v6702_v60  ;;  %1161 = vperm.xlu1 %5921, %v4606_v57   ;;  %v4620_v57 = vld [vmem:[%s8818_s0 + $0x368] sm:$0xff] }
  0x9a   :  { %492 = vperm.xlu0 %5920, %v365_v58   ;;  %v379_v58 = vld [vmem:[%s8818_s0 + $0x178] sm:$0xff] }
  0x9d   :  { %1164 = vperm.xlu1 %5921, %v4607_v61   ;;  %v6710_v63 = vpop.permute.xlu1 %1101  ;;  %v6715_v2 = vpop.permute.xlu0 %1098 }
  0x9e   :  { %8847 = vst [vmem:[#allocation8_spill] sm:$0xff] %v6710_v63  ;;  %495 = vperm.xlu0 %5920, %v366_v62   ;;  %8848 = vst [vmem:[#allocation9_spill] sm:$0xff] %v6715_v2 }
  0xa1   :  { %1167 = vperm.xlu1 %5921, %v4608_v1   ;;  %v4621_v1 = vld [vmem:[%s8818_s0 + $0x370] sm:$0xff] }
  0xa2   :  { %498 = vperm.xlu0 %5920, %v367_v3   ;;  %v380_v3 = vld [vmem:[%s8818_s0 + $0x180] sm:$0xff] }
  0xa3   :  { %v6726_v6 = vpop.permute.xlu1 %1107 }
  0xa4   :  { %8849 = vst [vmem:[#allocation10_spill] sm:$0xff] %v6726_v6  ;;  %v6728_v7 = vpop.permute.xlu0 %1104 }
  0xa5   :  { %8850 = vst [vmem:[#allocation11_spill] sm:$0xff] %v6728_v7  ;;  %1170 = vperm.xlu1 %5921, %v4609_v4  }
  0xa6   :  { %501 = vperm.xlu0 %5920, %v368_v5  }
  0xa8   :  { %v6736_v0 = vpop.permute.xlu1 %1113 }
  0xa9   :  { %8851 = vst [vmem:[#allocation12_spill] sm:$0xff] %v6736_v0  ;;  %1173 = vperm.xlu1 %5921, %v4610_v45   ;;  %v6738_v9 = vpop.permute.xlu0 %1110  ;;  %v4622_v45 = vld [vmem:[%s8818_s0 + $0x378] sm:$0xff]  ;;  %v4871_v0 = vld [vmem:[%s8818_s0 + $0x420] sm:$0xff] }
  0xaa   :  { %8852 = vst [vmem:[#allocation13_spill] sm:$0xff] %v6738_v9  ;;  %504 = vperm.xlu0 %5920, %v369_v8   ;;  %v381_v8 = vld [vmem:[%s8818_s0 + $0x188] sm:$0xff] }
  0xad   :  { %1176 = vperm.xlu1 %5921, %v4611_v10   ;;  %v6746_v13 = vpop.permute.xlu1 %396 }
  0xae   :  { %8853 = vst [vmem:[#allocation14_spill] sm:$0xff] %v6746_v13  ;;  %507 = vperm.xlu0 %5920, %v370_v12   ;;  %v6751_v15 = vpop.permute.xlu0 %393 }
  0xaf   :  { %8854 = vst [vmem:[#allocation15_spill] sm:$0xff] %v6751_v15 }
  0xb1   :  { %1179 = vperm.xlu1 %5921, %v4612_v14  }
  0xb2   :  { %510 = vperm.xlu0 %5920, %v371_v16   ;;  %v6762_v19 = vpop.permute.xlu1 %402  ;;  %v4623_v16 = vld [vmem:[%s8818_s0 + $0x380] sm:$0xff] }
  0xb3   :  { %8855 = vst [vmem:[#allocation16_spill] sm:$0xff] %v6762_v19  ;;  %v6764_v20 = vpop.permute.xlu0 %399  ;;  %v4869_v19 = vld [vmem:[%s8818_s0 + $0x410] sm:$0xff] }
  0xb4   :  { %8856 = vst [vmem:[#allocation17_spill] sm:$0xff] %v6764_v20 }
  0xb5   :  { %1182 = vperm.xlu1 %5921, %v4613_v17   ;;  %v382_v17 = vld [vmem:[%s8818_s0 + $0x190] sm:$0xff] }
  0xb6   :  { %513 = vperm.xlu0 %5920, %v372_v18  }
  0xb8   :  { %v6772_v23 = vpop.permute.xlu1 %408 }
  0xb9   :  { %1185 = vperm.xlu1 %5921, %v4614_v21   ;;  %8857 = vst [vmem:[#allocation18_spill] sm:$0xff] %v6772_v23  ;;  %v6774_v24 = vpop.permute.xlu0 %405 }
  0xba   :  { %8858 = vst [vmem:[#allocation19_spill] sm:$0xff] %v6774_v24  ;;  %516 = vperm.xlu0 %5920, %v373_v22  }
  0xbd   :  { %1188 = vperm.xlu1 %5921, %v4615_v25  }
  0xbe   :  { %519 = vperm.xlu0 %5920, %v374_v26   ;;  %v4624_v26 = vld [vmem:[%s8818_s0 + $0x388] sm:$0xff] }
  0xbf   :  { %v6785_v29 = vpop.permute.xlu1 %414  ;;  %v6787_v32 = vpop.permute.xlu0 %411 }
  0xc0   :  { %8859 = vst [vmem:[#allocation20_spill] sm:$0xff] %v6785_v29  ;;  %8860 = vst [vmem:[#allocation21_spill] sm:$0xff] %v6787_v32 }
  0xc1   :  { %1191 = vperm.xlu1 %5921, %v4616_v28   ;;  %v383_v28 = vld [vmem:[%s8818_s0 + $0x198] sm:$0xff] }
  0xc2   :  { %522 = vperm.xlu0 %5920, %v375_v33  }
  0xc3   :  { %v6795_v35 = vpop.permute.xlu1 %420 }
  0xc4   :  { %8861 = vst [vmem:[#allocation22_spill] sm:$0xff] %v6795_v35 }
  0xc5   :  { %v6800_v39 = vpop.permute.xlu0 %417  ;;  %1194 = vperm.xlu1 %5921, %v4617_v34  }
  0xc6   :  { %8862 = vst [vmem:[#allocation23_spill] sm:$0xff] %v6800_v39  ;;  %525 = vperm.xlu0 %5920, %v376_v37   ;;  %v4625_v37 = vld [vmem:[%s8818_s0 + $0x390] sm:$0xff]  ;;  %v4867_v39 = vld [vmem:[%s8818_s0 + $0x400] sm:$0xff] }
  0xc8   :  { %v6808_v46 = vpop.permute.xlu1 %426 }
  0xc9   :  { %8863 = vst [vmem:[#allocation24_spill] sm:$0xff] %v6808_v46  ;;  %v6810_v48 = vpop.permute.xlu0 %423  ;;  %1197 = vperm.xlu1 %5921, %v4618_v41   ;;  %v384_v41 = vld [vmem:[%s8818_s0 + $0x1a0] sm:$0xff]  ;;  %v4865_v46 = vld [vmem:[%s8818_s0 + $0x3f0] sm:$0xff] }
  0xca   :  { %8864 = vst [vmem:[#allocation25_spill] sm:$0xff] %v6810_v48  ;;  %528 = vperm.xlu0 %5920, %v377_v43  }
  0xcc   :  { %v6818_v53 = vpop.permute.xlu1 %432 }
  0xcd   :  { %8865 = vst [vmem:[#allocation26_spill] sm:$0xff] %v6818_v53  ;;  %v6820_v55 = vpop.permute.xlu0 %429  ;;  %1200 = vperm.xlu1 %5921, %v4619_v50  }
  0xce   :  { %8866 = vst [vmem:[#allocation27_spill] sm:$0xff] %v6820_v55  ;;  %531 = vperm.xlu0 %5920, %v378_v52  }
  0xd0   :  { %v6828_v61 = vpop.permute.xlu1 %438 }
  0xd1   :  { %8867 = vst [vmem:[#allocation28_spill] sm:$0xff] %v6828_v61  ;;  %v6830_v62 = vpop.permute.xlu0 %435  ;;  %1203 = vperm.xlu1 %5921, %v4620_v57   ;;  %v4626_v57 = vld [vmem:[%s8818_s0 + $0x398] sm:$0xff] }
  0xd2   :  { %8868 = vst [vmem:[#allocation29_spill] sm:$0xff] %v6830_v62  ;;  %534 = vperm.xlu0 %5920, %v379_v58   ;;  %v385_v58 = vld [vmem:[%s8818_s0 + $0x1a8] sm:$0xff] }
  0xd4   :  { %v6838_v4 = vpop.permute.xlu1 %444 }
  0xd5   :  { %8869 = vst [vmem:[#allocation30_spill] sm:$0xff] %v6838_v4  ;;  %v6840_v5 = vpop.permute.xlu0 %441  ;;  %1206 = vperm.xlu1 %5921, %v4621_v1  }
  0xd6   :  { %8870 = vst [vmem:[#allocation31_spill] sm:$0xff] %v6840_v5  ;;  %537 = vperm.xlu0 %5920, %v380_v3  }
  0xd8   :  { %v1117_v10 = vpop.permute.xlu1 %1116 }
  0xd9   :  { %vm1255_vm5 = vcmp.eq.s32.totalorder %v1117_v10, %v6631_v30  ;;  %v6849_v12 = vpop.permute.xlu0 %447  ;;  %1209 = vperm.xlu1 %5921, %v4622_v45  }
  0xda   :  { %8871 = vst [vmem:[#allocation32_spill] sm:$0xff] %v6849_v12  ;;  %v4651_v14 = vsel %vm1255_vm5, 1.0, %v8833_v11  ;;  %540 = vperm.xlu0 %5920, %v381_v8   ;;  %vm1241_vm5 = vcmp.eq.s32.totalorder %v6669_v47, %v6631_v30 }
  0xdb   :  { %5572 = vmatprep.mubr.msk.f32.mxu1 %vm1415_vm3, %v4651_v14  ;;  %v298_v18 = vpop.f32.mrf.mxu1  ;;  %v4627_v14 = vld [vmem:[%s8818_s0 + $0x3a0] sm:$0xff] }
  0xdc   :  { %v6859_v21 = vpop.permute.xlu1 %1119 }
  0xdd   :  { %v6861_v22 = vpop.permute.xlu0 %450  ;;  %1212 = vperm.xlu1 %5921, %v4623_v16   ;;  %v5476_v25 = vpop.f32.mrf.mxu1  ;;  %vm1256_vm8 = vcmp.eq.s32.totalorder %v6859_v21, %v6631_v30 }
  0xde   :  { %8872 = vst [vmem:[#allocation33_spill] sm:$0xff] %v6861_v22  ;;  %543 = vperm.xlu0 %5920, %v382_v17   ;;  %v386_v17 = vld [vmem:[%s8818_s0 + $0x1b0] sm:$0xff] }
  0xe0   :  { %v6869_v33 = vpop.permute.xlu1 %1122 }
  0xe1   :  { %v6871_v34 = vpop.permute.xlu0 %453  ;;  %1215 = vperm.xlu1 %5921, %v4624_v26   ;;  %vm1257_vm10 = vcmp.eq.s32.totalorder %v6869_v33, %v6631_v30 }
  0xe2   :  { %8873 = vst [vmem:[#allocation34_spill] sm:$0xff] %v6871_v34  ;;  %546 = vperm.xlu0 %5920, %v383_v28  }
  0xe4   :  { %v6879_v43 = vpop.permute.xlu1 %1125 }
  0xe5   :  { %v6881_v50 = vpop.permute.xlu0 %456  ;;  %1218 = vperm.xlu1 %5921, %v4625_v37   ;;  %v303_v52 = vpop.f32.mrf.mxu1  ;;  %vm1258_vm12 = vcmp.eq.s32.totalorder %v6879_v43, %v6631_v30 }
  0xe6   :  { %8874 = vst [vmem:[#allocation35_spill] sm:$0xff] %v6881_v50  ;;  %549 = vperm.xlu0 %5920, %v384_v41  }
  0xe7   :  { %v5082_v1 = vpop.f32.mrf.mxu0  ;;  %v5479_v3 = vpop.f32.mrf.mxu1 }
  0xe8   :  { %v6889_v45 = vpop.permute.xlu1 %1128  ;;  %v387_v3 = vld [vmem:[%s8818_s0 + $0x1b8] sm:$0xff] }
  0xe9   :  { %v6891_v8 = vpop.permute.xlu0 %459  ;;  %1221 = vperm.xlu1 %5921, %v4626_v57   ;;  %v5083_v10 = vpop.f32.mrf.mxu0  ;;  %vm1259_vm14 = vcmp.eq.s32.totalorder %v6889_v45, %v6631_v30  ;;  %v4890_v45 = vld [vmem:[%s8818_s0 + $0x4b8] sm:$0xff] }
  0xea   :  { %8875 = vst [vmem:[#allocation36_spill] sm:$0xff] %v6891_v8  ;;  %552 = vperm.xlu0 %5920, %v385_v58   ;;  %v5084_v16 = vadd.f32 %v5083_v10, %v5082_v1  ;;  %v4628_v58 = vld [vmem:[%s8818_s0 + $0x3a8] sm:$0xff] }
  0xeb   :  { %v308_v25 = vpop.f32.mrf.mxu1 }
  0xec   :  { %v6899_v26 = vpop.permute.xlu1 %1131  ;;  %v6901_v28 = vadd.f32 %v5084_v16, %v298_v18  ;;  %v5085_v37 = vpop.f32.mrf.mxu0 }
  0xed   :  { %v6903_v41 = vpop.permute.xlu0 %462  ;;  %1224 = vperm.xlu1 %5921, %v4627_v14   ;;  %v5482_v57 = vpop.f32.mrf.mxu1  ;;  %vm1260_vm4 = vcmp.eq.s32.totalorder %v6899_v26, %v6631_v30 }
  0xee   :  { %8876 = vst [vmem:[#allocation37_spill] sm:$0xff] %v6901_v28  ;;  %8877 = vst [vmem:[#allocation38_spill] sm:$0xff] %v6903_v41  ;;  %555 = vperm.xlu0 %5920, %v386_v17   ;;  %v5086_v1 = vpop.f32.mrf.mxu0  ;;  %v4629_v17 = vld [vmem:[%s8818_s0 + $0x3b0] sm:$0xff]  ;;  %v388_v41 = vld [vmem:[%s8818_s0 + $0x1c0] sm:$0xff] }
  0xef   :  { %v5087_v10 = vadd.f32 %v5086_v1, %v5085_v37  ;;  %v4880_v28 = vld [vmem:[%s8818_s0 + $0x468] sm:$0xff] }
  0xf0   :  { %v6911_v27 = vpop.permute.xlu1 %1134  ;;  %v313_v18 = vpop.f32.mrf.mxu1 }
  0xf1   :  { %v6913_v16 = vpop.permute.xlu0 %465  ;;  %1227 = vperm.xlu1 %5921, %v4628_v58   ;;  %v6915_v11 = vadd.f32 %v5087_v10, %v303_v52  ;;  %v5088_v14 = vpop.f32.mrf.mxu0  ;;  %v4630_v58 = vld [vmem:[%s8818_s0 + $0x3b8] sm:$0xff] }
  0xf2   :  { %8878 = vst [vmem:[#allocation39_spill] sm:$0xff] %v6913_v16  ;;  %558 = vperm.xlu0 %5920, %v387_v3   ;;  %v5485_v57 = vpop.f32.mrf.mxu1 }
  0xf3   :  { %v5089_v37 = vpop.f32.mrf.mxu0  ;;  %v389_v57 = vld [vmem:[%s8818_s0 + $0x1c8] sm:$0xff] }
  0xf4   :  { %v6923_v1 = vpop.permute.xlu1 %1137  ;;  %v5090_v8 = vadd.f32 %v5089_v37, %v5088_v14 }
  0xf5   :  { %v6925_v50 = vpop.permute.xlu0 %468  ;;  %1230 = vperm.xlu1 %5921, %v4629_v17   ;;  %v6927_v52 = vpop.f32.mrf.mxu1 }
  0xf6   :  { %8879 = vst [vmem:[#allocation40_spill] sm:$0xff] %v6925_v50  ;;  %561 = vperm.xlu0 %5920, %v388_v41   ;;  %v6932_v3 = vadd.f32 %v5090_v8, %v308_v25  ;;  %v5091_v10 = vpop.f32.mrf.mxu0  ;;  %v391_v41 = vld [vmem:[%s8818_s0 + $0x1d8] sm:$0xff]  ;;  %v390_v25 = vld [vmem:[%s8818_s0 + $0x1d0] sm:$0xff] }
  0xf7   :  { %v5488_v16 = vpop.f32.mrf.mxu1 }
  0xf8   :  { %v6937_v34 = vpop.permute.xlu1 %1140  ;;  %v5092_v14 = vpop.f32.mrf.mxu0 }
  0xf9   :  { %v6939_v37 = vpop.permute.xlu0 %471  ;;  %1233 = vperm.xlu1 %5921, %v4630_v58   ;;  %v5093_v17 = vadd.f32 %v5092_v14, %v5091_v10  ;;  %v4860_v10 = vld [vmem:[%s8818_s0 + $0x3c8] sm:$0xff] }
  0xfa   :  { %8880 = vst [vmem:[#allocation41_spill] sm:$0xff] %v6939_v37  ;;  %564 = vperm.xlu0 %5920, %v389_v57   ;;  %v6944_v8 = vpop.f32.mrf.mxu1  ;;  %v4859_v57 = vld [vmem:[%s8818_s0 + $0x3c0] sm:$0xff]  ;;  %v4861_v37 = vld [vmem:[%s8818_s0 + $0x3d0] sm:$0xff] }
  0xfb   :  { %v6949_v50 = vadd.f32 %v5093_v17, %v313_v18 }
  0xfc   :  { %v6951_v16 = vpop.permute.xlu1 %1143  ;;  %v5491_v22 = vpop.f32.mrf.mxu1 }
  0xfd   :  { %v6953_v12 = vpop.permute.xlu0 %474  ;;  %570 = vperm.xlu1 %5921, %v391_v41   ;;  %v6955_v58 = vpop.f32.mrf.mxu0 }
  0xfe   :  { %8881 = vst [vmem:[#allocation42_spill] sm:$0xff] %v6953_v12  ;;  %567 = vperm.xlu0 %5920, %v390_v25   ;;  %v4862_v25 = vld [vmem:[%s8818_s0 + $0x3d8] sm:$0xff] }
  0xff   :  { %v6963_v14 = vpop.f32.mrf.mxu0 }
 0x100   :  { %v6965_v18 = vpop.permute.xlu1 %1146  ;;  %v6967_v17 = vpop.f32.mrf.mxu1 }
 0x101   :  { %v6969_v22 = vpop.permute.xlu0 %477  ;;  %2820 = vperm.xlu1 %5921, %v4860_v10  }
 0x102   :  { %8882 = vst [vmem:[#allocation43_spill] sm:$0xff] %v6969_v22  ;;  %2817 = vperm.xlu0 %5920, %v4859_v57   ;;  %v5494_v41 = vpop.f32.mrf.mxu1  ;;  %v4864_v57 = vld [vmem:[%s8818_s0 + $0x3e8] sm:$0xff] }
 0x103   :  { %v6974_v12 = vpop.f32.mrf.mxu0  ;;  %v4863_v41 = vld [vmem:[%s8818_s0 + $0x3e0] sm:$0xff] }
 0x104   :  { %v6979_v4 = vpop.permute.xlu1 %1149 }
 0x105   :  { %8883 = vst [vmem:[#allocation44_spill] sm:$0xff] %v6979_v4  ;;  %v6981_v5 = vpop.permute.xlu0 %480  ;;  %2826 = vperm.xlu1 %5921, %v4862_v25   ;;  %v6983_v61 = vpop.f32.mrf.mxu0 }
 0x106   :  { %8884 = vst [vmem:[#allocation45_spill] sm:$0xff] %v6981_v5  ;;  %2823 = vperm.xlu0 %5920, %v4861_v37   ;;  %v6985_v10 = vpop.f32.mrf.mxu1  ;;  %v4866_v37 = vld [vmem:[%s8818_s0 + $0x3f8] sm:$0xff]  ;;  %v5099_v38 = vadd.f32 %v6983_v61, %v6974_v12  ;;  %v5096_v61 = vadd.f32 %v6963_v14, %v6955_v58  ;;  %v4888_v12 = vld [vmem:[%s8818_s0 + $0x4a8] sm:$0xff]  ;;  %v4887_v58 = vld [vmem:[%s8818_s0 + $0x4a0] sm:$0xff] }
 0x108   :  { %v6993_v22 = vpop.permute.xlu1 %1152  ;;  %v6995_v62 = vpop.f32.mrf.mxu1 }
 0x109   :  { %8885 = vst [vmem:[#allocation46_spill] sm:$0xff] %v6993_v22  ;;  %v6997_v53 = vpop.permute.xlu0 %483  ;;  %v6999_v25 = vpop.f32.mrf.mxu0  ;;  %2832 = vperm.xlu1 %5921, %v4864_v57  }
 0x10a   :  { %8886 = vst [vmem:[#allocation47_spill] sm:$0xff] %v6997_v53  ;;  %2829 = vperm.xlu0 %5920, %v4863_v41   ;;  %v4868_v41 = vld [vmem:[%s8818_s0 + $0x408] sm:$0xff] }
 0x10b   :  { %v7004_v5 = vpop.f32.mrf.mxu0  ;;  %v7006_v55 = vpop.f32.mrf.mxu1 }
 0x10c   :  { %v7011_v48 = vpop.permute.xlu1 %1155 }
 0x10d   :  { %8887 = vst [vmem:[#allocation48_spill] sm:$0xff] %v7011_v48  ;;  %v7013_v35 = vpop.permute.xlu0 %486  ;;  %v7015_v53 = vpop.f32.mrf.mxu1  ;;  %2838 = vperm.xlu1 %5921, %v4866_v37  }
 0x10e   :  { %8888 = vst [vmem:[#allocation49_spill] sm:$0xff] %v7013_v35  ;;  %v7017_v57 = vpop.f32.mrf.mxu0  ;;  %2835 = vperm.xlu0 %5920, %v4865_v46   ;;  %v4870_v46 = vld [vmem:[%s8818_s0 + $0x418] sm:$0xff] }
 0x110   :  { %v7025_v29 = vpop.f32.mrf.mxu1  ;;  %v5509_v32 = vpop.f32.mrf.mxu0 }
 0x111   :  { %v7027_v23 = vpop.permute.xlu1 %1158  ;;  %v7029_v35 = vpop.permute.xlu0 %489  ;;  %2844 = vperm.xlu1 %5921, %v4868_v41  }
 0x112   :  { %8889 = vst [vmem:[#allocation50_spill] sm:$0xff] %v7027_v23  ;;  %8890 = vst [vmem:[#allocation51_spill] sm:$0xff] %v7029_v35  ;;  %v7031_v37 = vpop.f32.mrf.mxu1  ;;  %v7033_v24 = vpop.f32.mrf.mxu0  ;;  %2841 = vperm.xlu0 %5920, %v4867_v39   ;;  %v4872_v39 = vld [vmem:[%s8818_s0 + $0x428] sm:$0xff] }
 0x114   :  { %v7041_v20 = vpop.f32.mrf.mxu1  ;;  %v5512_v32 = vpop.f32.mrf.mxu0 }
 0x115   :  { %v7043_v13 = vpop.permute.xlu1 %1161  ;;  %v7045_v35 = vpop.permute.xlu0 %492  ;;  %2850 = vperm.xlu1 %5921, %v4870_v46  }
 0x116   :  { %8891 = vst [vmem:[#allocation52_spill] sm:$0xff] %v7043_v13  ;;  %8892 = vst [vmem:[#allocation53_spill] sm:$0xff] %v7045_v35  ;;  %v5158_v41 = vpop.f32.mrf.mxu1  ;;  %v7047_v15 = vpop.f32.mrf.mxu0  ;;  %2847 = vperm.xlu0 %5920, %v4869_v19   ;;  %v4874_v19 = vld [vmem:[%s8818_s0 + $0x438] sm:$0xff]  ;;  %v4873_v13 = vld [vmem:[%s8818_s0 + $0x430] sm:$0xff] }
 0x118   :  { %v5160_v9 = vpop.f32.mrf.mxu1  ;;  %v5515_v6 = vpop.f32.mrf.mxu0 }
 0x119   :  { %v7055_v32 = vpop.permute.xlu1 %1164  ;;  %v7057_v7 = vpop.permute.xlu0 %495  ;;  %2856 = vperm.xlu1 %5921, %v4872_v39  }
 0x11a   :  { %8893 = vst [vmem:[#allocation54_spill] sm:$0xff] %v7055_v32  ;;  %8894 = vst [vmem:[#allocation55_spill] sm:$0xff] %v7057_v7  ;;  %v5161_v46 = vpop.f32.mrf.mxu1  ;;  %v975_v35 = vpop.f32.mrf.mxu0  ;;  %2853 = vperm.xlu0 %5920, %v4871_v0   ;;  %v4876_v0 = vld [vmem:[%s8818_s0 + $0x448] sm:$0xff]  ;;  %v4875_v32 = vld [vmem:[%s8818_s0 + $0x440] sm:$0xff] }
 0x11c   :  { %v5163_v63 = vpop.f32.mrf.mxu1  ;;  %v5518_v23 = vpop.f32.mrf.mxu0 }
 0x11d   :  { %v7065_v2 = vpop.permute.xlu1 %1167  ;;  %v7067_v6 = vpop.permute.xlu0 %498  ;;  %2862 = vperm.xlu1 %5921, %v4874_v19  }
 0x11e   :  { %8895 = vst [vmem:[#allocation56_spill] sm:$0xff] %v7065_v2  ;;  %8896 = vst [vmem:[#allocation57_spill] sm:$0xff] %v7067_v6  ;;  %v5164_v7 = vpop.f32.mrf.mxu1  ;;  %v980_v39 = vpop.f32.mrf.mxu0  ;;  %2859 = vperm.xlu0 %5920, %v4873_v13   ;;  %v4878_v13 = vld [vmem:[%s8818_s0 + $0x458] sm:$0xff]  ;;  %v4877_v2 = vld [vmem:[%s8818_s0 + $0x450] sm:$0xff] }
 0x120   :  { %v5166_v48 = vpop.f32.mrf.mxu1  ;;  %v5521_v59 = vpop.f32.mrf.mxu0 }
 0x121   :  { %v7075_v22 = vpop.permute.xlu1 %1170  ;;  %v7077_v23 = vpop.permute.xlu0 %501  ;;  %2868 = vperm.xlu1 %5921, %v4876_v0  }
 0x122   :  { %8897 = vst [vmem:[#allocation58_spill] sm:$0xff] %v7075_v22  ;;  %8898 = vst [vmem:[#allocation59_spill] sm:$0xff] %v7077_v23  ;;  %v5167_v6 = vpop.f32.mrf.mxu1  ;;  %v985_v19 = vpop.f32.mrf.mxu0  ;;  %2865 = vperm.xlu0 %5920, %v4875_v32   ;;  %v5165_v32 = vadd.f32 %v5164_v7, %v5163_v63  ;;  %v5159_v7 = vadd.f32 %v5158_v41, %v7041_v20 }
 0x123   :  { %v5168_v4 = vadd.f32 %v5167_v6, %v5166_v48 }
 0x124   :  { %v5524_v60 = vpop.f32.mrf.mxu0  ;;  %v976_v20 = vadd.f32 %v5159_v7, %v975_v35  ;;  %v4883_v35 = vld [vmem:[%s8818_s0 + $0x480] sm:$0xff] }
 0x125   :  { %v7085_v54 = vpop.permute.xlu1 %1173  ;;  %v7087_v59 = vpop.permute.xlu0 %504  ;;  %2874 = vperm.xlu1 %5921, %v4878_v13   ;;  %v4879_v60 = vld [vmem:[%s8818_s0 + $0x460] sm:$0xff]  ;;  %v5153_v13 = vadd.f32 %v7015_v53, %v7006_v55  ;;  %v5102_v55 = vadd.f32 %v7004_v5, %v6999_v25  ;;  %v4885_v5 = vld [vmem:[%s8818_s0 + $0x490] sm:$0xff] }
 0x126   :  { %v990_v23 = vpop.f32.mrf.mxu0  ;;  %2871 = vperm.xlu0 %5920, %v4877_v2   ;;  %v5162_v2 = vadd.f32 %v5161_v46, %v5160_v9  ;;  %v4882_v9 = vld [vmem:[%s8818_s0 + $0x478] sm:$0xff]  ;;  %v5156_v46 = vadd.f32 %v7031_v37, %v7025_v29  ;;  %v4884_v29 = vld [vmem:[%s8818_s0 + $0x488] sm:$0xff] }
 0x127   :  { %v991_v0 = vadd.f32 %v5168_v4, %v990_v23  ;;  %v986_v4 = vadd.f32 %v5165_v32, %v985_v19  ;;  %v966_v37 = vadd.f32 %v5153_v13, %v7033_v24  ;;  %v329_v32 = vadd.f32 %v5102_v55, %v6967_v17  ;;  %v8903_v55 = vld [vmem:[#allocation7_spill] sm:$0xff] }
 0x128   :  { %v5527_v22 = vpop.f32.mrf.mxu0  ;;  %v981_v63 = vadd.f32 %v5162_v2, %v980_v39  ;;  %v971_v41 = vadd.f32 %v5156_v46, %v7047_v15  ;;  %v5150_v15 = vadd.f32 %v6995_v62, %v6985_v10  ;;  %v4886_v62 = vld [vmem:[%s8818_s0 + $0x498] sm:$0xff]  ;;  %v8899_v10 = vmov 0.0  }
 0x129   :  { %5528 = vmatprep.subr.msk.mxu0 %vm1596_vm6, %v991_v0  ;;  %5902 = vmatprep.subr.msk.mxu1 %vm1596_vm6, %v991_v0  ;;  %v7097_v48 = vpop.permute.xlu1 %1176  ;;  %v7099_v6 = vpop.permute.xlu0 %507  ;;  %v4632_v25 = vsel %vm1236_vm7, 1.0, %v8899_v10  ;;  %v4633_v31 = vsel %vm1237_vm9, 1.0, %v8899_v10  ;;  %v4653_v33 = vsel %vm1257_vm10, 1.0, %v8899_v10  ;;  %v324_v17 = vadd.f32 %v5099_v38, %v6944_v8  ;;  %v4894_v46 = vld [vmem:[%s8818_s0 + $0x4d8] sm:$0xff] }
 0x12a   :  { %5529 = vmatpush3.msk.msra.mxu0 %vm1596_vm6, %v991_v0  ;;  %5909 = vmatpush3.msk.msra.mxu1 %vm1596_vm6, %v991_v0  ;;  %v961_v0 = vadd.f32 %v5150_v15, %v7017_v57  ;;  %v4652_v57 = vsel %vm1256_vm8, 1.0, %v8899_v10  ;;  %v4634_v8 = vsel %vm1238_vm11, 1.0, %v8899_v10  ;;  %v4654_v14 = vsel %vm1258_vm12, 1.0, %v8899_v10  ;;  %v4896_v15 = vld [vmem:[%s8818_s0 + $0x4e8] sm:$0xff] }
 0x12b   :  { %2880 = vperm.xlu1 %5921, %v4880_v28   ;;  %2877 = vperm.xlu0 %5920, %v4879_v60   ;;  %v4881_v28 = vld [vmem:[%s8818_s0 + $0x470] sm:$0xff]  ;;  %v319_v60 = vadd.f32 %v5096_v61, %v6927_v52  ;;  %v4635_v42 = vsel %vm1239_vm13, 1.0, %v8899_v10  ;;  %v4655_v2 = vsel %vm1259_vm14, 1.0, %v8899_v10  ;;  %vm1261_vm7 = vcmp.eq.s32.totalorder %v6911_v27, %v6631_v30  ;;  %v4892_v27 = vld [vmem:[%s8818_s0 + $0x4c8] sm:$0xff] }
 0x12c   :  { %5530 = vmatprep.subr.mxu0 %v986_v4  ;;  %5903 = vmatprep.subr.mxu1 %v986_v4  ;;  %v4889_v52 = vld [vmem:[%s8818_s0 + $0x4b0] sm:$0xff]  ;;  %v4636_v26 = vsel %vm1240_vm15, 1.0, %v8899_v10  ;;  %v4637_v47 = vsel %vm1241_vm5, 1.0, %v8899_v10  ;;  %vm1242_vm8 = vcmp.eq.s32.totalorder %v6664_v44, %v6631_v30  ;;  %vm1262_vm9 = vcmp.eq.s32.totalorder %v6923_v1, %v6631_v30 }
 0x12d   :  { %5531 = vmatpush3.msra.mxu0 %v986_v4  ;;  %5910 = vmatpush3.msra.mxu1 %v986_v4  ;;  %v7104_v22 = vpop.permute.xlu1 %1179  ;;  %v7106_v23 = vpop.permute.xlu0 %510  ;;  %vm1243_vm10 = vcmp.eq.s32.totalorder %v6679_v51, %v6631_v30  ;;  %vm1263_vm11 = vcmp.eq.s32.totalorder %v6937_v34, %v6631_v30  ;;  %v4638_v44 = vsel %vm1242_vm8, 1.0, %v8899_v10  ;;  %v4658_v1 = vsel %vm1262_vm9, 1.0, %v8899_v10  ;;  %v4844_v34 = vld [vmem:[%s8820_s2 + $0x358] sm:$0xff] }
 0x12e   :  { %5532 = vmatprep.subr.mxu0 %v981_v63  ;;  %5904 = vmatprep.subr.mxu1 %v981_v63  ;;  %vm1244_vm12 = vcmp.eq.s32.totalorder %v6674_v49, %v6631_v30  ;;  %vm1264_vm13 = vcmp.eq.s32.totalorder %v6951_v16, %v6631_v30  ;;  %vm1245_vm14 = vcmp.eq.s32.totalorder %v6692_v56, %v6631_v30  ;;  %v4659_v49 = vsel %vm1263_vm11, 1.0, %v8899_v10  ;;  %v8900_v16 = vld [vmem:[#allocation37_spill] sm:$0xff] }
 0x12f   :  { %5533 = vmatpush3.msra.mxu0 %v981_v63  ;;  %5911 = vmatpush3.msra.mxu1 %v981_v63  ;;  %v4656_v63 = vsel %vm1260_vm4, 1.0, %v8899_v10  ;;  %vm1265_vm15 = vcmp.eq.s32.totalorder %v6965_v18, %v6631_v30  ;;  %v4660_v56 = vsel %vm1264_vm13, 1.0, %v8899_v10  ;;  %v8901_v18 = vld [vmem:[#allocation5_spill] sm:$0xff]  ;;  %v4641_v13 = vsel %vm1245_vm14, 1.0, %v8899_v10 }
 0x130   :  { %2886 = vperm.xlu1 %5921, %v4882_v9   ;;  %2883 = vperm.xlu0 %5920, %v4881_v28   ;;  %v4657_v9 = vsel %vm1261_vm7, 1.0, %v8899_v10  ;;  %vm1246_vm4 = vcmp.eq.s32.totalorder %v8901_v18, %v6631_v30  ;;  %vm1247_vm7 = vcmp.eq.s32.totalorder %v8903_v55, %v6631_v30  ;;  %v8915_v18 = vld [vmem:[#allocation13_spill] sm:$0xff] }
 0x131   :  { %5534 = vmatprep.subr.mxu0 %v976_v20  ;;  %5905 = vmatprep.subr.mxu1 %v976_v20  ;;  %v7117_v39 = vpop.permute.xlu1 %1182  ;;  %v7119_v19 = vpop.permute.xlu0 %513  ;;  %v4842_v55 = vld [vmem:[%s8820_s2 + $0x348] sm:$0xff] }
 0x132   :  { %5535 = vmatpush3.msra.mxu0 %v976_v20  ;;  %5912 = vmatpush3.msra.mxu1 %v976_v20  ;;  %v4640_v20 = vsel %vm1244_vm12, 1.0, %v8899_v10 }
 0x133   :  { %5536 = vmatprep.subr.mxu0 %v971_v41  ;;  %5906 = vmatprep.subr.mxu1 %v971_v41 }
 0x134   :  { %5537 = vmatpush3.msra.mxu0 %v971_v41  ;;  %5913 = vmatpush3.msra.mxu1 %v971_v41 }
 0x135   :  { %2892 = vperm.xlu1 %5921, %v4884_v29   ;;  %2889 = vperm.xlu0 %5920, %v4883_v35   ;;  %v7132_v53 = vpop.permute.xlu1 %1185  ;;  %v7141_v24 = vpop.permute.xlu0 %516  ;;  %v4661_v29 = vsel %vm1265_vm15, 1.0, %v8899_v10  ;;  %v8902_v35 = vld [vmem:[#allocation44_spill] sm:$0xff] }
 0x136   :  { %5538 = vmatprep.subr.mxu0 %v966_v37  ;;  %5907 = vmatprep.subr.mxu1 %v966_v37  ;;  %vm1266_vm5 = vcmp.eq.s32.totalorder %v8902_v35, %v6631_v30 }
 0x137   :  { %5539 = vmatpush3.msra.mxu0 %v966_v37  ;;  %5914 = vmatpush3.msra.mxu1 %v966_v37  ;;  %v4895_v37 = vld [vmem:[%s8818_s0 + $0x4e0] sm:$0xff]  ;;  %v4662_v38 = vsel %vm1266_vm5, 1.0, %v8899_v10 }
 0x138   :  { %5540 = vmatprep.subr.mxu0 %v961_v0  ;;  %5908 = vmatprep.subr.mxu1 %v961_v0 }
 0x139   :  { %5541 = vmatpush3.msra.mxu0 %v961_v0  ;;  %5915 = vmatpush3.msra.mxu1 %v961_v0  ;;  %v7155_v21 = vpop.permute.xlu1 %1188  ;;  %v7183_v36 = vpop.permute.xlu0 %519  ;;  %v8904_v0 = vld [vmem:[#allocation46_spill] sm:$0xff] }
 0x13a   :  { %2898 = vperm.xlu1 %5921, %v4886_v62   ;;  %2895 = vperm.xlu0 %5920, %v4885_v5   ;;  %vm1267_vm8 = vcmp.eq.s32.totalorder %v8904_v0, %v6631_v30  ;;  %v4642_v5 = vsel %vm1246_vm4, 1.0, %v8899_v10  ;;  %v8917_v0 = vld [vmem:[#allocation12_spill] sm:$0xff] }
 0x13b   :  { %5543 = vmatmul.mubr.msk.f32.vlgmr.msra.gmra.mxu0 %vm1415_vm3, %v4632_v25  ;;  %5573 = vmatmul.mubr.msk.f32.vlgmr.msra.gmra.mxu1 %vm1415_vm3, %v4652_v57  ;;  %v4828_v57 = vld [vmem:[%s8820_s2 + $0x2d8] sm:$0xff]  ;;  %v4663_v61 = vsel %vm1267_vm8, 1.0, %v8899_v10  ;;  %vm1253_vm8 = vcmp.eq.s32.totalorder %v8915_v18, %v6631_v30 }
 0x13c   :  { %5632 = vmatprep.subr.msk.mxu0 %vm1596_vm6, %v329_v32  ;;  %5545 = vmatprep.mubr.msk.f32.mxu0 %vm1415_vm3, %v4633_v31  ;;  %v4643_v31 = vsel %vm1247_vm7, 1.0, %v8899_v10 }
 0x13d   :  { %5575 = vmatprep.mubr.msk.f32.mxu1 %vm1415_vm3, %v4653_v33  ;;  %5633 = vmatpush3.msk.msra.mxu0 %vm1596_vm6, %v329_v32  ;;  %v7185_v43 = vpop.permute.xlu1 %1191  ;;  %v7215_v40 = vpop.permute.xlu0 %522  ;;  %v8905_v32 = vld [vmem:[#allocation6_spill] sm:$0xff]  ;;  %v4898_v33 = vld [vmem:[%s8818_s0 + $0x4f8] sm:$0xff] }
 0x13e   :  { %5634 = vmatprep.subr.mxu0 %v324_v17  ;;  %2904 = vperm.xlu1 %5921, %v4888_v12   ;;  %vm1248_vm9 = vcmp.eq.s32.totalorder %v8905_v32, %v6631_v30  ;;  %v8906_v12 = vld [vmem:[#allocation48_spill] sm:$0xff] }
 0x13f   :  { %5635 = vmatpush3.msra.mxu0 %v324_v17  ;;  %2901 = vperm.xlu0 %5920, %v4887_v58   ;;  %v4897_v17 = vld [vmem:[%s8818_s0 + $0x4f0] sm:$0xff]  ;;  %v8907_v58 = vld [vmem:[#allocation9_spill] sm:$0xff] }
 0x140   :  { %5546 = vmatmul.mubr.msk.f32.gmra.mxu0 %vm1415_vm3, %v4634_v8  ;;  %5576 = vmatmul.mubr.msk.f32.gmra.mxu1 %vm1415_vm3, %v4654_v14  ;;  %vm1249_vm11 = vcmp.eq.s32.totalorder %v8907_v58, %v6631_v30  ;;  %v8908_v8 = vld [vmem:[#allocation50_spill] sm:$0xff]  ;;  %v4644_v14 = vsel %vm1248_vm9, 1.0, %v8899_v10  ;;  %v4903_v32 = vld [vmem:[%s8818_s0 + $0x520] sm:$0xff] }
 0x141   :  { %5636 = vmatprep.subr.mxu0 %v319_v60  ;;  %5548 = vmatprep.mubr.msk.f32.mxu0 %vm1415_vm3, %v4635_v42  ;;  %v7207_v4 = vpop.permute.xlu1 %1194  ;;  %v7247_v28 = vpop.permute.xlu0 %525  ;;  %vm1269_vm12 = vcmp.eq.s32.totalorder %v8908_v8, %v6631_v30 }
 0x142   :  { %5578 = vmatprep.mubr.msk.f32.mxu1 %vm1415_vm3, %v4655_v2  ;;  %5637 = vmatpush3.msra.mxu0 %v319_v60  ;;  %v8909_v2 = vld [vmem:[#allocation8_spill] sm:$0xff] }
 0x143   :  { %5638 = vmatprep.subr.mxu0 %v6949_v50  ;;  %2910 = vperm.xlu1 %5921, %v4890_v45   ;;  %v4843_v45 = vld [vmem:[%s8820_s2 + $0x350] sm:$0xff]  ;;  %vm1250_vm13 = vcmp.eq.s32.totalorder %v8909_v2, %v6631_v30 }
 0x144   :  { %5639 = vmatpush3.msra.mxu0 %v6949_v50  ;;  %2907 = vperm.xlu0 %5920, %v4889_v52   ;;  %v4891_v50 = vld [vmem:[%s8818_s0 + $0x4c0] sm:$0xff]  ;;  %v4645_v52 = vsel %vm1249_vm11, 1.0, %v8899_v10  ;;  %vm1274_vm11 = vcmp.eq.s32.totalorder %v7085_v54, %v6631_v30 }
 0x145   :  { %5549 = vmatmul.mubr.msk.f32.gmra.mxu0 %vm1415_vm3, %v4636_v26  ;;  %5579 = vmatmul.mubr.msk.f32.gmra.mxu1 %vm1415_vm3, %v4656_v63  ;;  %v7226_v7 = vpop.permute.xlu1 %1197  ;;  %v7302_v62 = vpop.permute.xlu0 %528  ;;  %v4665_v26 = vsel %vm1269_vm12, 1.0, %v8899_v10  ;;  %v8910_v63 = vld [vmem:[#allocation52_spill] sm:$0xff] }
 0x146   :  { %5640 = vmatprep.subr.mxu0 %v6932_v3  ;;  %5551 = vmatprep.mubr.msk.f32.mxu0 %vm1415_vm3, %v4637_v47  ;;  %vm1270_vm14 = vcmp.eq.s32.totalorder %v8910_v63, %v6631_v30  ;;  %v4900_v47 = vld [vmem:[%s8818_s0 + $0x508] sm:$0xff] }
 0x147   :  { %5581 = vmatprep.mubr.msk.f32.mxu1 %vm1415_vm3, %v4657_v9  ;;  %5641 = vmatpush3.msra.mxu0 %v6932_v3  ;;  %v4639_v3 = vsel %vm1243_vm10, 1.0, %v8899_v10  ;;  %vm1268_vm10 = vcmp.eq.s32.totalorder %v8906_v12, %v6631_v30 }
 0x148   :  { %5642 = vmatprep.subr.mxu0 %v6915_v11  ;;  %2916 = vperm.xlu1 %5921, %v4892_v27   ;;  %v4664_v60 = vsel %vm1268_vm10, 1.0, %v8899_v10  ;;  %v4899_v27 = vld [vmem:[%s8818_s0 + $0x500] sm:$0xff]  ;;  %vm1254_vm10 = vcmp.eq.s32.totalorder %v8917_v0, %v6631_v30 }
 0x149   :  { %5643 = vmatpush3.msra.mxu0 %v6915_v11  ;;  %2913 = vperm.xlu0 %5920, %v4891_v50   ;;  %v7250_v51 = vpop.permute.xlu1 %1200  ;;  %v4893_v11 = vld [vmem:[%s8818_s0 + $0x4d0] sm:$0xff]  ;;  %v7336_v42 = vpop.permute.xlu0 %531  ;;  %v4650_v54 = vsel %vm1254_vm10, 1.0, %v8899_v10  ;;  %vm1279_vm10 = vcmp.eq.s32.totalorder %v7155_v21, %v6631_v30  ;;  %v4825_v21 = vld [vmem:[%s8820_s2 + $0x2c0] sm:$0xff] }
 0x14a   :  { %5552 = vmatmul.mubr.msk.f32.gmra.mxu0 %vm1415_vm3, %v4638_v44  ;;  %5582 = vmatmul.mubr.msk.f32.gmra.mxu1 %vm1415_vm3, %v4658_v1  ;;  %v8911_v50 = vld [vmem:[#allocation11_spill] sm:$0xff]  ;;  %v8912_v44 = vld [vmem:[#allocation54_spill] sm:$0xff]  ;;  %v4646_v1 = vsel %vm1250_vm13, 1.0, %v8899_v10  ;;  %vm1275_vm13 = vcmp.eq.s32.totalorder %v7097_v48, %v6631_v30 }
 0x14b   :  { %5644 = vmatprep.subr.mxu0 %v8900_v16  ;;  %5554 = vmatprep.mubr.msk.f32.mxu0 %vm1415_vm3, %v4639_v3  ;;  %vm1251_vm15 = vcmp.eq.s32.totalorder %v8911_v50, %v6631_v30  ;;  %vm1271_vm4 = vcmp.eq.s32.totalorder %v8912_v44, %v6631_v30  ;;  %v4666_v3 = vsel %vm1270_vm14, 1.0, %v8899_v10  ;;  %v4671_v58 = vsel %vm1275_vm13, 1.0, %v8899_v10  ;;  %v4907_v50 = vld [vmem:[%s8818_s0 + $0x540] sm:$0xff]  ;;  %v8922_v44 = vld [vmem:[#allocation19_spill] sm:$0xff] }
 0x14c   :  { %5584 = vmatprep.mubr.msk.f32.mxu1 %vm1415_vm3, %v4659_v49  ;;  %5645 = vmatpush3.msra.mxu0 %v8900_v16  ;;  %v4647_v49 = vsel %vm1251_vm15, 1.0, %v8899_v10  ;;  %v4667_v16 = vsel %vm1271_vm4, 1.0, %v8899_v10  ;;  %vm1276_vm15 = vcmp.eq.s32.totalorder %v7104_v22, %v6631_v30  ;;  %vm1281_vm13 = vcmp.eq.s32.totalorder %v7207_v4, %v6631_v30  ;;  %v4849_v4 = vld [vmem:[%s8820_s2 + $0x380] sm:$0xff] }
 0x14d   :  { %2922 = vperm.xlu1 %5921, %v4894_v46   ;;  %2919 = vperm.xlu0 %5920, %v4893_v11   ;;  %v7279_v41 = vpop.permute.xlu1 %1203  ;;  %v4827_v46 = vld [vmem:[%s8820_s2 + $0x2d0] sm:$0xff]  ;;  %v4672_v2 = vsel %vm1276_vm15, 1.0, %v8899_v10  ;;  %v4677_v0 = vsel %vm1281_vm13, 1.0, %v8899_v10  ;;  %vm1282_vm15 = vcmp.eq.s32.totalorder %v7226_v7, %v6631_v30 }
 0x14e   :  { %5555 = vmatmul.mubr.msk.f32.gmra.mxu0 %vm1415_vm3, %v4640_v20  ;;  %5585 = vmatmul.mubr.msk.f32.gmra.mxu1 %vm1415_vm3, %v4660_v56  ;;  %v8913_v11 = vld [vmem:[#allocation10_spill] sm:$0xff]  ;;  %v8914_v20 = vld [vmem:[#allocation56_spill] sm:$0xff] }
 0x14f   :  { %5557 = vmatprep.mubr.msk.f32.mxu0 %vm1415_vm3, %v4641_v13  ;;  %5587 = vmatprep.mubr.msk.f32.mxu1 %vm1415_vm3, %v4661_v29  ;;  %vm1252_vm5 = vcmp.eq.s32.totalorder %v8913_v11, %v6631_v30  ;;  %vm1272_vm7 = vcmp.eq.s32.totalorder %v8914_v20, %v6631_v30  ;;  %v4902_v56 = vld [vmem:[%s8818_s0 + $0x518] sm:$0xff]  ;;  %v8916_v13 = vld [vmem:[#allocation58_spill] sm:$0xff]  ;;  %v7386_v29 = vpop.permute.xlu0 %534 }
 0x150   :  { %5316 = vmatprep.subr.mxu1 %v4844_v34  ;;  %5736 = vmatprep.subr.mxu0 %v8899_v10  ;;  %v4901_v34 = vld [vmem:[%s8818_s0 + $0x510] sm:$0xff]  ;;  %vm1273_vm9 = vcmp.eq.s32.totalorder %v8916_v13, %v6631_v30  ;;  %v4910_v20 = vld [vmem:[%s8818_s0 + $0x558] sm:$0xff] }
 0x151   :  { %2928 = vperm.xlu1 %5921, %v4896_v15   ;;  %2925 = vperm.xlu0 %5920, %v4895_v37   ;;  %v7309_v25 = vpop.permute.xlu1 %1206  ;;  %v4648_v15 = vsel %vm1252_vm5, 1.0, %v8899_v10  ;;  %v4668_v37 = vsel %vm1272_vm7, 1.0, %v8899_v10  ;;  %vm1277_vm5 = vcmp.eq.s32.totalorder %v7117_v39, %v6631_v30  ;;  %v8921_v39 = vld [vmem:[#allocation16_spill] sm:$0xff]  ;;  %v8923_v11 = vld [vmem:[#allocation18_spill] sm:$0xff] }
 0x152   :  { %5558 = vmatmul.mubr.msk.f32.gmra.mxu0 %vm1415_vm3, %v4642_v5  ;;  %5588 = vmatmul.mubr.msk.f32.gmra.mxu1 %vm1415_vm3, %v4662_v38  ;;  %v4649_v5 = vsel %vm1253_vm8, 1.0, %v8899_v10  ;;  %v4669_v38 = vsel %vm1273_vm9, 1.0, %v8899_v10  ;;  %vm575_vm7 = vcmp.eq.s32.totalorder %v8921_v39, %v6631_v30  ;;  %vm1278_vm8 = vcmp.eq.s32.totalorder %v7132_v53, %v6631_v30  ;;  %v4916_v39 = vld [vmem:[%s8818_s0 + $0x588] sm:$0xff] }
 0x153   :  { %5560 = vmatprep.mubr.msk.f32.mxu0 %vm1415_vm3, %v4643_v31  ;;  %5590 = vmatprep.mubr.msk.f32.mxu1 %vm1415_vm3, %v4663_v61  ;;  %v8918_v31 = vld [vmem:[#allocation15_spill] sm:$0xff]  ;;  %v4670_v61 = vsel %vm1274_vm11, 1.0, %v8899_v10  ;;  %v7419_v12 = vpop.permute.xlu0 %537  ;;  %vm576_vm9 = vcmp.eq.s32.totalorder %v8922_v44, %v6631_v30  ;;  %vm577_vm11 = vcmp.eq.s32.totalorder %v8923_v11, %v6631_v30 }
 0x154   :  { %5317 = vmatpush3.msra.mxu1 %v4828_v57  ;;  %v4904_v57 = vld [vmem:[%s8818_s0 + $0x528] sm:$0xff]  ;;  %vm572_vm12 = vcmp.eq.s32.totalorder %v8918_v31, %v6631_v30  ;;  %v4678_v31 = vsel %vm1282_vm15, 1.0, %v8899_v10  ;;  %v4918_v11 = vld [vmem:[%s8818_s0 + $0x598] sm:$0xff] }
 0x155   :  { %2934 = vperm.xlu1 %5921, %v4898_v33   ;;  %2931 = vperm.xlu0 %5920, %v4897_v17   ;;  %v7355_v9 = vpop.permute.xlu1 %1209  ;;  %v4826_v33 = vld [vmem:[%s8820_s2 + $0x2c8] sm:$0xff]  ;;  %v4465_v48 = vsel %vm572_vm12, 1.0, %v8899_v10 }
 0x156   :  { %5561 = vmatmul.mubr.msk.f32.gmra.mxu0 %vm1415_vm3, %v4644_v14  ;;  %5591 = vmatmul.mubr.msk.f32.gmra.mxu1 %vm1415_vm3, %v4664_v60  ;;  %v8919_v17 = vld [vmem:[#allocation14_spill] sm:$0xff]  ;;  %v4906_v14 = vld [vmem:[%s8818_s0 + $0x538] sm:$0xff] }
 0x157   :  { %5563 = vmatprep.mubr.msk.f32.mxu0 %vm1415_vm3, %v4645_v52  ;;  %5593 = vmatprep.mubr.msk.f32.mxu1 %vm1415_vm3, %v4665_v26  ;;  %vm573_vm14 = vcmp.eq.s32.totalorder %v8919_v17, %v6631_v30  ;;  %v4905_v60 = vld [vmem:[%s8818_s0 + $0x530] sm:$0xff]  ;;  %v4841_v52 = vld [vmem:[%s8820_s2 + $0x340] sm:$0xff]  ;;  %v4850_v26 = vld [vmem:[%s8820_s2 + $0x388] sm:$0xf] }
 0x158   :  { %5318 = vmatprep.subr.mxu1 %v4843_v45  ;;  %v8920_v45 = vld [vmem:[#allocation17_spill] sm:$0xff]  ;;  %v4466_v22 = vsel %vm573_vm14, 1.0, %v8899_v10  ;;  %v4914_v17 = vld [vmem:[%s8818_s0 + $0x578] sm:$0xff] }
 0x159   :  { %2940 = vperm.xlu1 %5921, %v4900_v47   ;;  %2937 = vperm.xlu0 %5920, %v4899_v27   ;;  %v7390_v35 = vpop.permute.xlu1 %1212  ;;  %vm574_vm4 = vcmp.eq.s32.totalorder %v8920_v45, %v6631_v30  ;;  %v4673_v47 = vsel %vm1277_vm5, 1.0, %v8899_v10  ;;  %v4908_v27 = vld [vmem:[%s8818_s0 + $0x548] sm:$0xff]  ;;  %vm1283_vm5 = vcmp.eq.s32.totalorder %v7250_v51, %v6631_v30 }
 0x15a   :  { %5564 = vmatmul.mubr.msk.f32.gmra.mxu0 %vm1415_vm3, %v4646_v1  ;;  %5594 = vmatmul.mubr.msk.f32.gmra.mxu1 %vm1415_vm3, %v4666_v3  ;;  %v4467_v63 = vsel %vm574_vm4, 1.0, %v8899_v10  ;;  %v7472_v1 = vpop.permute.xlu0 %540  ;;  %v4468_v3 = vsel %vm575_vm7, 1.0, %v8899_v10  ;;  %vm1287_vm13 = vcmp.eq.s32.totalorder %v7390_v35, %v6631_v30  ;;  %v4821_v35 = vld [vmem:[%s8820_s2 + $0x2a0] sm:$0xff] }
 0x15b   :  { %5566 = vmatprep.mubr.msk.f32.mxu0 %vm1415_vm3, %v4647_v49  ;;  %5596 = vmatprep.mubr.msk.f32.mxu1 %vm1415_vm3, %v4667_v16  ;;  %v4469_v49 = vsel %vm576_vm9, 1.0, %v8899_v10  ;;  %v4675_v16 = vsel %vm1279_vm10, 1.0, %v8899_v10  ;;  %vm1285_vm10 = vcmp.eq.s32.totalorder %v7309_v25, %v6631_v30  ;;  %v4839_v25 = vld [vmem:[%s8820_s2 + $0x330] sm:$0xff] }
 0x15c   :  { %5319 = vmatpush3.msra.mxu1 %v4827_v46  ;;  %v4674_v46 = vsel %vm1278_vm8, 1.0, %v8899_v10  ;;  %vm1284_vm8 = vcmp.eq.s32.totalorder %v7279_v41, %v6631_v30 }
 0x15d   :  { %2946 = vperm.xlu1 %5921, %v4902_v56   ;;  %2943 = vperm.xlu0 %5920, %v4901_v34   ;;  %v7432_v8 = vpop.permute.xlu1 %1215  ;;  %v4909_v56 = vld [vmem:[%s8818_s0 + $0x550] sm:$0xff]  ;;  %v8924_v34 = vld [vmem:[#allocation21_spill] sm:$0xff]  ;;  %v4680_v45 = vsel %vm1284_vm8, 1.0, %v8899_v10 }
 0x15e   :  { %5567 = vmatmul.mubr.msk.f32.gmra.mxu0 %vm1415_vm3, %v4648_v15  ;;  %5597 = vmatmul.mubr.msk.f32.gmra.mxu1 %vm1415_vm3, %v4668_v37  ;;  %vm578_vm12 = vcmp.eq.s32.totalorder %v8924_v34, %v6631_v30  ;;  %v7510_v13 = vpop.permute.xlu0 %543  ;;  %v4840_v15 = vld [vmem:[%s8820_s2 + $0x338] sm:$0xff]  ;;  %v4917_v34 = vld [vmem:[%s8818_s0 + $0x590] sm:$0xff]  ;;  %vm1288_vm15 = vcmp.eq.s32.totalorder %v7432_v8, %v6631_v30 }
 0x15f   :  { %5569 = vmatprep.mubr.msk.f32.mxu0 %vm1415_vm3, %v4649_v5  ;;  %5599 = vmatprep.mubr.msk.f32.mxu1 %vm1415_vm3, %v4669_v38  ;;  %v8925_v37 = vld [vmem:[#allocation20_spill] sm:$0xff]  ;;  %v4912_v38 = vld [vmem:[%s8818_s0 + $0x568] sm:$0xff] }
 0x160   :  { %5320 = vmatprep.subr.mxu1 %v4842_v55  ;;  %vm579_vm14 = vcmp.eq.s32.totalorder %v8925_v37, %v6631_v30  ;;  %v4471_v55 = vsel %vm578_vm12, 1.0, %v8899_v10  ;;  %v4836_v8 = vld [vmem:[%s8820_s2 + $0x318] sm:$0xff] }
 0x161   :  { %2952 = vperm.xlu1 %5921, %v4904_v57   ;;  %2949 = vperm.xlu0 %5920, %v4903_v32   ;;  %v7476_v53 = vpop.permute.xlu1 %1218  ;;  %v4911_v57 = vld [vmem:[%s8818_s0 + $0x560] sm:$0xff]  ;;  %v8926_v32 = vld [vmem:[#allocation23_spill] sm:$0xff]  ;;  %v4472_v7 = vsel %vm579_vm14, 1.0, %v8899_v10 }
 0x162   :  { %5570 = vmatmul.mubr.msk.f32.gmra.mxu0 %vm1415_vm3, %v4650_v54  ;;  %5600 = vmatmul.mubr.msk.f32.gmra.mxu1 %vm1415_vm3, %v4670_v61  ;;  %vm580_vm4 = vcmp.eq.s32.totalorder %v8926_v32, %v6631_v30  ;;  %v4824_v54 = vld [vmem:[%s8820_s2 + $0x2b8] sm:$0xff]  ;;  %v8927_v61 = vld [vmem:[#allocation22_spill] sm:$0xff] }
 0x163   :  { %5602 = vmatprep.mubr.msk.f32.mxu1 %vm1415_vm3, %v4671_v58  ;;  %5646 = vmatprep.mubr.msk.f32.mxu0 %vm1415_vm3, %v4465_v48  ;;  %vm581_vm7 = vcmp.eq.s32.totalorder %v8927_v61, %v6631_v30  ;;  %v4473_v51 = vsel %vm580_vm4, 1.0, %v8899_v10  ;;  %v4913_v48 = vld [vmem:[%s8818_s0 + $0x570] sm:$0xff]  ;;  %v8928_v58 = vld [vmem:[#allocation25_spill] sm:$0xff] }
 0x164   :  { %5321 = vmatpush3.msra.mxu1 %v4826_v33  ;;  %v4679_v33 = vsel %vm1283_vm5, 1.0, %v8899_v10  ;;  %vm582_vm9 = vcmp.eq.s32.totalorder %v8928_v58, %v6631_v30  ;;  %vm1289_vm5 = vcmp.eq.s32.totalorder %v7476_v53, %v6631_v30  ;;  %v4820_v53 = vld [vmem:[%s8820_s2 + $0x298] sm:$0xff]  ;;  %v4835_v32 = vld [vmem:[%s8820_s2 + $0x310] sm:$0xff] }
 0x165   :  { %2958 = vperm.xlu1 %5921, %v4906_v14   ;;  %2955 = vperm.xlu0 %5920, %v4905_v60   ;;  %v7524_v5 = vpop.permute.xlu1 %1221  ;;  %v7563_v14 = vpop.permute.xlu0 %546  ;;  %v4474_v60 = vsel %vm581_vm7, 1.0, %v8899_v10 }
 0x166   :  { %5603 = vmatmul.mubr.msk.f32.gmra.mxu1 %vm1415_vm3, %v4672_v2  ;;  %5647 = vmatmul.mubr.msk.f32.vlgmr.msra.gmra.mxu0 %vm1415_vm3, %v4466_v22  ;;  %v4848_v22 = vld [vmem:[%s8820_s2 + $0x378] sm:$0xff]  ;;  %v4475_v2 = vsel %vm582_vm9, 1.0, %v8899_v10  ;;  %vm1290_vm9 = vcmp.eq.s32.totalorder %v7524_v5, %v6631_v30  ;;  %v4834_v5 = vld [vmem:[%s8820_s2 + $0x308] sm:$0xff] }
 0x167   :  { %5605 = vmatprep.mubr.msk.f32.mxu1 %vm1415_vm3, %v4673_v47  ;;  %5649 = vmatprep.mubr.msk.f32.mxu0 %vm1415_vm3, %v4467_v63  ;;  %v8929_v63 = vld [vmem:[#allocation24_spill] sm:$0xff]  ;;  %v8930_v47 = vld [vmem:[#allocation27_spill] sm:$0xff] }
 0x168   :  { %5322 = vmatprep.subr.mxu1 %v4841_v52  ;;  %5737 = vmatpush3.msk.msra.mxu0 %vm128_vm0, %v4850_v26  ;;  %vm1280_vm0 = vcmp.eq.s32.totalorder %v7185_v43, %v6631_v30  ;;  %v4470_v43 = vsel %vm577_vm11, 1.0, %v8899_v10  ;;  %v4681_v52 = vsel %vm1285_vm10, 1.0, %v8899_v10  ;;  %vm1286_vm11 = vcmp.eq.s32.totalorder %v7355_v9, %v6631_v30  ;;  %v4823_v26 = vld [vmem:[%s8820_s2 + $0x2b0] sm:$0xff]  ;;  %v4915_v9 = vld [vmem:[%s8818_s0 + $0x580] sm:$0xff] }
 0x169   :  { %2964 = vperm.xlu1 %5921, %v4908_v27   ;;  %2961 = vperm.xlu0 %5920, %v4907_v50   ;;  %v4676_v18 = vsel %vm1280_vm0, 1.0, %v8899_v10  ;;  %v7567_v41 = vpop.permute.xlu1 %1224  ;;  %vm583_vm0 = vcmp.eq.s32.totalorder %v8929_v63, %v6631_v30  ;;  %vm584_vm12 = vcmp.eq.s32.totalorder %v8930_v47, %v6631_v30  ;;  %v4838_v27 = vld [vmem:[%s8820_s2 + $0x328] sm:$0xff]  ;;  %v4682_v50 = vsel %vm1286_vm11, 1.0, %v8899_v10  ;;  %v7608_v44 = vpop.permute.xlu0 %549 }
 0x16a   :  { %5606 = vmatmul.mubr.msk.f32.gmra.mxu1 %vm1415_vm3, %v4674_v46  ;;  %5650 = vmatmul.mubr.msk.f32.gmra.mxu0 %vm1415_vm3, %v4468_v3  ;;  %v4476_v3 = vsel %vm583_vm0, 1.0, %v8899_v10  ;;  %vm1291_vm10 = vcmp.eq.s32.totalorder %v7567_v41, %v6631_v30 }
 0x16b   :  { %5608 = vmatprep.mubr.msk.f32.mxu1 %vm1415_vm3, %v4675_v16  ;;  %5652 = vmatprep.mubr.msk.f32.mxu0 %vm1415_vm3, %v4469_v49  ;;  %v8931_v49 = vld [vmem:[#allocation26_spill] sm:$0xff]  ;;  %v4477_v16 = vsel %vm584_vm12, 1.0, %v8899_v10  ;;  %v4687_v58 = vsel %vm1291_vm10, 1.0, %v8899_v10 }
 0x16c   :  { %5323 = vmatpush3.msra.mxu1 %v4825_v21  ;;  %5738 = vmatprep.subr.mxu0 %v8899_v10  ;;  %v4822_v21 = vld [vmem:[%s8820_s2 + $0x2a8] sm:$0xff]  ;;  %vm585_vm14 = vcmp.eq.s32.totalorder %v8931_v49, %v6631_v30 }
 0x16d   :  { %2970 = vperm.xlu1 %5921, %v4910_v20   ;;  %2967 = vperm.xlu0 %5920, %v4909_v56   ;;  %v7611_v46 = vpop.permute.xlu1 %1227  ;;  %v4683_v20 = vsel %vm1287_vm13, 1.0, %v8899_v10  ;;  %v4837_v56 = vld [vmem:[%s8820_s2 + $0x320] sm:$0xff]  ;;  %v7658_v37 = vpop.permute.xlu0 %552  ;;  %v4814_v49 = vld [vmem:[%s8820_s2 + $0x268] sm:$0xff] }
 0x16e   :  { %5609 = vmatmul.mubr.msk.f32.gmra.mxu1 %vm1415_vm3, %v4676_v18  ;;  %5653 = vmatmul.mubr.msk.f32.gmra.mxu0 %vm1415_vm3, %v4470_v43  ;;  %v8932_v43 = vld [vmem:[#allocation29_spill] sm:$0xff]  ;;  %v4478_v18 = vsel %vm585_vm14, 1.0, %v8899_v10  ;;  %vm1292_vm12 = vcmp.eq.s32.totalorder %v7611_v46, %v6631_v30 }
 0x16f   :  { %5611 = vmatprep.mubr.msk.f32.mxu1 %vm1415_vm3, %v4677_v0  ;;  %5655 = vmatprep.mubr.msk.f32.mxu0 %vm1415_vm3, %v4471_v55  ;;  %vm586_vm4 = vcmp.eq.s32.totalorder %v8932_v43, %v6631_v30  ;;  %v8934_v0 = vld [vmem:[#allocation31_spill] sm:$0xff]  ;;  %v4688_v63 = vsel %vm1292_vm12, 1.0, %v8899_v10  ;;  %v5922_v43 = vld [vmem:[%s8819_s1 + $0x8] sm:$0xff] }
 0x170   :  { %5324 = vmatprep.subr.mxu1 %v4840_v15  ;;  %5739 = vmatpush3.msra.mxu0 %v4849_v4  ;;  %v8933_v15 = vld [vmem:[#allocation28_spill] sm:$0xff]  ;;  %v4684_v4 = vsel %vm1288_vm15, 1.0, %v8899_v10  ;;  %v4479_v55 = vsel %vm586_vm4, 1.0, %v8899_v10  ;;  %vm588_vm8 = vcmp.eq.s32.totalorder %v8934_v0, %v6631_v30  ;;  %v4846_v0 = vld [vmem:[%s8820_s2 + $0x368] sm:$0xff] }
 0x171   :  { %2976 = vperm.xlu1 %5921, %v4912_v38   ;;  %2973 = vperm.xlu0 %5920, %v4911_v57   ;;  %vm587_vm7 = vcmp.eq.s32.totalorder %v8933_v15, %v6631_v30  ;;  %v4685_v38 = vsel %vm1289_vm5, 1.0, %v8899_v10  ;;  %v1231_v57 = vpop.permute.xlu1 %1230  ;;  %v4481_v61 = vsel %vm588_vm8, 1.0, %v8899_v10  ;;  %v7707_v41 = vpop.permute.xlu0 %555  ;;  %v8941_v15 = vld [vmem:[#allocation38_spill] sm:$0xff] }
 0x172   :  { %5612 = vmatmul.mubr.msk.f32.gmra.mxu1 %vm1415_vm3, %v4678_v31  ;;  %5656 = vmatmul.mubr.msk.f32.gmra.mxu0 %vm1415_vm3, %v4472_v7  ;;  %v4819_v7 = vld [vmem:[%s8820_s2 + $0x290] sm:$0xff]  ;;  %v4480_v31 = vsel %vm587_vm7, 1.0, %v8899_v10  ;;  %vm1293_vm13 = vcmp.eq.s32.totalorder %v1231_v57, %v6631_v30  ;;  %vm595_vm8 = vcmp.eq.s32.totalorder %v8941_v15, %v6631_v30  ;;  %v5924_v57 = vld [vmem:[%s8819_s1 + $0x20] sm:$0xff] }
 0x173   :  { %5614 = vmatprep.mubr.msk.f32.mxu1 %vm1415_vm3, %v4679_v33  ;;  %5658 = vmatprep.mubr.msk.f32.mxu0 %vm1415_vm3, %v4473_v51  ;;  %v4818_v51 = vld [vmem:[%s8820_s2 + $0x288] sm:$0xff]  ;;  %v8936_v33 = vld [vmem:[#allocation32_spill] sm:$0xff]  ;;  %v4689_v47 = vsel %vm1293_vm13, 1.0, %v8899_v10  ;;  %v8954_v15 = vld [vmem:[#allocation59_spill] sm:$0xff] }
 0x174   :  { %5325 = vmatpush3.msra.mxu1 %v4824_v54  ;;  %5740 = vmatprep.subr.mxu0 %v8899_v10  ;;  %v8935_v54 = vld [vmem:[#allocation30_spill] sm:$0xff]  ;;  %vm590_vm0 = vcmp.eq.s32.totalorder %v8936_v33, %v6631_v30 }
 0x175   :  { %2982 = vperm.xlu1 %5921, %v4914_v17   ;;  %2979 = vperm.xlu0 %5920, %v4913_v48   ;;  %vm589_vm11 = vcmp.eq.s32.totalorder %v8935_v54, %v6631_v30  ;;  %v4686_v17 = vsel %vm1290_vm9, 1.0, %v8899_v10  ;;  %v4833_v48 = vld [vmem:[%s8820_s2 + $0x300] sm:$0xff]  ;;  %v5925_v54 = vld [vmem:[%s8819_s1 + $0x18] sm:$0xff] }
 0x176   :  { %5615 = vmatmul.mubr.msk.f32.gmra.mxu1 %vm1415_vm3, %v4680_v45  ;;  %5659 = vmatmul.mubr.msk.f32.gmra.mxu0 %vm1415_vm3, %v4474_v60  ;;  %v4817_v60 = vld [vmem:[%s8820_s2 + $0x280] sm:$0xff]  ;;  %v4482_v45 = vsel %vm589_vm11, 1.0, %v8899_v10 }
 0x177   :  { %5617 = vmatprep.mubr.msk.f32.mxu1 %vm1415_vm3, %v4681_v52  ;;  %5661 = vmatprep.mubr.msk.f32.mxu0 %vm1415_vm3, %v4475_v2  ;;  %v4483_v2 = vsel %vm590_vm0, 1.0, %v8899_v10  ;;  %v8937_v52 = vld [vmem:[#allocation33_spill] sm:$0xff] }
 0x178   :  { %5326 = vmatprep.subr.mxu1 %v4839_v25  ;;  %5741 = vmatpush3.msra.mxu0 %v4848_v22  ;;  %v1234_v25 = vpop.permute.xlu1 %1233  ;;  %v4832_v22 = vld [vmem:[%s8820_s2 + $0x2f8] sm:$0xff]  ;;  %vm591_vm14 = vcmp.eq.s32.totalorder %v8937_v52, %v6631_v30 }
 0x179   :  { %5327 = vmatpush3.msra.mxu1 %v4823_v26  ;;  %2988 = vperm.xlu1 %5921, %v4916_v39   ;;  %v4816_v26 = vld [vmem:[%s8820_s2 + $0x278] sm:$0xff]  ;;  %v8938_v39 = vld [vmem:[#allocation34_spill] sm:$0xff]  ;;  %vm1294_vm4 = vcmp.eq.s32.totalorder %v1234_v25, %v6631_v30 }
 0x17a   :  { %2985 = vperm.xlu0 %5920, %v4915_v9   ;;  %5618 = vmatmul.mubr.msk.f32.gmra.mxu1 %vm1415_vm3, %v4682_v50  ;;  %vm592_vm15 = vcmp.eq.s32.totalorder %v8938_v39, %v6631_v30  ;;  %v4831_v9 = vld [vmem:[%s8820_s2 + $0x2f0] sm:$0xff]  ;;  %v4484_v50 = vsel %vm591_vm14, 1.0, %v8899_v10  ;;  %v5929_v39 = vld [vmem:[%s8819_s1 + $0x48] sm:$0xff] }
 0x17b   :  { %5662 = vmatmul.mubr.msk.f32.gmra.mxu0 %vm1415_vm3, %v4476_v3  ;;  %5328 = vmatprep.subr.mxu1 %v4838_v27  ;;  %v4815_v27 = vld [vmem:[%s8820_s2 + $0x270] sm:$0xff]  ;;  %v4830_v3 = vld [vmem:[%s8820_s2 + $0x2e8] sm:$0xff]  ;;  %v4485_v46 = vsel %vm592_vm15, 1.0, %v8899_v10 }
 0x17c   :  { %5620 = vmatprep.mubr.msk.f32.mxu1 %vm1415_vm3, %v4683_v20  ;;  %5664 = vmatprep.mubr.msk.f32.mxu0 %vm1415_vm3, %v4477_v16  ;;  %v8940_v16 = vld [vmem:[#allocation36_spill] sm:$0xff]  ;;  %v4690_v20 = vsel %vm1294_vm4, 1.0, %v8899_v10  ;;  %v5928_v25 = vld [vmem:[%s8819_s1 + $0x50] sm:$0xff] }
 0x17d   :  { %5329 = vmatpush3.msra.mxu1 %v4822_v21  ;;  %2994 = vperm.xlu1 %5921, %v4918_v11   ;;  %v8939_v21 = vld [vmem:[#allocation35_spill] sm:$0xff]  ;;  %v7758_v11 = vpop.permute.xlu0 %558  ;;  %vm594_vm7 = vcmp.eq.s32.totalorder %v8940_v16, %v6631_v30  ;;  %v8951_v16 = vld [vmem:[#allocation53_spill] sm:$0xff] }
 0x17e   :  { %5330 = vmatprep.subr.mxu1 %v4837_v56  ;;  %2991 = vperm.xlu0 %5920, %v4917_v34   ;;  %vm593_vm5 = vcmp.eq.s32.totalorder %v8939_v21, %v6631_v30  ;;  %v4829_v56 = vld [vmem:[%s8820_s2 + $0x2e0] sm:$0xff]  ;;  %v8948_v52 = vld [vmem:[#allocation47_spill] sm:$0xff] }
 0x17f   :  { %5331 = vmatpush3.msra.mxu1 %v4821_v35  ;;  %5665 = vmatmul.mubr.msk.f32.gmra.mxu0 %vm1415_vm3, %v4478_v18  ;;  %v4813_v34 = vld [vmem:[%s8820_s2 + $0x260] sm:$0xff]  ;;  %v4486_v35 = vsel %vm593_vm5, 1.0, %v8899_v10  ;;  %v4487_v18 = vsel %vm594_vm7, 1.0, %v8899_v10  ;;  %vm602_vm14 = vcmp.eq.s32.totalorder %v8948_v52, %v6631_v30  ;;  %vm605_vm5 = vcmp.eq.s32.totalorder %v8951_v16, %v6631_v30 }
 0x180   :  { %5621 = vmatmul.mubr.msk.f32.gmra.mxu1 %vm1415_vm3, %v4684_v4  ;;  %5332 = vmatprep.subr.mxu1 %v4836_v8  ;;  %v4847_v8 = vld [vmem:[%s8820_s2 + $0x370] sm:$0xff]  ;;  %v5932_v21 = vld [vmem:[%s8819_s1 + $0x80] sm:$0xff] }
 0x181   :  { %5623 = vmatprep.mubr.msk.f32.mxu1 %vm1415_vm3, %v4685_v38  ;;  %5667 = vmatprep.mubr.msk.f32.mxu0 %vm1415_vm3, %v4479_v55  ;;  %v8942_v4 = vld [vmem:[#allocation39_spill] sm:$0xff]  ;;  %v5923_v55 = vld [vmem:[%s8819_s1] sm:$0xff]  ;;  %v4488_v38 = vsel %vm595_vm8, 1.0, %v8899_v10 }
 0x182   :  { %5333 = vmatpush3.msra.mxu1 %v4820_v53  ;;  %5742 = vmatprep.subr.mxu0 %v8899_v10  ;;  %vm596_vm9 = vcmp.eq.s32.totalorder %v8942_v4, %v6631_v30  ;;  %v7789_v53 = vpop.permute.xlu0 %561 }
 0x183   :  { %5334 = vmatprep.subr.mxu1 %v4835_v32  ;;  %5668 = vmatmul.mubr.msk.f32.gmra.mxu0 %vm1415_vm3, %v4480_v31  ;;  %v4489_v32 = vsel %vm596_vm9, 1.0, %v8899_v10  ;;  %v4845_v31 = vld [vmem:[%s8820_s2 + $0x360] sm:$0xff] }
 0x184   :  { %5335 = vmatpush3.msra.mxu1 %v4819_v7  ;;  %5670 = vmatprep.mubr.msk.f32.mxu0 %vm1415_vm3, %v4481_v61  ;;  %v8943_v7 = vld [vmem:[#allocation40_spill] sm:$0xff] }
 0x185   :  { %5624 = vmatmul.mubr.msk.f32.gmra.mxu1 %vm1415_vm3, %v4686_v17  ;;  %5336 = vmatprep.subr.mxu1 %v4834_v5  ;;  %vm597_vm10 = vcmp.eq.s32.totalorder %v8943_v7, %v6631_v30  ;;  %v8944_v5 = vld [vmem:[#allocation41_spill] sm:$0xff]  ;;  %v8945_v17 = vld [vmem:[#allocation42_spill] sm:$0xff]  ;;  %v571_v7 = vpop.permute.xlu1 %570 }
 0x186   :  { %5626 = vmatprep.mubr.msk.f32.mxu1 %vm1415_vm3, %v4687_v58  ;;  %5337 = vmatpush3.msra.mxu1 %v4818_v51  ;;  %vm598_vm11 = vcmp.eq.s32.totalorder %v8944_v5, %v6631_v30  ;;  %v4490_v61 = vsel %vm597_vm10, 1.0, %v8899_v10  ;;  %v5926_v51 = vld [vmem:[%s8819_s1 + $0x38] sm:$0xff]  ;;  %vm599_vm0 = vcmp.eq.s32.totalorder %v8945_v17, %v6631_v30  ;;  %vm608_vm10 = vcmp.eq.s32.totalorder %v8954_v15, %v6631_v30  ;;  %v5936_v5 = vld [vmem:[%s8819_s1 + $0x10] sm:$0xff]  ;;  %v5941_v17 = vld [vmem:[%s8819_s1 + $0x88] sm:$0xff] }
 0x187   :  { %5338 = vmatprep.subr.mxu1 %v4833_v48  ;;  %5671 = vmatmul.mubr.msk.f32.gmra.mxu0 %vm1415_vm3, %v4482_v45  ;;  %v4491_v33 = vsel %vm598_vm11, 1.0, %v8899_v10  ;;  %v7823_v48 = vpop.permute.xlu0 %564  ;;  %v8946_v58 = vld [vmem:[#allocation43_spill] sm:$0xff]  ;;  %v4492_v45 = vsel %vm599_vm0, 1.0, %v8899_v10  ;;  %vm609_vm11 = vcmp.eq.s32.totalorder %v7087_v59, %v6631_v30  ;;  %vm610_vm0 = vcmp.eq.s32.totalorder %v7099_v6, %v6631_v30 }
 0x188   :  { %5339 = vmatpush3.msra.mxu1 %v4817_v60  ;;  %5673 = vmatprep.mubr.msk.f32.mxu0 %vm1415_vm3, %v4483_v2  ;;  %vm600_vm12 = vcmp.eq.s32.totalorder %v8946_v58, %v6631_v30  ;;  %v5927_v60 = vld [vmem:[%s8819_s1 + $0x30] sm:$0xff]  ;;  %v8947_v2 = vld [vmem:[#allocation45_spill] sm:$0xff] }
 0x189   :  { %5627 = vmatmul.mubr.msk.f32.gmra.mxu1 %vm1415_vm3, %v4688_v63  ;;  %5340 = vmatprep.subr.mxu1 %v4832_v22  ;;  %v4493_v22 = vsel %vm600_vm12, 1.0, %v8899_v10  ;;  %vm601_vm13 = vcmp.eq.s32.totalorder %v8947_v2, %v6631_v30  ;;  %vm611_vm12 = vcmp.eq.s32.totalorder %v7106_v23, %v6631_v30 }
 0x18a   :  { %5629 = vmatprep.mubr.msk.f32.mxu1 %vm1415_vm3, %v4689_v47  ;;  %5341 = vmatpush3.msra.mxu1 %v4816_v26  ;;  %v4494_v63 = vsel %vm601_vm13, 1.0, %v8899_v10  ;;  %v4495_v47 = vsel %vm602_vm14, 1.0, %v8899_v10  ;;  %vm612_vm13 = vcmp.eq.s32.totalorder %v7119_v19, %v6631_v30  ;;  %v4504_v59 = vsel %vm611_vm12, 1.0, %v8899_v10 }
 0x18b   :  { %5342 = vmatprep.subr.mxu1 %v4831_v9  ;;  %5674 = vmatmul.mubr.msk.f32.gmra.mxu0 %vm1415_vm3, %v4484_v50  ;;  %v7844_v26 = vpop.permute.xlu0 %567  ;;  %v5930_v9 = vld [vmem:[%s8819_s1 + $0x68] sm:$0xff]  ;;  %v8950_v50 = vld [vmem:[#allocation51_spill] sm:$0xff]  ;;  %v4505_v6 = vsel %vm612_vm13, 1.0, %v8899_v10  ;;  %vm613_vm14 = vcmp.eq.s32.totalorder %v7141_v24, %v6631_v30  ;;  %vm623_vm12 = vcmp.eq.s32.totalorder %v7563_v14, %v6631_v30  ;;  %vm624_vm13 = vcmp.eq.s32.totalorder %v7608_v44, %v6631_v30 }
 0x18c   :  { %5343 = vmatpush3.msra.mxu1 %v4815_v27  ;;  %5676 = vmatprep.mubr.msk.f32.mxu0 %vm1415_vm3, %v4485_v46  ;;  %v8949_v27 = vld [vmem:[#allocation49_spill] sm:$0xff]  ;;  %vm604_vm4 = vcmp.eq.s32.totalorder %v8950_v50, %v6631_v30  ;;  %v4506_v23 = vsel %vm613_vm14, 1.0, %v8899_v10  ;;  %vm625_vm14 = vcmp.eq.s32.totalorder %v7658_v37, %v6631_v30 }
 0x18d   :  { %5630 = vmatmul.mubr.msk.f32.gmra.mxu1 %vm1415_vm3, %v4690_v20  ;;  %5344 = vmatprep.subr.mxu1 %v4830_v3  ;;  %vm603_vm15 = vcmp.eq.s32.totalorder %v8949_v27, %v6631_v30  ;;  %v5931_v3 = vld [vmem:[%s8819_s1 + $0x60] sm:$0xff]  ;;  %v4518_v14 = vsel %vm625_vm14, 1.0, %v8899_v10 }
 0x18e   :  { %5345 = vmatpush3.msra.mxu1 %v4814_v49  ;;  %2619 = vmatprep.mubr.f32.mxu1 %v5922_v43  ;;  %v4496_v46 = vsel %vm603_vm15, 1.0, %v8899_v10  ;;  %v4497_v49 = vsel %vm604_vm4, 1.0, %v8899_v10  ;;  %v5934_v43 = vld [vmem:[%s8819_s1 + $0x98] sm:$0x3]  ;;  %vm614_vm15 = vcmp.eq.s32.totalorder %v7183_v36, %v6631_v30  ;;  %vm615_vm4 = vcmp.eq.s32.totalorder %v7215_v40, %v6631_v30 }
 0x18f   :  { %5346 = vmatprep.subr.mxu1 %v4829_v56  ;;  %5677 = vmatmul.mubr.msk.f32.gmra.mxu0 %vm1415_vm3, %v4486_v35  ;;  %v2818_v20 = vpop.permute.xlu0 %2817  ;;  %v8952_v56 = vld [vmem:[#allocation55_spill] sm:$0xff]  ;;  %v4498_v35 = vsel %vm605_vm5, 1.0, %v8899_v10  ;;  %v4507_v19 = vsel %vm614_vm15, 1.0, %v8899_v10  ;;  %vm616_vm5 = vcmp.eq.s32.totalorder %v7247_v28, %v6631_v30  ;;  %v4508_v24 = vsel %vm615_vm4, 1.0, %v8899_v10 }
 0x190   :  { %5347 = vmatpush3.msra.mxu1 %v4813_v34  ;;  %5679 = vmatprep.mubr.msk.f32.mxu0 %vm1415_vm3, %v4487_v18  ;;  %vm606_vm7 = vcmp.eq.s32.totalorder %v8952_v56, %v6631_v30  ;;  %v5933_v34 = vld [vmem:[%s8819_s1 + $0x78] sm:$0xff]  ;;  %vm2996_vm8 = vcmp.eq.s32.totalorder %v2818_v20, %v6631_v30  ;;  %v8953_v18 = vld [vmem:[#allocation57_spill] sm:$0xff]  ;;  %v4509_v36 = vsel %vm616_vm5, 1.0, %v8899_v10  ;;  %vm626_vm15 = vcmp.eq.s32.totalorder %v7707_v41, %v6631_v30 }
 0x191   :  { %2620 = vmatmul.mubr.f32.vlgmr.msra.gmra.mxu1 %v5923_v55  ;;  %5743 = vmatpush3.msra.mxu0 %v4847_v8  ;;  %v4499_v8 = vsel %vm606_vm7, 1.0, %v8899_v10  ;;  %vm607_vm9 = vcmp.eq.s32.totalorder %v8953_v18, %v6631_v30  ;;  %v4919_v4 = vsel %vm2996_vm8, 1.0, %v8899_v10  ;;  %v5935_v55 = vld [vmem:[%s8819_s1 + $0x90] sm:$0x3]  ;;  %vm617_vm7 = vcmp.eq.s32.totalorder %v7302_v62, %v6631_v30 }
 0x192   :  { %2624 = vmatprep.mubr.f32.mxu1 %v5924_v57  ;;  %5744 = vmatprep.subr.mxu0 %v8899_v10  ;;  %v4502_v57 = vsel %vm609_vm11, 1.0, %v8899_v10  ;;  %vm618_vm8 = vcmp.eq.s32.totalorder %v7336_v42, %v6631_v30  ;;  %v4510_v40 = vsel %vm617_vm7, 1.0, %v8899_v10  ;;  %vm621_vm11 = vcmp.eq.s32.totalorder %v7472_v1, %v6631_v30 }
 0x193   :  { %5680 = vmatmul.mubr.msk.f32.gmra.mxu0 %vm1415_vm3, %v4488_v38  ;;  %v4501_v38 = vsel %vm608_vm10, 1.0, %v8899_v10  ;;  %v4511_v28 = vsel %vm618_vm8, 1.0, %v8899_v10  ;;  %vm620_vm10 = vcmp.eq.s32.totalorder %v7419_v12, %v6631_v30  ;;  %v4516_v1 = vsel %vm623_vm12, 1.0, %v8899_v10 }
 0x194   :  { %5682 = vmatprep.mubr.msk.f32.mxu0 %vm1415_vm3, %v4489_v32  ;;  %5745 = vmatpush3.msra.mxu0 %v4846_v0  ;;  %v4500_v0 = vsel %vm607_vm9, 1.0, %v8899_v10  ;;  %v4503_v32 = vsel %vm610_vm0, 1.0, %v8899_v10  ;;  %vm619_vm9 = vcmp.eq.s32.totalorder %v7386_v29, %v6631_v30  ;;  %v4513_v42 = vsel %vm620_vm10, 1.0, %v8899_v10 }
 0x195   :  { %2625 = vmatmul.mubr.f32.gmra.mxu1 %v5925_v54  ;;  %5746 = vmatprep.subr.mxu0 %v8899_v10  ;;  %v4512_v62 = vsel %vm619_vm9, 1.0, %v8899_v10  ;;  %vm622_vm0 = vcmp.eq.s32.totalorder %v7510_v13, %v6631_v30  ;;  %v4514_v29 = vsel %vm621_vm11, 1.0, %v8899_v10  ;;  %v4517_v13 = vsel %vm624_vm13, 1.0, %v8899_v10  ;;  %v5937_v54 = vld [vmem:[%s8819_s1 + $0x28] sm:$0xff] }
 0x196   :  { %2629 = vmatprep.mubr.f32.mxu1 %v5926_v51  ;;  %5747 = vmatpush3.msra.mxu0 %v4845_v31  ;;  %v4515_v12 = vsel %vm622_vm0, 1.0, %v8899_v10  ;;  %v4519_v44 = vsel %vm626_vm15, 1.0, %v8899_v10  ;;  %vm627_vm4 = vcmp.eq.s32.totalorder %v7758_v11, %v6631_v30  ;;  %vm628_vm5 = vcmp.eq.s32.totalorder %v7789_v53, %v6631_v30  ;;  %v5939_v51 = vld [vmem:[%s8819_s1 + $0x58] sm:$0xff] }
 0x197   :  { %5683 = vmatmul.mubr.msk.f32.gmra.mxu0 %vm1415_vm3, %v4490_v61  ;;  %5873 = vmatprep.subr.mxu0 %v8899_v10  ;;  %v4520_v37 = vsel %vm627_vm4, 1.0, %v8899_v10  ;;  %v4521_v41 = vsel %vm628_vm5, 1.0, %v8899_v10  ;;  %vm629_vm7 = vcmp.eq.s32.totalorder %v7823_v48, %v6631_v30  ;;  %vm630_vm8 = vcmp.eq.s32.totalorder %v7844_v26, %v6631_v30  ;;  %v5938_v61 = vld [vmem:[%s8819_s1 + $0x40] sm:$0xff] }
 0x198   :  { %5685 = vmatprep.mubr.msk.f32.mxu0 %vm1415_vm3, %v4491_v33  ;;  %v4522_v11 = vsel %vm629_vm7, 1.0, %v8899_v10  ;;  %vm631_vm9 = vcmp.eq.s32.totalorder %v571_v7, %v6631_v30  ;;  %v4523_v53 = vsel %vm630_vm8, 1.0, %v8899_v10  ;;  %v5940_v33 = vld [vmem:[%s8819_s1 + $0x70] sm:$0xff]  ;;  %v5942_v48 = vld [vmem:[%s8819_s1 + $0xa0] sm:$0x3] }
 0x199   :  { %2630 = vmatmul.mubr.f32.gmra.mxu1 %v5927_v60  ;;  %v4524_v31 = vsel %vm631_vm9, 1.0, %v8899_v10 }
 0x19a   :  { %2634 = vmatprep.mubr.f32.mxu1 %v5928_v25 }
 0x19b   :  { %5686 = vmatmul.mubr.msk.f32.gmra.mxu0 %vm1415_vm3, %v4492_v45 }
 0x19c   :  { %5688 = vmatprep.mubr.msk.f32.mxu0 %vm1415_vm3, %v4493_v22 }
 0x19d   :  { %2635 = vmatmul.mubr.f32.gmra.mxu1 %v5929_v39 }
 0x19e   :  { %2639 = vmatprep.mubr.f32.mxu1 %v5930_v9 }
 0x19f   :  { %5689 = vmatmul.mubr.msk.f32.gmra.mxu0 %vm1415_vm3, %v4494_v63 }
 0x1a0   :  { %5691 = vmatprep.mubr.msk.f32.mxu0 %vm1415_vm3, %v4495_v47 }
 0x1a1   :  { %2640 = vmatmul.mubr.f32.gmra.mxu1 %v5931_v3 }
 0x1a2   :  { %2644 = vmatprep.mubr.f32.mxu1 %v5932_v21 }
 0x1a3   :  { %5692 = vmatmul.mubr.msk.f32.gmra.mxu0 %vm1415_vm3, %v4496_v46 }
 0x1a4   :  { %5694 = vmatprep.mubr.msk.f32.mxu0 %vm1415_vm3, %v4497_v49 }
 0x1a5   :  { %2645 = vmatmul.mubr.f32.gmra.mxu1 %v5933_v34 }
 0x1a6   :  { %2649 = vmatprep.mubr.f32.mxu1 %v5934_v43 }
 0x1a7   :  { %5695 = vmatmul.mubr.msk.f32.gmra.mxu0 %vm1415_vm3, %v4498_v35 }
 0x1a8   :  { %5697 = vmatprep.mubr.msk.f32.mxu0 %vm1415_vm3, %v4499_v8 }
 0x1a9   :  { %2650 = vmatmul.mubr.f32.gmra.mxu1 %v5935_v55 }
 0x1aa   :  { %5783 = vmatprep.mubr.msk.f32.mxu1 %vm1415_vm3, %v4919_v4 }
 0x1ab   :  { %5698 = vmatmul.mubr.msk.f32.gmra.mxu0 %vm1415_vm3, %v4500_v0 }
 0x1ac   :  { %5700 = vmatprep.mubr.msk.f32.mxu0 %vm1415_vm3, %v4501_v38 }
 0x1af   :  { %5701 = vmatmul.mubr.msk.f32.gmra.mxu0 %vm1415_vm3, %v4502_v57 }
 0x1b0   :  { %5703 = vmatprep.mubr.msk.f32.mxu0 %vm1415_vm3, %v4503_v32 }
 0x1b3   :  { %5704 = vmatmul.mubr.msk.f32.gmra.mxu0 %vm1415_vm3, %v4504_v59 }
 0x1b4   :  { %5706 = vmatprep.mubr.msk.f32.mxu0 %vm1415_vm3, %v4505_v6 }
 0x1b7   :  { %5707 = vmatmul.mubr.msk.f32.gmra.mxu0 %vm1415_vm3, %v4506_v23 }
 0x1b8   :  { %5709 = vmatprep.mubr.msk.f32.mxu0 %vm1415_vm3, %v4507_v19 }
 0x1bb   :  { %5710 = vmatmul.mubr.msk.f32.gmra.mxu0 %vm1415_vm3, %v4508_v24 }
 0x1bc   :  { %5712 = vmatprep.mubr.msk.f32.mxu0 %vm1415_vm3, %v4509_v36 }
 0x1bf   :  { %5713 = vmatmul.mubr.msk.f32.gmra.mxu0 %vm1415_vm3, %v4510_v40 }
 0x1c0   :  { %5715 = vmatprep.mubr.msk.f32.mxu0 %vm1415_vm3, %v4511_v28 }
 0x1c3   :  { %5716 = vmatmul.mubr.msk.f32.gmra.mxu0 %vm1415_vm3, %v4512_v62 }
 0x1c4   :  { %5718 = vmatprep.mubr.msk.f32.mxu0 %vm1415_vm3, %v4513_v42 }
 0x1c7   :  { %5719 = vmatmul.mubr.msk.f32.gmra.mxu0 %vm1415_vm3, %v4514_v29 }
 0x1c8   :  { %5721 = vmatprep.mubr.msk.f32.mxu0 %vm1415_vm3, %v4515_v12 }
 0x1cb   :  { %5722 = vmatmul.mubr.msk.f32.gmra.mxu0 %vm1415_vm3, %v4516_v1 }
 0x1cc   :  { %5724 = vmatprep.mubr.msk.f32.mxu0 %vm1415_vm3, %v4517_v13 }
 0x1cf   :  { %5725 = vmatmul.mubr.msk.f32.gmra.mxu0 %vm1415_vm3, %v4518_v14 }
 0x1d0   :  { %5727 = vmatprep.mubr.msk.f32.mxu0 %vm1415_vm3, %v4519_v44 }
 0x1d3   :  { %5728 = vmatmul.mubr.msk.f32.gmra.mxu0 %vm1415_vm3, %v4520_v37 }
 0x1d4   :  { %5730 = vmatprep.mubr.msk.f32.mxu0 %vm1415_vm3, %v4521_v41 }
 0x1d7   :  { %5731 = vmatmul.mubr.msk.f32.gmra.mxu0 %vm1415_vm3, %v4522_v11 }
 0x1d8   :  { %5733 = vmatprep.mubr.msk.f32.mxu0 %vm1415_vm3, %v4523_v53 }
 0x1db   :  { %5734 = vmatmul.mubr.msk.f32.gmra.mxu0 %vm1415_vm3, %v4524_v31 }
 0x1dc   :  { %5748 = vmatprep.mubr.msk.f32.mxu0 %vm5967_vm1, %v8899_v10 }
 0x1df   :  { %5749 = vmatmul.mubr.msk.f32.vlgmr.msra.gmra.mxu0 %vm106_vm2, %v5936_v5 }
 0x1e0   :  { %5751 = vmatprep.mubr.msk.f32.mxu0 %vm5967_vm1, %v8899_v10 }
 0x1e3   :  { %5752 = vmatmul.mubr.msk.f32.gmra.mxu0 %vm106_vm2, %v5937_v54 }
 0x1e4   :  { %5754 = vmatprep.mubr.msk.f32.mxu0 %vm5967_vm1, %v8899_v10 }
 0x1e7   :  { %5755 = vmatmul.mubr.msk.f32.gmra.mxu0 %vm106_vm2, %v5938_v61 }
 0x1e8   :  { %5757 = vmatprep.mubr.msk.f32.mxu0 %vm5967_vm1, %v8899_v10 }
 0x1eb   :  { %5758 = vmatmul.mubr.msk.f32.gmra.mxu0 %vm106_vm2, %v5939_v51 }
 0x1ec   :  { %5760 = vmatprep.mubr.msk.f32.mxu0 %vm5967_vm1, %v8899_v10 }
 0x1ef   :  { %5761 = vmatmul.mubr.msk.f32.gmra.mxu0 %vm106_vm2, %v5940_v33 }
 0x1f0   :  { %5763 = vmatprep.mubr.msk.f32.mxu0 %vm5967_vm1, %v8899_v10 }
 0x1f3   :  { %5764 = vmatmul.mubr.msk.f32.gmra.mxu0 %vm106_vm2, %v5941_v17 }
 0x1f4   :  { %5766 = vmatprep.mubr.msk.f32.mxu0 %vm5967_vm1, %v8899_v10 }
 0x1f7   :  { %5767 = vmatmul.mubr.msk.f32.gmra.mxu0 %vm106_vm2, %v5942_v48 }
 0x1f8   :  { %5877 = vmatprep.mubr.msk.f32.mxu0 %vm5967_vm1, %v8899_v10 }
 0x1fb   :  { %v5544_v58 = vpop.f32.mrf.mxu0  ;;  %v8033_v60 = vpop.f32.mrf.mxu1 }
 0x1fc   :  { %8955 = vst [vmem:[#allocation37_spill] sm:$0xff] %v8033_v60 }
 0x1fd   :  { %v1666_v45 = vpop.f32.mrf.mxu0  ;;  %v8035_v25 = vpop.f32.mrf.mxu1 }
 0x1fe   :  { %8956 = vst [vmem:[#allocation5_spill] sm:$0xff] %v8035_v25 }
 0x200   :  { %v5547_v22 = vpop.f32.mrf.mxu0  ;;  %v8037_v2 = vpop.f32.mrf.mxu1 }
 0x201   :  { %8957 = vst [vmem:[#allocation44_spill] sm:$0xff] %v8037_v2 }
 0x202   :  { %v1676_v52 = vpop.f32.mrf.mxu0  ;;  %v8039_v26 = vpop.f32.mrf.mxu1 }
 0x203   :  { %8958 = vst [vmem:[#allocation7_spill] sm:$0xff] %v8039_v26 }
 0x205   :  { %v5550_v39 = vpop.f32.mrf.mxu0  ;;  %v8041_v63 = vpop.f32.mrf.mxu1 }
 0x206   :  { %8959 = vst [vmem:[#allocation46_spill] sm:$0xff] %v8041_v63 }
 0x207   :  { %v1686_v9 = vpop.f32.mrf.mxu0  ;;  %v8043_v47 = vpop.f32.mrf.mxu1 }
 0x208   :  { %8960 = vst [vmem:[#allocation6_spill] sm:$0xff] %v8043_v47 }
 0x20a   :  { %v5553_v27 = vpop.f32.mrf.mxu0  ;;  %v8045_v50 = vpop.f32.mrf.mxu1 }
 0x20b   :  { %8961 = vst [vmem:[#allocation48_spill] sm:$0xff] %v8045_v50 }
 0x20c   :  { %v1696_v3 = vpop.f32.mrf.mxu0  ;;  %v8047_v46 = vpop.f32.mrf.mxu1 }
 0x20d   :  { %8962 = vst [vmem:[#allocation9_spill] sm:$0xff] %v8047_v46 }
 0x20e   :  { %v5556_v21 = vpop.f32.mrf.mxu0  ;;  %v8049_v49 = vpop.f32.mrf.mxu1 }
 0x20f   :  { %8963 = vst [vmem:[#allocation50_spill] sm:$0xff] %v8049_v49 }
 0x210   :  { %v1706_v16 = vpop.f32.mrf.mxu0  ;;  %v8051_v20 = vpop.f32.mrf.mxu1 }
 0x211   :  { %8964 = vst [vmem:[#allocation8_spill] sm:$0xff] %v8051_v20 }
 0x212   :  { %v5559_v56 = vpop.f32.mrf.mxu0  ;;  %v8053_v34 = vpop.f32.mrf.mxu1 }
 0x213   :  { %8965 = vst [vmem:[#allocation52_spill] sm:$0xff] %v8053_v34 }
 0x214   :  { %v1716_v35 = vpop.f32.mrf.mxu0  ;;  %v8055_v43 = vpop.f32.mrf.mxu1 }
 0x215   :  { %8966 = vst [vmem:[#allocation11_spill] sm:$0xff] %v8055_v43 }
 0x216   :  { %v5562_v8 = vpop.f32.mrf.mxu0  ;;  %v8057_v18 = vpop.f32.mrf.mxu1 }
 0x217   :  { %8967 = vst [vmem:[#allocation54_spill] sm:$0xff] %v8057_v18 }
 0x218   :  { %v1726_v15 = vpop.f32.mrf.mxu0  ;;  %v8059_v4 = vpop.f32.mrf.mxu1 }
 0x219   :  { %8968 = vst [vmem:[#allocation10_spill] sm:$0xff] %v8059_v4 }
 0x21a   :  { %v5565_v55 = vpop.f32.mrf.mxu0  ;;  %v8061_v0 = vpop.f32.mrf.mxu1 }
 0x21b   :  { %8969 = vst [vmem:[#allocation56_spill] sm:$0xff] %v8061_v0 }
 0x21c   :  { %v1736_v38 = vpop.f32.mrf.mxu0  ;;  %v8063_v57 = vpop.f32.mrf.mxu1 }
 0x21d   :  { %8970 = vst [vmem:[#allocation13_spill] sm:$0xff] %v8063_v57 }
 0x21e   :  { %v5568_v32 = vpop.f32.mrf.mxu0  ;;  %v8065_v6 = vpop.f32.mrf.mxu1 }
 0x21f   :  { %8971 = vst [vmem:[#allocation58_spill] sm:$0xff] %v8065_v6 }
 0x220   :  { %v1746_v59 = vpop.f32.mrf.mxu0  ;;  %v8067_v24 = vpop.f32.mrf.mxu1 }
 0x221   :  { %8972 = vst [vmem:[#allocation12_spill] sm:$0xff] %v8067_v24 }
 0x222   :  { %v5571_v23 = vpop.f32.mrf.mxu0  ;;  %v8071_v62 = vpop.f32.mrf.mxu1 }
 0x223   :  { %8973 = vst [vmem:[#allocation15_spill] sm:$0xff] %v8071_v62 }
 0x224   :  { %v1756_v19 = vpop.f32.mrf.mxu0  ;;  %v8077_v13 = vpop.f32.mrf.mxu1 }
 0x225   :  { %8974 = vst [vmem:[#allocation14_spill] sm:$0xff] %v8077_v13 }
 0x226   :  { %v5648_v36 = vpop.f32.mrf.mxu0  ;;  %v8083_v7 = vpop.f32.mrf.mxu1 }
 0x227   :  { %v8069_v40 = vadd.f32 %v5648_v36, %v5544_v58  ;;  %8975 = vst [vmem:[#allocation17_spill] sm:$0xff] %v8083_v7 }
 0x228   :  { %v2214_v28 = vpop.f32.mrf.mxu0  ;;  %v8089_v54 = vpop.f32.mrf.mxu1 }
 0x229   :  { %v8073_v42 = vadd.f32 %v2214_v28, %v1666_v45  ;;  %8976 = vst [vmem:[#allocation16_spill] sm:$0xff] %v8089_v54 }
 0x22a   :  { %v5651_v29 = vpop.f32.mrf.mxu0  ;;  %v8095_v48 = vpop.f32.mrf.mxu1 }
 0x22b   :  { %v8075_v12 = vadd.f32 %v5651_v29, %v5547_v22  ;;  %8977 = vst [vmem:[#allocation19_spill] sm:$0xff] %v8095_v48 }
 0x22c   :  { %v2224_v1 = vpop.f32.mrf.mxu0 }
 0x22d   :  { %v8079_v14 = vadd.f32 %v2224_v1, %v1676_v52  ;;  %v8101_v52 = vpop.f32.mrf.mxu1 }
 0x22e   :  { %v5654_v44 = vpop.f32.mrf.mxu0  ;;  %8978 = vst [vmem:[#allocation18_spill] sm:$0xff] %v8101_v52 }
 0x22f   :  { %v8081_v37 = vadd.f32 %v5654_v44, %v5550_v39 }
 0x230   :  { %v2234_v41 = vpop.f32.mrf.mxu0 }
 0x231   :  { %v8085_v11 = vadd.f32 %v2234_v41, %v1686_v9 }
 0x232   :  { %v5657_v53 = vpop.f32.mrf.mxu0 }
 0x233   :  { %v8087_v31 = vadd.f32 %v5657_v53, %v5553_v27 }
 0x234   :  { %v2244_v5 = vpop.f32.mrf.mxu0 }
 0x235   :  { %v8091_v61 = vadd.f32 %v2244_v5, %v1696_v3  ;;  %v8107_v3 = vpop.f32.mrf.mxu1 }
 0x236   :  { %v5660_v51 = vpop.f32.mrf.mxu0  ;;  %8979 = vst [vmem:[#allocation21_spill] sm:$0xff] %v8107_v3 }
 0x237   :  { %v8093_v33 = vadd.f32 %v5660_v51, %v5556_v21 }
 0x238   :  { %v2254_v17 = vpop.f32.mrf.mxu0 }
 0x239   :  { %v8097_v58 = vadd.f32 %v2254_v17, %v1706_v16  ;;  %v8113_v16 = vpop.f32.mrf.mxu1 }
 0x23a   :  { %8982 = vst [vmem:[#allocation22_spill] sm:$0xff] %v8113_v16 }
 0x23b   :  { %v5663_v45 = vpop.f32.mrf.mxu0 }
 0x23c   :  { %v8099_v22 = vadd.f32 %v5663_v45, %v5559_v56 }
 0x23d   :  { %v2264_v39 = vpop.f32.mrf.mxu0 }
 0x23e   :  { %v8103_v9 = vadd.f32 %v2264_v39, %v1716_v35  ;;  %v8119_v35 = vpop.f32.mrf.mxu1 }
 0x23f   :  { %v5666_v27 = vpop.f32.mrf.mxu0  ;;  %8985 = vst [vmem:[#allocation27_spill] sm:$0xff] %v8119_v35 }
 0x240   :  { %v8105_v36 = vadd.f32 %v5666_v27, %v5562_v8 }
 0x241   :  { %v2274_v21 = vpop.f32.mrf.mxu0 }
 0x242   :  { %v8109_v28 = vadd.f32 %v2274_v21, %v1726_v15  ;;  %v8125_v15 = vpop.f32.mrf.mxu1 }
 0x243   :  { %v5669_v29 = vpop.f32.mrf.mxu0  ;;  %8988 = vst [vmem:[#allocation28_spill] sm:$0xff] %v8125_v15 }
 0x244   :  { %8980 = vst [vmem:[#allocation20_spill] sm:$0xff] %v8109_v28  ;;  %v8111_v1 = vadd.f32 %v5669_v29, %v5565_v55 }
 0x245   :  { %v2284_v56 = vpop.f32.mrf.mxu0 }
 0x246   :  { %8981 = vst [vmem:[#allocation23_spill] sm:$0xff] %v8111_v1  ;;  %v8115_v44 = vadd.f32 %v2284_v56, %v1736_v38  ;;  %v8131_v38 = vpop.f32.mrf.mxu1 }
 0x247   :  { %v5672_v41 = vpop.f32.mrf.mxu0  ;;  %8991 = vst [vmem:[#allocation32_spill] sm:$0xff] %v8131_v38 }
 0x248   :  { %8983 = vst [vmem:[#allocation25_spill] sm:$0xff] %v8115_v44  ;;  %v8117_v53 = vadd.f32 %v5672_v41, %v5568_v32  ;;  %v8137_v21 = vpop.f32.mrf.mxu1 }
 0x249   :  { %v2294_v8 = vpop.f32.mrf.mxu0  ;;  %8994 = vst [vmem:[#allocation35_spill] sm:$0xff] %v8137_v21 }
 0x24a   :  { %8984 = vst [vmem:[#allocation24_spill] sm:$0xff] %v8117_v53  ;;  %v8121_v5 = vadd.f32 %v2294_v8, %v1746_v59 }
 0x24b   :  { %v5675_v51 = vpop.f32.mrf.mxu0 }
 0x24c   :  { %8986 = vst [vmem:[#allocation26_spill] sm:$0xff] %v8121_v5  ;;  %v8123_v17 = vadd.f32 %v5675_v51, %v5571_v23  ;;  %v8143_v23 = vpop.f32.mrf.mxu1 }
 0x24d   :  { %v2304_v55 = vpop.f32.mrf.mxu0  ;;  %8997 = vst [vmem:[#allocation39_spill] sm:$0xff] %v8143_v23 }
 0x24e   :  { %8987 = vst [vmem:[#allocation29_spill] sm:$0xff] %v8123_v17  ;;  %v8127_v45 = vadd.f32 %v2304_v55, %v1756_v19  ;;  %v8149_v41 = vpop.f32.mrf.mxu1 }
 0x24f   :  { %v8129_v39 = vpop.f32.mrf.mxu0  ;;  %9000 = vst [vmem:[#allocation42_spill] sm:$0xff] %v8149_v41 }
 0x250   :  { %8989 = vst [vmem:[#allocation31_spill] sm:$0xff] %v8127_v45  ;;  %8990 = vst [vmem:[#allocation30_spill] sm:$0xff] %v8129_v39  ;;  %v8155_v55 = vpop.f32.mrf.mxu1 }
 0x251   :  { %v8133_v27 = vpop.f32.mrf.mxu0  ;;  %9003 = vst [vmem:[#allocation47_spill] sm:$0xff] %v8155_v55 }
 0x252   :  { %8992 = vst [vmem:[#allocation33_spill] sm:$0xff] %v8133_v27  ;;  %v8161_v15 = vpop.f32.mrf.mxu1 }
 0x253   :  { %v8135_v32 = vpop.f32.mrf.mxu0  ;;  %9006 = vst [vmem:[#allocation53_spill] sm:$0xff] %v8161_v15 }
 0x254   :  { %8993 = vst [vmem:[#allocation34_spill] sm:$0xff] %v8135_v32  ;;  %v8167_v16 = vpop.f32.mrf.mxu1 }
 0x255   :  { %v8139_v59 = vpop.f32.mrf.mxu0  ;;  %9009 = vst [vmem:[#allocation59_spill] sm:$0xff] %v8167_v16 }
 0x256   :  { %8995 = vst [vmem:[#allocation36_spill] sm:$0xff] %v8139_v59  ;;  %v8173_v52 = vpop.f32.mrf.mxu1 }
 0x257   :  { %v8141_v29 = vpop.f32.mrf.mxu0  ;;  %9012 = vst [vmem:[#allocation62_spill] sm:$0xff] %v8173_v52 }
 0x258   :  { %8996 = vst [vmem:[#allocation38_spill] sm:$0xff] %v8141_v29  ;;  %v8179_v54 = vpop.f32.mrf.mxu1 }
 0x259   :  { %v8145_v56 = vpop.f32.mrf.mxu0  ;;  %9015 = vst [vmem:[#allocation65_spill] sm:$0xff] %v8179_v54 }
 0x25a   :  { %8998 = vst [vmem:[#allocation40_spill] sm:$0xff] %v8145_v56  ;;  %v8185_v13 = vpop.f32.mrf.mxu1 }
 0x25b   :  { %v8147_v19 = vpop.f32.mrf.mxu0  ;;  %9018 = vst [vmem:[#allocation68_spill] sm:$0xff] %v8185_v13 }
 0x25c   :  { %8999 = vst [vmem:[#allocation41_spill] sm:$0xff] %v8147_v19  ;;  %v8191_v24 = vpop.f32.mrf.mxu1 }
 0x25d   :  { %v8151_v8 = vpop.f32.mrf.mxu0  ;;  %9021 = vst [vmem:[#allocation71_spill] sm:$0xff] %v8191_v24  ;;  %v8213_v24 = vpop.permute.xlu1 %2820 }
 0x25e   :  { %9001 = vst [vmem:[#allocation43_spill] sm:$0xff] %v8151_v8  ;;  %vm2997_vm2 = vcmp.eq.s32.totalorder %v8213_v24, %v6631_v30 }
 0x25f   :  { %v8153_v51 = vpop.f32.mrf.mxu0 }
 0x260   :  { %9002 = vst [vmem:[#allocation45_spill] sm:$0xff] %v8153_v51 }
 0x261   :  { %v8157_v38 = vpop.f32.mrf.mxu0 }
 0x262   :  { %9004 = vst [vmem:[#allocation49_spill] sm:$0xff] %v8157_v38 }
 0x263   :  { %v8159_v21 = vpop.f32.mrf.mxu0 }
 0x264   :  { %9005 = vst [vmem:[#allocation51_spill] sm:$0xff] %v8159_v21 }
 0x265   :  { %v8163_v35 = vpop.f32.mrf.mxu0 }
 0x266   :  { %9007 = vst [vmem:[#allocation55_spill] sm:$0xff] %v8163_v35 }
 0x267   :  { %v8165_v23 = vpop.f32.mrf.mxu0 }
 0x268   :  { %9008 = vst [vmem:[#allocation57_spill] sm:$0xff] %v8165_v23 }
 0x269   :  { %v8169_v3 = vpop.f32.mrf.mxu0 }
 0x26a   :  { %9010 = vst [vmem:[#allocation60_spill] sm:$0xff] %v8169_v3 }
 0x26b   :  { %v8171_v41 = vpop.f32.mrf.mxu0 }
 0x26c   :  { %9011 = vst [vmem:[#allocation61_spill] sm:$0xff] %v8171_v41 }
 0x26d   :  { %v8175_v48 = vpop.f32.mrf.mxu0 }
 0x26e   :  { %9013 = vst [vmem:[#allocation63_spill] sm:$0xff] %v8175_v48  ;;  %v8197_v48 = vpop.f32.mrf.mxu1 }
 0x26f   :  { %v8177_v55 = vpop.f32.mrf.mxu0  ;;  %9024 = vst [vmem:[#allocation74_spill] sm:$0xff] %v8197_v48 }
 0x270   :  { %9014 = vst [vmem:[#allocation64_spill] sm:$0xff] %v8177_v55 }
 0x271   :  { %v8181_v7 = vpop.f32.mrf.mxu0 }
 0x272   :  { %9016 = vst [vmem:[#allocation66_spill] sm:$0xff] %v8181_v7  ;;  %v8203_v7 = vpop.f32.mrf.mxu1 }
 0x273   :  { %v8183_v15 = vpop.f32.mrf.mxu0 }
 0x274   :  { %9017 = vst [vmem:[#allocation67_spill] sm:$0xff] %v8183_v15 }
 0x275   :  { %v8187_v62 = vpop.f32.mrf.mxu0 }
 0x276   :  { %9019 = vst [vmem:[#allocation69_spill] sm:$0xff] %v8187_v62  ;;  %v8209_v62 = vpop.f32.mrf.mxu1 }
 0x277   :  { %v8189_v16 = vpop.f32.mrf.mxu0 }
 0x278   :  { %9020 = vst [vmem:[#allocation70_spill] sm:$0xff] %v8189_v16 }
 0x279   :  { %v8193_v6 = vpop.f32.mrf.mxu0 }
 0x27a   :  { %9022 = vst [vmem:[#allocation72_spill] sm:$0xff] %v8193_v6 }
 0x27b   :  { %v8195_v52 = vpop.f32.mrf.mxu0 }
 0x27c   :  { %9023 = vst [vmem:[#allocation73_spill] sm:$0xff] %v8195_v52  ;;  %v8217_v52 = vpop.f32.mrf.mxu1 }
 0x27d   :  { %v8199_v55 = vpop.f32.mrf.mxu0 }
 0x27e   :  { %9025 = vst [vmem:[#allocation75_spill] sm:$0xff] %v8199_v55  ;;  %v8221_v55 = vpop.permute.xlu0 %2823  ;;  %v8225_v57 = vpop.f32.mrf.mxu1 }
 0x27f   :  { %v8201_v54 = vpop.f32.mrf.mxu0 }
 0x280   :  { %9026 = vst [vmem:[#allocation76_spill] sm:$0xff] %v8201_v54 }
 0x281   :  { %v8205_v15 = vpop.f32.mrf.mxu0 }
 0x282   :  { %9027 = vst [vmem:[#allocation77_spill] sm:$0xff] %v8205_v15  ;;  %v8227_v15 = vpop.permute.xlu1 %2826  ;;  %v8233_v0 = vpop.permute.xlu0 %2829 }
 0x283   :  { %v8207_v13 = vpop.f32.mrf.mxu0  ;;  %vm2999_vm10 = vcmp.eq.s32.totalorder %v8227_v15, %v6631_v30  ;;  %vm3000_vm11 = vcmp.eq.s32.totalorder %v8233_v0, %v6631_v30 }
 0x284   :  { %9028 = vst [vmem:[#allocation78_spill] sm:$0xff] %v8207_v13 }
 0x285   :  { %v8211_v16 = vpop.f32.mrf.mxu0 }
 0x286   :  { %9029 = vst [vmem:[#allocation79_spill] sm:$0xff] %v8211_v16  ;;  %v5354_v16 = vpop.f32.mrf.mxu1  ;;  %v8237_v3 = vpop.permute.xlu1 %2832 }
 0x287   :  { %v8215_v6 = vpop.f32.mrf.mxu0  ;;  %vm3001_vm0 = vcmp.eq.s32.totalorder %v8237_v3, %v6631_v30 }
 0x288   :  { %9030 = vst [vmem:[#allocation80_spill] sm:$0xff] %v8215_v6  ;;  %v5355_v4 = vpop.f32.mrf.mxu1  ;;  %v4924_v0 = vsel %vm3001_vm0, 1.0, %v8899_v10 }
 0x289   :  { %v8219_v48 = vpop.f32.mrf.mxu0 }
 0x28a   :  { %9031 = vst [vmem:[#allocation81_spill] sm:$0xff] %v8219_v48  ;;  %v5357_v35 = vpop.f32.mrf.mxu1 }
 0x28b   :  { %v8223_v54 = vpop.f32.mrf.mxu0 }
 0x28c   :  { %9032 = vst [vmem:[#allocation82_spill] sm:$0xff] %v8223_v54  ;;  %v8243_v54 = vpop.permute.xlu0 %2835  ;;  %v5358_v21 = vpop.f32.mrf.mxu1 }
 0x28d   :  { %v8229_v13 = vpop.f32.mrf.mxu0  ;;  %vm3002_vm12 = vcmp.eq.s32.totalorder %v8243_v54, %v6631_v30 }
 0x28e   :  { %9033 = vst [vmem:[#allocation83_spill] sm:$0xff] %v8229_v13  ;;  %v8247_v13 = vpop.permute.xlu1 %2838  ;;  %v4925_v3 = vsel %vm3002_vm12, 1.0, %v8899_v10 }
 0x28f   :  { %v8231_v41 = vpop.f32.mrf.mxu0  ;;  %vm3003_vm13 = vcmp.eq.s32.totalorder %v8247_v13, %v6631_v30 }
 0x290   :  { %9034 = vst [vmem:[#allocation84_spill] sm:$0xff] %v8231_v41  ;;  %v4926_v54 = vsel %vm3003_vm13, 1.0, %v8899_v10 }
 0x291   :  { %v8235_v6 = vpop.f32.mrf.mxu0 }
 0x292   :  { %9035 = vst [vmem:[#allocation85_spill] sm:$0xff] %v8235_v6  ;;  %v8253_v6 = vpop.permute.xlu0 %2841 }
 0x293   :  { %v8239_v48 = vpop.f32.mrf.mxu0  ;;  %vm3004_vm14 = vcmp.eq.s32.totalorder %v8253_v6, %v6631_v30 }
 0x294   :  { %9036 = vst [vmem:[#allocation86_spill] sm:$0xff] %v8239_v48  ;;  %v8257_v48 = vpop.permute.xlu1 %2844 }
 0x295   :  { %v8241_v23 = vpop.f32.mrf.mxu0  ;;  %vm3005_vm15 = vcmp.eq.s32.totalorder %v8257_v48, %v6631_v30 }
 0x296   :  { %9037 = vst [vmem:[#allocation87_spill] sm:$0xff] %v8241_v23  ;;  %v5360_v23 = vpop.f32.mrf.mxu1  ;;  %v8259_v51 = vpop.permute.xlu0 %2847  ;;  %v4928_v6 = vsel %vm3005_vm15, 1.0, %v8899_v10 }
 0x297   :  { %v8245_v18 = vpop.f32.mrf.mxu0  ;;  %vm3006_vm4 = vcmp.eq.s32.totalorder %v8259_v51, %v6631_v30 }
 0x298   :  { %9038 = vst [vmem:[#allocation88_spill] sm:$0xff] %v8245_v18  ;;  %v5361_v49 = vpop.f32.mrf.mxu1  ;;  %v8261_v8 = vpop.permute.xlu1 %2850 }
 0x299   :  { %v8249_v41 = vpop.f32.mrf.mxu0  ;;  %v5362_v53 = vadd.f32 %v5361_v49, %v5360_v23  ;;  %v5353_v49 = vadd.f32 %v8225_v57, %v8217_v52  ;;  %v4920_v57 = vsel %vm2997_vm2, 1.0, %v8899_v10  ;;  %vm3007_vm5 = vcmp.eq.s32.totalorder %v8261_v8, %v6631_v30 }
 0x29a   :  { %9039 = vst [vmem:[#allocation89_spill] sm:$0xff] %v8249_v41  ;;  %v5363_v19 = vpop.f32.mrf.mxu1  ;;  %v4930_v48 = vsel %vm3007_vm5, 1.0, %v8899_v10 }
 0x29b   :  { %v8251_v43 = vpop.f32.mrf.mxu0 }
 0x29c   :  { %9040 = vst [vmem:[#allocation90_spill] sm:$0xff] %v8251_v43  ;;  %v8263_v43 = vpop.permute.xlu0 %2853  ;;  %v8265_v56 = vpop.permute.xlu1 %2856 }
 0x29d   :  { %v8255_v34 = vpop.f32.mrf.mxu0  ;;  %v5364_v47 = vpop.f32.mrf.mxu1  ;;  %vm3008_vm7 = vcmp.eq.s32.totalorder %v8263_v43, %v6631_v30  ;;  %vm3009_vm8 = vcmp.eq.s32.totalorder %v8265_v56, %v6631_v30 }
 0x29e   :  { %9041 = vst [vmem:[#allocation91_spill] sm:$0xff] %v8255_v34  ;;  %v5365_v60 = vadd.f32 %v5364_v47, %v5363_v19  ;;  %v4932_v43 = vsel %vm3009_vm8, 1.0, %v8899_v10 }
 0x29f   :  { %v2721_v38 = vpop.f32.mrf.mxu0  ;;  %v5366_v59 = vpop.f32.mrf.mxu1 }
 0x2a0   :  { %v8267_v63 = vpop.permute.xlu0 %2859  ;;  %v8269_v26 = vpop.permute.xlu1 %2862 }
 0x2a1   :  { %v5750_v20 = vpop.f32.mrf.mxu0  ;;  %v5367_v2 = vpop.f32.mrf.mxu1  ;;  %vm3010_vm9 = vcmp.eq.s32.totalorder %v8267_v63, %v6631_v30  ;;  %vm3011_vm2 = vcmp.eq.s32.totalorder %v8269_v26, %v6631_v30 }
 0x2a2   :  { %v5368_v45 = vadd.f32 %v5367_v2, %v5366_v59  ;;  %v4934_v63 = vsel %vm3011_vm2, 1.0, %v8899_v10 }
 0x2a3   :  { %v2726_v18 = vpop.f32.mrf.mxu0 }
 0x2a4   :  { %v8273_v39 = vpop.permute.xlu1 %2868 }
 0x2a5   :  { %v5753_v46 = vpop.f32.mrf.mxu0 }
 0x2a6   :  { %v8271_v46 = vpop.permute.xlu0 %2865 }
 0x2a7   :  { %v2731_v41 = vpop.f32.mrf.mxu0 }
 0x2a8   :  { %v8279_v28 = vpop.permute.xlu1 %2874 }
 0x2a9   :  { %v5756_v50 = vpop.f32.mrf.mxu0  ;;  %vm3015_vm0 = vcmp.eq.s32.totalorder %v8279_v28, %v6631_v30 }
 0x2aa   :  { %v4938_v8 = vsel %vm3015_vm0, 1.0, %v8899_v10 }
 0x2ab   :  { %v2736_v34 = vpop.f32.mrf.mxu0 }
 0x2ad   :  { %v5759_v29 = vpop.f32.mrf.mxu0 }
 0x2ae   :  { %v8275_v29 = vpop.permute.xlu0 %2871 }
 0x2af   :  { %v2741_v20 = vpop.f32.mrf.mxu0 }
 0x2b0   :  { %v2742_v1 = vadd.f32 %v5362_v53, %v2741_v20  ;;  %v2727_v53 = vadd.f32 %v5353_v49, %v2726_v18 }
 0x2b1   :  { %v5762_v32 = vpop.f32.mrf.mxu0 }
 0x2b2   :  { %v5359_v32 = vadd.f32 %v5358_v21, %v5357_v35  ;;  %v8281_v47 = vpop.permute.xlu0 %2877  ;;  %v5350_v35 = vadd.f32 %v8209_v62, %v8203_v7  ;;  %v4922_v62 = vsel %vm2999_vm10, 1.0, %v8899_v10  ;;  %v4923_v7 = vsel %vm3000_vm11, 1.0, %v8899_v10 }
 0x2b3   :  { %v2746_v27 = vpop.f32.mrf.mxu0  ;;  %v4933_v21 = vsel %vm3010_vm9, 1.0, %v8899_v10  ;;  %vm3013_vm10 = vcmp.eq.s32.totalorder %v8273_v39, %v6631_v30  ;;  %vm3014_vm11 = vcmp.eq.s32.totalorder %v8275_v29, %v6631_v30  ;;  %vm3016_vm12 = vcmp.eq.s32.totalorder %v8281_v47, %v6631_v30 }
 0x2b4   :  { %v2747_v44 = vadd.f32 %v5365_v60, %v2746_v27  ;;  %v2737_v2 = vadd.f32 %v5359_v32, %v2736_v34  ;;  %v2722_v34 = vadd.f32 %v5350_v35, %v2721_v38  ;;  %v4931_v38 = vsel %vm3008_vm7, 1.0, %v8899_v10 }
 0x2b5   :  { %v5765_v25 = vpop.f32.mrf.mxu0  ;;  %v4936_v26 = vsel %vm3013_vm10, 1.0, %v8899_v10  ;;  %v4939_v51 = vsel %vm3016_vm12, 1.0, %v8899_v10 }
 0x2b6   :  { %v5356_v25 = vadd.f32 %v5355_v4, %v5354_v16  ;;  %v8293_v4 = vpop.permute.xlu0 %2883 }
 0x2b7   :  { %v2751_v50 = vpop.f32.mrf.mxu0 }
 0x2b8   :  { %v2752_v17 = vadd.f32 %v5368_v45, %v2751_v50  ;;  %v2732_v60 = vadd.f32 %v5356_v25, %v2731_v41  ;;  %v4937_v41 = vsel %vm3014_vm11, 1.0, %v8899_v10 }
 0x2b9   :  { %v5768_v5 = vpop.f32.mrf.mxu0 }
 0x2ba   :  { %5769 = vmatprep.subr.msk.mxu1 %vm1596_vm6, %v2752_v17  ;;  %v8287_v5 = vpop.permute.xlu1 %2880  ;;  %v8309_v52 = vpop.permute.xlu0 %2889 }
 0x2bb   :  { %5770 = vmatpush3.msk.msra.mxu1 %vm1596_vm6, %v2752_v17  ;;  %vm2998_vm6 = vcmp.eq.s32.totalorder %v8221_v55, %v6631_v30  ;;  %v4929_v17 = vsel %vm3006_vm4, 1.0, %v8899_v10  ;;  %vm3017_vm13 = vcmp.eq.s32.totalorder %v8287_v5, %v6631_v30  ;;  %vm3020_vm4 = vcmp.eq.s32.totalorder %v8309_v52, %v6631_v30 }
 0x2bc   :  { %5771 = vmatprep.subr.mxu1 %v2747_v44  ;;  %v4921_v18 = vsel %vm2998_vm6, 1.0, %v8899_v10  ;;  %vm3012_vm6 = vcmp.eq.s32.totalorder %v8271_v46, %v6631_v30  ;;  %v4940_v55 = vsel %vm3017_vm13, 1.0, %v8899_v10  ;;  %v4943_v32 = vsel %vm3020_vm4, 1.0, %v8899_v10 }
 0x2bd   :  { %5772 = vmatpush3.msra.mxu1 %v2747_v44  ;;  %v4927_v44 = vsel %vm3004_vm14, 1.0, %v8899_v10  ;;  %v4935_v23 = vsel %vm3012_vm6, 1.0, %v8899_v10  ;;  %vm3018_vm14 = vcmp.eq.s32.totalorder %v8293_v4, %v6631_v30 }
 0x2be   :  { %5773 = vmatprep.subr.mxu1 %v2742_v1  ;;  %v8302_v24 = vpop.permute.xlu1 %2886  ;;  %v8325_v16 = vpop.permute.xlu0 %2895  ;;  %v4941_v20 = vsel %vm3018_vm14, 1.0, %v8899_v10 }
 0x2bf   :  { %5774 = vmatpush3.msra.mxu1 %v2742_v1  ;;  %vm3019_vm15 = vcmp.eq.s32.totalorder %v8302_v24, %v6631_v30  ;;  %vm3022_vm7 = vcmp.eq.s32.totalorder %v8325_v16, %v6631_v30 }
 0x2c0   :  { %5775 = vmatprep.subr.mxu1 %v2737_v2  ;;  %v4942_v50 = vsel %vm3019_vm15, 1.0, %v8899_v10  ;;  %v4945_v47 = vsel %vm3022_vm7, 1.0, %v8899_v10 }
 0x2c1   :  { %5776 = vmatpush3.msra.mxu1 %v2737_v2 }
 0x2c2   :  { %5777 = vmatprep.subr.mxu1 %v2732_v60  ;;  %v8316_v1 = vpop.permute.xlu1 %2892  ;;  %v8341_v15 = vpop.permute.xlu0 %2901 }
 0x2c3   :  { %5778 = vmatpush3.msra.mxu1 %v2732_v60  ;;  %vm3021_vm5 = vcmp.eq.s32.totalorder %v8316_v1, %v6631_v30  ;;  %vm3024_vm9 = vcmp.eq.s32.totalorder %v8341_v15, %v6631_v30 }
 0x2c4   :  { %5779 = vmatprep.subr.mxu1 %v2727_v53  ;;  %v4944_v2 = vsel %vm3021_vm5, 1.0, %v8899_v10  ;;  %v4947_v35 = vsel %vm3024_vm9, 1.0, %v8899_v10 }
 0x2c5   :  { %5780 = vmatpush3.msra.mxu1 %v2727_v53 }
 0x2c6   :  { %5781 = vmatprep.subr.mxu1 %v2722_v34  ;;  %v8334_v13 = vpop.permute.xlu1 %2898  ;;  %v8357_v27 = vpop.permute.xlu0 %2907 }
 0x2c7   :  { %5782 = vmatpush3.msra.mxu1 %v2722_v34  ;;  %vm3023_vm8 = vcmp.eq.s32.totalorder %v8334_v13, %v6631_v30  ;;  %vm3026_vm6 = vcmp.eq.s32.totalorder %v8357_v27, %v6631_v30 }
 0x2c8   :  { %5784 = vmatmul.mubr.msk.f32.vlgmr.msra.gmra.mxu1 %vm1415_vm3, %v4920_v57  ;;  %v4946_v60 = vsel %vm3023_vm8, 1.0, %v8899_v10  ;;  %v4949_v4 = vsel %vm3026_vm6, 1.0, %v8899_v10 }
 0x2c9   :  { %5786 = vmatprep.mubr.msk.f32.mxu1 %vm1415_vm3, %v4921_v18 }
 0x2ca   :  { %v8348_v45 = vpop.permute.xlu1 %2904  ;;  %v2914_v56 = vpop.permute.xlu0 %2913 }
 0x2cb   :  { %vm3025_vm2 = vcmp.eq.s32.totalorder %v8348_v45, %v6631_v30  ;;  %vm3028_vm11 = vcmp.eq.s32.totalorder %v2914_v56, %v6631_v30 }
 0x2cc   :  { %5787 = vmatmul.mubr.msk.f32.gmra.mxu1 %vm1415_vm3, %v4922_v62  ;;  %v4948_v5 = vsel %vm3025_vm2, 1.0, %v8899_v10  ;;  %v4951_v24 = vsel %vm3028_vm11, 1.0, %v8899_v10 }
 0x2cd   :  { %5789 = vmatprep.mubr.msk.f32.mxu1 %vm1415_vm3, %v4923_v7 }
 0x2ce   :  { %v2911_v59 = vpop.permute.xlu1 %2910  ;;  %v2920_v39 = vpop.permute.xlu0 %2919 }
 0x2cf   :  { %vm3027_vm10 = vcmp.eq.s32.totalorder %v2911_v59, %v6631_v30  ;;  %vm3030_vm12 = vcmp.eq.s32.totalorder %v2920_v39, %v6631_v30 }
 0x2d0   :  { %5790 = vmatmul.mubr.msk.f32.gmra.mxu1 %vm1415_vm3, %v4924_v0  ;;  %v4950_v18 = vsel %vm3027_vm10, 1.0, %v8899_v10  ;;  %v4953_v52 = vsel %vm3030_vm12, 1.0, %v8899_v10 }
 0x2d1   :  { %5792 = vmatprep.mubr.msk.f32.mxu1 %vm1415_vm3, %v4925_v3 }
 0x2d2   :  { %v2917_v19 = vpop.permute.xlu1 %2916  ;;  %v2926_v46 = vpop.permute.xlu0 %2925 }
 0x2d3   :  { %vm3029_vm0 = vcmp.eq.s32.totalorder %v2917_v19, %v6631_v30  ;;  %vm3032_vm14 = vcmp.eq.s32.totalorder %v2926_v46, %v6631_v30 }
 0x2d4   :  { %5793 = vmatmul.mubr.msk.f32.gmra.mxu1 %vm1415_vm3, %v4926_v54  ;;  %v4952_v7 = vsel %vm3029_vm0, 1.0, %v8899_v10  ;;  %v4955_v16 = vsel %vm3032_vm14, 1.0, %v8899_v10 }
 0x2d5   :  { %5795 = vmatprep.mubr.msk.f32.mxu1 %vm1415_vm3, %v4927_v44 }
 0x2d6   :  { %v2923_v28 = vpop.permute.xlu1 %2922  ;;  %v2932_v25 = vpop.permute.xlu0 %2931 }
 0x2d7   :  { %vm3031_vm13 = vcmp.eq.s32.totalorder %v2923_v28, %v6631_v30  ;;  %vm3034_vm4 = vcmp.eq.s32.totalorder %v2932_v25, %v6631_v30 }
 0x2d8   :  { %5796 = vmatmul.mubr.msk.f32.gmra.mxu1 %vm1415_vm3, %v4928_v6  ;;  %v4954_v1 = vsel %vm3031_vm13, 1.0, %v8899_v10  ;;  %v4957_v13 = vsel %vm3034_vm4, 1.0, %v8899_v10 }
 0x2d9   :  { %5798 = vmatprep.mubr.msk.f32.mxu1 %vm1415_vm3, %v4929_v17 }
 0x2da   :  { %v2929_v29 = vpop.permute.xlu1 %2928  ;;  %v2938_v53 = vpop.permute.xlu0 %2937 }
 0x2db   :  { %vm3033_vm15 = vcmp.eq.s32.totalorder %v2929_v29, %v6631_v30  ;;  %vm3036_vm7 = vcmp.eq.s32.totalorder %v2938_v53, %v6631_v30 }
 0x2dc   :  { %5799 = vmatmul.mubr.msk.f32.gmra.mxu1 %vm1415_vm3, %v4930_v48  ;;  %v4956_v44 = vsel %vm3033_vm15, 1.0, %v8899_v10  ;;  %v4959_v15 = vsel %vm3036_vm7, 1.0, %v8899_v10 }
 0x2dd   :  { %5801 = vmatprep.mubr.msk.f32.mxu1 %vm1415_vm3, %v4931_v38 }
 0x2de   :  { %v2935_v49 = vpop.permute.xlu1 %2934  ;;  %v2944_v57 = vpop.permute.xlu0 %2943 }
 0x2df   :  { %vm3035_vm5 = vcmp.eq.s32.totalorder %v2935_v49, %v6631_v30  ;;  %vm3038_vm9 = vcmp.eq.s32.totalorder %v2944_v57, %v6631_v30 }
 0x2e0   :  { %5802 = vmatmul.mubr.msk.f32.gmra.mxu1 %vm1415_vm3, %v4932_v43  ;;  %v4958_v17 = vsel %vm3035_vm5, 1.0, %v8899_v10  ;;  %v4961_v27 = vsel %vm3038_vm9, 1.0, %v8899_v10 }
 0x2e1   :  { %5804 = vmatprep.mubr.msk.f32.mxu1 %vm1415_vm3, %v4933_v21 }
 0x2e2   :  { %v2941_v34 = vpop.permute.xlu1 %2940  ;;  %v2950_v0 = vpop.permute.xlu0 %2949 }
 0x2e3   :  { %vm3037_vm8 = vcmp.eq.s32.totalorder %v2941_v34, %v6631_v30  ;;  %vm3040_vm6 = vcmp.eq.s32.totalorder %v2950_v0, %v6631_v30 }
 0x2e4   :  { %5805 = vmatmul.mubr.msk.f32.gmra.mxu1 %vm1415_vm3, %v4934_v63  ;;  %v4960_v45 = vsel %vm3037_vm8, 1.0, %v8899_v10  ;;  %v4963_v59 = vsel %vm3040_vm6, 1.0, %v8899_v10 }
 0x2e5   :  { %5807 = vmatprep.mubr.msk.f32.mxu1 %vm1415_vm3, %v4935_v23 }
 0x2e6   :  { %v2947_v62 = vpop.permute.xlu1 %2946  ;;  %v2956_v54 = vpop.permute.xlu0 %2955 }
 0x2e7   :  { %vm3039_vm2 = vcmp.eq.s32.totalorder %v2947_v62, %v6631_v30  ;;  %vm3042_vm11 = vcmp.eq.s32.totalorder %v2956_v54, %v6631_v30 }
 0x2e8   :  { %5808 = vmatmul.mubr.msk.f32.gmra.mxu1 %vm1415_vm3, %v4936_v26  ;;  %v4962_v21 = vsel %vm3039_vm2, 1.0, %v8899_v10  ;;  %v4965_v56 = vsel %vm3042_vm11, 1.0, %v8899_v10 }
 0x2e9   :  { %5810 = vmatprep.mubr.msk.f32.mxu1 %vm1415_vm3, %v4937_v41 }
 0x2ea   :  { %v2953_v3 = vpop.permute.xlu1 %2952  ;;  %v2962_v48 = vpop.permute.xlu0 %2961 }
 0x2eb   :  { %vm3041_vm10 = vcmp.eq.s32.totalorder %v2953_v3, %v6631_v30  ;;  %vm3044_vm12 = vcmp.eq.s32.totalorder %v2962_v48, %v6631_v30 }
 0x2ec   :  { %5811 = vmatmul.mubr.msk.f32.gmra.mxu1 %vm1415_vm3, %v4938_v8  ;;  %v4964_v23 = vsel %vm3041_vm10, 1.0, %v8899_v10  ;;  %v4967_v39 = vsel %vm3044_vm12, 1.0, %v8899_v10  ;;  %vm4275_vm12 = vcmask 261120  }
 0x2ed   :  { %5813 = vmatprep.mubr.msk.f32.mxu1 %vm1415_vm3, %v4939_v51 }
 0x2ee   :  { %v2959_v6 = vpop.permute.xlu1 %2958  ;;  %v2968_v43 = vpop.permute.xlu0 %2967 }
 0x2ef   :  { %vm3043_vm0 = vcmp.eq.s32.totalorder %v2959_v6, %v6631_v30  ;;  %vm3046_vm14 = vcmp.eq.s32.totalorder %v2968_v43, %v6631_v30 }
 0x2f0   :  { %5814 = vmatmul.mubr.msk.f32.gmra.mxu1 %vm1415_vm3, %v4940_v55  ;;  %v4966_v19 = vsel %vm3043_vm0, 1.0, %v8899_v10  ;;  %v4969_v28 = vsel %vm3046_vm14, 1.0, %v8899_v10  ;;  %vm4163_vm0 = vcmask 1040384  }
 0x2f1   :  { %5816 = vmatprep.mubr.msk.f32.mxu1 %vm1415_vm3, %v4941_v20 }
 0x2f2   :  { %v2965_v38 = vpop.permute.xlu1 %2964  ;;  %v2974_v26 = vpop.permute.xlu0 %2973 }
 0x2f3   :  { %vm3045_vm13 = vcmp.eq.s32.totalorder %v2965_v38, %v6631_v30  ;;  %vm3048_vm4 = vcmp.eq.s32.totalorder %v2974_v26, %v6631_v30 }
 0x2f4   :  { %5817 = vmatmul.mubr.msk.f32.gmra.mxu1 %vm1415_vm3, %v4942_v50  ;;  %v4968_v51 = vsel %vm3045_vm13, 1.0, %v8899_v10  ;;  %v4971_v46 = vsel %vm3048_vm4, 1.0, %v8899_v10 }
 0x2f5   :  { %5819 = vmatprep.mubr.msk.f32.mxu1 %vm1415_vm3, %v4943_v32 }
 0x2f6   :  { %v2971_v63 = vpop.permute.xlu1 %2970  ;;  %v2980_v8 = vpop.permute.xlu0 %2979 }
 0x2f7   :  { %vm3047_vm15 = vcmp.eq.s32.totalorder %v2971_v63, %v6631_v30  ;;  %vm3050_vm7 = vcmp.eq.s32.totalorder %v2980_v8, %v6631_v30 }
 0x2f8   :  { %5820 = vmatmul.mubr.msk.f32.gmra.mxu1 %vm1415_vm3, %v4944_v2  ;;  %v4970_v20 = vsel %vm3047_vm15, 1.0, %v8899_v10  ;;  %v4973_v25 = vsel %vm3050_vm7, 1.0, %v8899_v10 }
 0x2f9   :  { %5822 = vmatprep.mubr.msk.f32.mxu1 %vm1415_vm3, %v4945_v47 }
 0x2fa   :  { %v2977_v41 = vpop.permute.xlu1 %2976  ;;  %v2986_v50 = vpop.permute.xlu0 %2985 }
 0x2fb   :  { %vm3049_vm5 = vcmp.eq.s32.totalorder %v2977_v41, %v6631_v30  ;;  %vm3052_vm9 = vcmp.eq.s32.totalorder %v2986_v50, %v6631_v30 }
 0x2fc   :  { %5823 = vmatmul.mubr.msk.f32.gmra.mxu1 %vm1415_vm3, %v4946_v60  ;;  %v4972_v29 = vsel %vm3049_vm5, 1.0, %v8899_v10  ;;  %v4975_v49 = vsel %vm3052_vm9, 1.0, %v8899_v10 }
 0x2fd   :  { %5825 = vmatprep.mubr.msk.f32.mxu1 %vm1415_vm3, %v4947_v35 }
 0x2fe   :  { %v2983_v55 = vpop.permute.xlu1 %2982  ;;  %v2992_v2 = vpop.permute.xlu0 %2991 }
 0x2ff   :  { %vm3051_vm8 = vcmp.eq.s32.totalorder %v2983_v55, %v6631_v30  ;;  %vm3054_vm6 = vcmp.eq.s32.totalorder %v2992_v2, %v6631_v30 }
 0x300   :  { %5826 = vmatmul.mubr.msk.f32.gmra.mxu1 %vm1415_vm3, %v4948_v5  ;;  %v4974_v47 = vsel %vm3051_vm8, 1.0, %v8899_v10  ;;  %v4977_v53 = vsel %vm3054_vm6, 1.0, %v8899_v10 }
 0x301   :  { %5828 = vmatprep.mubr.msk.f32.mxu1 %vm1415_vm3, %v4949_v4 }
 0x302   :  { %v2989_v32 = vpop.permute.xlu1 %2988 }
 0x303   :  { %vm3053_vm2 = vcmp.eq.s32.totalorder %v2989_v32, %v6631_v30 }
 0x304   :  { %5829 = vmatmul.mubr.msk.f32.gmra.mxu1 %vm1415_vm3, %v4950_v18  ;;  %v4976_v35 = vsel %vm3053_vm2, 1.0, %v8899_v10  ;;  %v8518_v18 = vld [vmem:[%s8821_s3] ss:$0 sm:$0xff] }
 0x305   :  { %5831 = vmatprep.mubr.msk.f32.mxu1 %vm1415_vm3, %v4951_v24 }
 0x306   :  { %v2995_v60 = vpop.permute.xlu1 %2994 }
 0x307   :  { %vm3055_vm10 = vcmp.eq.s32.totalorder %v2995_v60, %v6631_v30 }
 0x308   :  { %5832 = vmatmul.mubr.msk.f32.gmra.mxu1 %vm1415_vm3, %v4952_v7  ;;  %v4978_v5 = vsel %vm3055_vm10, 1.0, %v8899_v10 }
 0x309   :  { %5834 = vmatprep.mubr.msk.f32.mxu1 %vm1415_vm3, %v4953_v52 }
 0x30c   :  { %5835 = vmatmul.mubr.msk.f32.gmra.mxu1 %vm1415_vm3, %v4954_v1 }
 0x30d   :  { %5837 = vmatprep.mubr.msk.f32.mxu1 %vm1415_vm3, %v4955_v16 }
 0x310   :  { %5838 = vmatmul.mubr.msk.f32.gmra.mxu1 %vm1415_vm3, %v4956_v44 }
 0x311   :  { %5840 = vmatprep.mubr.msk.f32.mxu1 %vm1415_vm3, %v4957_v13 }
 0x314   :  { %5841 = vmatmul.mubr.msk.f32.gmra.mxu1 %vm1415_vm3, %v4958_v17 }
 0x315   :  { %5843 = vmatprep.mubr.msk.f32.mxu1 %vm1415_vm3, %v4959_v15 }
 0x318   :  { %5844 = vmatmul.mubr.msk.f32.gmra.mxu1 %vm1415_vm3, %v4960_v45 }
 0x319   :  { %5846 = vmatprep.mubr.msk.f32.mxu1 %vm1415_vm3, %v4961_v27 }
 0x31c   :  { %5847 = vmatmul.mubr.msk.f32.gmra.mxu1 %vm1415_vm3, %v4962_v21 }
 0x31d   :  { %5849 = vmatprep.mubr.msk.f32.mxu1 %vm1415_vm3, %v4963_v59 }
 0x320   :  { %5850 = vmatmul.mubr.msk.f32.gmra.mxu1 %vm1415_vm3, %v4964_v23 }
 0x321   :  { %5852 = vmatprep.mubr.msk.f32.mxu1 %vm1415_vm3, %v4965_v56 }
 0x324   :  { %5853 = vmatmul.mubr.msk.f32.gmra.mxu1 %vm1415_vm3, %v4966_v19 }
 0x325   :  { %5855 = vmatprep.mubr.msk.f32.mxu1 %vm1415_vm3, %v4967_v39  ;;  %v4174_v39 = vld [vmem:[%s8823_s5 + $0x8] sm:$0xff] }
 0x326   :  { %5874 = vmatpush3.msra.mxu0 %v4174_v39 }
 0x327   :  { %5875 = vmatprep.subr.mxu0 %v8899_v10 }
 0x328   :  { %5856 = vmatmul.mubr.msk.f32.gmra.mxu1 %vm1415_vm3, %v4968_v51 }
 0x329   :  { %5858 = vmatprep.mubr.msk.f32.mxu1 %vm1415_vm3, %v4969_v28 }
 0x32c   :  { %5859 = vmatmul.mubr.msk.f32.gmra.mxu1 %vm1415_vm3, %v4970_v20 }
 0x32d   :  { %5861 = vmatprep.mubr.msk.f32.mxu1 %vm1415_vm3, %v4971_v46 }
 0x330   :  { %5862 = vmatmul.mubr.msk.f32.gmra.mxu1 %vm1415_vm3, %v4972_v29 }
 0x331   :  { %5864 = vmatprep.mubr.msk.f32.mxu1 %vm1415_vm3, %v4973_v25 }
 0x334   :  { %5865 = vmatmul.mubr.msk.f32.gmra.mxu1 %vm1415_vm3, %v4974_v47 }
 0x335   :  { %5867 = vmatprep.mubr.msk.f32.mxu1 %vm1415_vm3, %v4975_v49 }
 0x338   :  { %5868 = vmatmul.mubr.msk.f32.gmra.mxu1 %vm1415_vm3, %v4976_v35 }
 0x339   :  { %5870 = vmatprep.mubr.msk.f32.mxu1 %vm1415_vm3, %v4977_v53 }
 0x33c   :  { %5871 = vmatmul.mubr.msk.f32.gmra.mxu1 %vm1415_vm3, %v4978_v5  ;;  %vm4002_vm3 = vcmask 130048  }
 0x388   :  { %v5785_v34 = vpop.f32.mrf.mxu1 }
 0x389   :  { %v3725_v4 = vadd.f32 %v5785_v34, %v8069_v40 }
 0x38a   :  { %v3425_v57 = vpop.f32.mrf.mxu1 }
 0x38b   :  { %v3724_v30 = vadd.f32 %v3425_v57, %v8073_v42  ;;  %v3792_v7 = vadd.f32 %v8518_v18, %v3725_v4 }
 0x38c   :  { %v5788_v24 = vpop.f32.mrf.mxu1 }
 0x38d   :  { %v3727_v62 = vadd.f32 %v5788_v24, %v8075_v12  ;;  %v3791_v1 = vadd.f32 %v8518_v18, %v3724_v30  ;;  %v3852_v16 = vmax.f32 %v3792_v7, 0.0 }
 0x38e   :  { %v3435_v52 = vpop.f32.mrf.mxu1 }
 0x38f   :  { %v3726_v0 = vadd.f32 %v3435_v52, %v8079_v14  ;;  %v3794_v54 = vadd.f32 %v8518_v18, %v3727_v62  ;;  %v3851_v12 = vmax.f32 %v3791_v1, 0.0 }
 0x390   :  { %v5791_v3 = vpop.f32.mrf.mxu1 }
 0x391   :  { %v3729_v40 = vadd.f32 %v5791_v3, %v8081_v37  ;;  %v3793_v6 = vadd.f32 %v8518_v18, %v3726_v0  ;;  %v4004_v37 = vsel %vm4002_vm3, %v3852_v16, -inf  ;;  %v3854_v45 = vmax.f32 %v3794_v54, 0.0 }
 0x392   :  { %v3445_v44 = vpop.f32.mrf.mxu1  ;;  %v4003_v59 = vsel %vm4002_vm3, %v3851_v12, -inf  ;;  %v9043_v12 = vld [vmem:[#allocation23_spill] sm:$0xff] }
 0x393   :  { %v3796_v42 = vadd.f32 %v8518_v18, %v3729_v40  ;;  %v3728_v13 = vadd.f32 %v3445_v44, %v8085_v11  ;;  %v3853_v63 = vmax.f32 %v3793_v6, 0.0  ;;  %v4006_v8 = vsel %vm4002_vm3, %v3854_v45, -inf  ;;  %v9042_v40 = vld [vmem:[#allocation20_spill] sm:$0xff] }
 0x394   :  { %v5794_v17 = vpop.f32.mrf.mxu1 }
 0x395   :  { %v3856_v15 = vmax.f32 %v3796_v42, 0.0  ;;  %v3795_v14 = vadd.f32 %v8518_v18, %v3728_v13  ;;  %v3731_v48 = vadd.f32 %v5794_v17, %v8087_v31  ;;  %v4005_v50 = vsel %vm4002_vm3, %v3853_v63, -inf }
 0x396   :  { %v3455_v38 = vpop.f32.mrf.mxu1 }
 0x397   :  { %v4009_v27 = vsel %vm4002_vm3, %v3856_v15, -inf  ;;  %v3855_v43 = vmax.f32 %v3795_v14, 0.0  ;;  %v3798_v21 = vadd.f32 %v8518_v18, %v3731_v48  ;;  %v3730_v11 = vadd.f32 %v3455_v38, %v8091_v61  ;;  %v4173_v61 = vld [vmem:[%s8823_s5] sm:$0xff] }
 0x398   :  { %v4010_v23 = vmax.f32 %v4004_v37, %v4009_v27  ;;  %v5797_v56 = vpop.f32.mrf.mxu1  ;;  %5876 = vmatpush3.msra.mxu0 %v4173_v61  ;;  %v9044_v37 = vld [vmem:[#allocation25_spill] sm:$0xff] }
 0x399   :  { %v4007_v26 = vsel %vm4002_vm3, %v3855_v43, -inf  ;;  %v3858_v19 = vmax.f32 %v3798_v21, 0.0  ;;  %v3797_v31 = vadd.f32 %v8518_v18, %v3730_v11  ;;  %v3733_v41 = vadd.f32 %v5797_v56, %v8093_v33  ;;  %5880 = vmatprep.subr.mxu0 %v8899_v10 }
 0x39a   :  { %v4008_v51 = vmax.f32 %v4003_v59, %v4007_v26  ;;  %v3465_v28 = vpop.f32.mrf.mxu1  ;;  %v9045_v59 = vld [vmem:[#allocation24_spill] sm:$0xff] }
 0x39b   :  { %v4013_v55 = vsel %vm4002_vm3, %v3858_v19, -inf  ;;  %v3857_v20 = vmax.f32 %v3797_v31, 0.0  ;;  %v3800_v46 = vadd.f32 %v8518_v18, %v3733_v41  ;;  %v3732_v33 = vadd.f32 %v3465_v28, %v8097_v58  ;;  %v9046_v41 = vld [vmem:[#allocation26_spill] sm:$0xff] }
 0x39c   :  { %v4014_v29 = vmax.f32 %v4006_v8, %v4013_v55  ;;  %v5800_v32 = vpop.f32.mrf.mxu1 }
 0x39d   :  { %v4011_v25 = vsel %vm4002_vm3, %v3857_v20, -inf  ;;  %v3860_v2 = vmax.f32 %v3800_v46, 0.0  ;;  %v3799_v47 = vadd.f32 %v8518_v18, %v3732_v33  ;;  %v3735_v49 = vadd.f32 %v5800_v32, %v8099_v22  ;;  %v9047_v20 = vld [vmem:[#allocation29_spill] sm:$0xff] }
 0x39e   :  { %v4012_v60 = vmax.f32 %v4005_v50, %v4011_v25  ;;  %v3475_v35 = vpop.f32.mrf.mxu1  ;;  %v9048_v33 = vld [vmem:[#allocation37_spill] sm:$0xff]  ;;  %v9049_v50 = vld [vmem:[#allocation30_spill] sm:$0xff] }
 0x39f   :  { %v4017_v58 = vsel %vm4002_vm3, %v3860_v2, -inf  ;;  %v3859_v53 = vmax.f32 %v3799_v47, 0.0  ;;  %v3802_v5 = vadd.f32 %v8518_v18, %v3735_v49  ;;  %v3734_v34 = vadd.f32 %v3475_v35, %v8103_v9 }
 0x3a0   :  { %v4018_v4 = vmax.f32 %v4010_v23, %v4017_v58  ;;  %v5803_v57 = vpop.f32.mrf.mxu1  ;;  %v9051_v58 = vld [vmem:[#allocation5_spill] sm:$0xff] }
 0x3a1   :  { %v4015_v30 = vsel %vm4002_vm3, %v3859_v53, -inf  ;;  %v3862_v24 = vmax.f32 %v3802_v5, 0.0  ;;  %v3801_v62 = vadd.f32 %v8518_v18, %v3734_v34  ;;  %v3737_v22 = vadd.f32 %v5803_v57, %v8105_v36  ;;  %v9052_v53 = vld [vmem:[#allocation33_spill] sm:$0xff] }
 0x3a2   :  { %v4016_v7 = vmax.f32 %v4008_v51, %v4015_v30  ;;  %v3485_v52 = vpop.f32.mrf.mxu1  ;;  %v2315_v5 = vadd.f32 %v9052_v53, %v9051_v58 }
 0x3a3   :  { %v4021_v0 = vsel %vm4002_vm3, %v3862_v24, -inf  ;;  %v3861_v1 = vmax.f32 %v3801_v62, 0.0  ;;  %v3804_v3 = vadd.f32 %v8518_v18, %v3737_v22  ;;  %v3736_v16 = vadd.f32 %v3485_v52, %v9042_v40  ;;  %v9053_v22 = vld [vmem:[#allocation44_spill] sm:$0xff] }
 0x3a4   :  { %v4022_v54 = vmax.f32 %v4014_v29, %v4021_v0  ;;  %v5806_v9 = vpop.f32.mrf.mxu1  ;;  %v2320_v29 = vadd.f32 %v9049_v50, %v9048_v33 }
 0x3a5   :  { %v4019_v44 = vsel %vm4002_vm3, %v3861_v1, -inf  ;;  %v3864_v42 = vmax.f32 %v3804_v3, 0.0  ;;  %v3803_v13 = vadd.f32 %v8518_v18, %v3736_v16  ;;  %v3739_v6 = vadd.f32 %v5806_v9, %v9043_v12  ;;  %v9055_v9 = vld [vmem:[#allocation7_spill] sm:$0xff] }
 0x3a6   :  { %v4020_v17 = vmax.f32 %v4012_v60, %v4019_v44  ;;  %v3495_v36 = vpop.f32.mrf.mxu1  ;;  %v9050_v60 = vld [vmem:[#allocation31_spill] sm:$0xff]  ;;  %v9056_v44 = vld [vmem:[#allocation36_spill] sm:$0xff] }
 0x3a7   :  { %v4025_v15 = vsel %vm4002_vm3, %v3864_v42, -inf  ;;  %v3863_v14 = vmax.f32 %v3803_v13, 0.0  ;;  %v3806_v48 = vadd.f32 %v8518_v18, %v3739_v6  ;;  %v3738_v45 = vadd.f32 %v3495_v36, %v9044_v37 }
 0x3a8   :  { %v4026_v38 = vmax.f32 %v4018_v4, %v4025_v15  ;;  %v5809_v27 = vpop.f32.mrf.mxu1  ;;  %v2325_v42 = vadd.f32 %v9056_v44, %v9055_v9 }
 0x3a9   :  { %v4023_v43 = vsel %vm4002_vm3, %v3863_v14, -inf  ;;  %v3866_v21 = vmax.f32 %v3806_v48, 0.0  ;;  %v3805_v11 = vadd.f32 %v8518_v18, %v3738_v45  ;;  %v3741_v63 = vadd.f32 %v5809_v27, %v9045_v59  ;;  %v9057_v14 = vld [vmem:[#allocation46_spill] sm:$0xff] }
 0x3aa   :  { %v4024_v23 = vmax.f32 %v4016_v7, %v4023_v43  ;;  %v3505_v56 = vpop.f32.mrf.mxu1  ;;  %v9054_v7 = vld [vmem:[#allocation34_spill] sm:$0xff] }
 0x3ab   :  { %v4029_v26 = vsel %vm4002_vm3, %v3866_v21, -inf  ;;  %v3865_v19 = vmax.f32 %v3805_v11, 0.0  ;;  %v3808_v31 = vadd.f32 %v8518_v18, %v3741_v63  ;;  %v3740_v39 = vadd.f32 %v3505_v56, %v9046_v41  ;;  %v9058_v48 = vld [vmem:[#allocation38_spill] sm:$0xff]  ;;  %v9060_v63 = vld [vmem:[#allocation40_spill] sm:$0xff] }
 0x3ac   :  { %v4030_v61 = vmax.f32 %v4022_v54, %v4029_v26  ;;  %v5812_v8 = vpop.f32.mrf.mxu1  ;;  %v2330_v52 = vadd.f32 %v9054_v7, %v9053_v22  ;;  %v2340_v37 = vadd.f32 %v9058_v48, %v9057_v14  ;;  %v9059_v59 = vld [vmem:[#allocation6_spill] sm:$0xff]  ;;  %v9070_v48 = vld [vmem:[#allocation52_spill] sm:$0xff] }
 0x3ad   :  { %v4027_v51 = vsel %vm4002_vm3, %v3865_v19, -inf  ;;  %v3868_v28 = vmax.f32 %v3808_v31, 0.0  ;;  %v3807_v55 = vadd.f32 %v8518_v18, %v3740_v39  ;;  %v3743_v46 = vadd.f32 %v5812_v8, %v9047_v20  ;;  %v9062_v8 = vld [vmem:[#allocation41_spill] sm:$0xff] }
 0x3ae   :  { %v4028_v32 = vmax.f32 %v4020_v17, %v4027_v51  ;;  %v3515_v25 = vpop.f32.mrf.mxu1 }
 0x3af   :  { %v4033_v2 = vsel %vm4002_vm3, %v3868_v28, -inf  ;;  %v3867_v47 = vmax.f32 %v3807_v55, 0.0  ;;  %v3810_v49 = vadd.f32 %v8518_v18, %v3743_v46  ;;  %v3742_v35 = vadd.f32 %v3515_v25, %v9050_v60 }
 0x3b0   :  { %v4034_v34 = vmax.f32 %v4026_v38, %v4033_v2  ;;  %v5815_v4 = vpop.f32.mrf.mxu1 }
 0x3b1   :  { %v4031_v57 = vsel %vm4002_vm3, %v3867_v47, -inf  ;;  %v3870_v30 = vmax.f32 %v3810_v49, 0.0  ;;  %v3809_v24 = vadd.f32 %v8518_v18, %v3742_v35  ;;  %v3745_v62 = vadd.f32 %v5815_v4, %v2320_v29  ;;  %v9063_v29 = vld [vmem:[#allocation9_spill] sm:$0xff] }
 0x3b2   :  { %v4032_v0 = vmax.f32 %v4024_v23, %v4031_v57  ;;  %v3525_v1 = vpop.f32.mrf.mxu1  ;;  %v2335_v23 = vadd.f32 %v9060_v63, %v9059_v59  ;;  %v9065_v49 = vlaneseq  ;;  %v9067_v4 = vld [vmem:[#allocation45_spill] sm:$0xff]  ;;  %v9072_v59 = vld [vmem:[#allocation11_spill] sm:$0xff] }
 0x3b3   :  { %v4037_v3 = vsel %vm4002_vm3, %v3870_v30, -inf  ;;  %v3869_v40 = vmax.f32 %v3809_v24, 0.0  ;;  %v3812_v16 = vadd.f32 %v8518_v18, %v3745_v62  ;;  %v3744_v54 = vadd.f32 %v3525_v1, %v2315_v5  ;;  %v9069_v1 = vld [vmem:[#allocation49_spill] sm:$0xff]  ;;  %v9073_v63 = vld [vmem:[#allocation55_spill] sm:$0xff] }
 0x3b4   :  { %v4038_v13 = vmax.f32 %v4030_v61, %v4037_v3  ;;  %v5818_v12 = vpop.f32.mrf.mxu1  ;;  %v9061_v61 = vld [vmem:[#allocation48_spill] sm:$0xff]  ;;  %v3912_v60 = vshrl.u32 %v9065_v49, 7 }
 0x3b5   :  { %v4035_v6 = vsel %vm4002_vm3, %v3869_v40, -inf  ;;  %v3872_v17 = vmax.f32 %v3812_v16, 0.0  ;;  %v3811_v36 = vadd.f32 %v8518_v18, %v3744_v54  ;;  %v3747_v15 = vadd.f32 %v5818_v12, %v2330_v52 }
 0x3b6   :  { %v4036_v45 = vmax.f32 %v4028_v32, %v4035_v6  ;;  %v3535_v38 = vpop.f32.mrf.mxu1  ;;  %v2350_v51 = vadd.f32 %v9062_v8, %v9061_v61  ;;  %v9064_v32 = vld [vmem:[#allocation43_spill] sm:$0xff]  ;;  %v8620_v54 = vadd.s32 232, %v3912_v60  ;;  %v9075_v61 = vld [vmem:[#allocation57_spill] sm:$0xff]  ;;  %v9078_v60 = vld [vmem:[#allocation56_spill] sm:$0xff] }
 0x3b7   :  { %v4041_v27 = vsel %vm4002_vm3, %v3872_v17, -inf  ;;  %v3871_v43 = vmax.f32 %v3811_v36, 0.0  ;;  %v3814_v21 = vadd.f32 %v8518_v18, %v3747_v15  ;;  %v3746_v11 = vadd.f32 %v3535_v38, %v2325_v42 }
 0x3b8   :  { %v4042_v56 = vmax.f32 %v4034_v34, %v4041_v27  ;;  %v5821_v26 = vpop.f32.mrf.mxu1  ;;  %v2345_v25 = vadd.f32 %v9064_v32, %v9063_v29  ;;  %v9066_v34 = vld [vmem:[#allocation50_spill] sm:$0xff]  ;;  %vm3971_vm11 = vcmp.lt.s32.totalorder %v8620_v54, 238  ;;  %v9077_v29 = vld [vmem:[#allocation60_spill] sm:$0xff] }
 0x3b9   :  { %v4039_v19 = vsel %vm4002_vm3, %v3871_v43, -inf  ;;  %v3874_v31 = vmax.f32 %v3814_v21, 0.0  ;;  %v3813_v41 = vadd.f32 %v8518_v18, %v3746_v11  ;;  %v3749_v39 = vadd.f32 %v5821_v26, %v2340_v37  ;;  %v9071_v37 = vld [vmem:[#allocation51_spill] sm:$0xff] }
 0x3ba   :  { %v4040_v28 = vmax.f32 %v4032_v0, %v4039_v19  ;;  %v3545_v55 = vpop.f32.mrf.mxu1  ;;  %v2360_v57 = vadd.f32 %v9067_v4, %v9066_v34  ;;  %v9068_v0 = vld [vmem:[#allocation8_spill] sm:$0xff] }
 0x3bb   :  { %v4045_v20 = vsel %vm4002_vm3, %v3874_v31, -inf  ;;  %v3873_v46 = vmax.f32 %v3813_v41, 0.0  ;;  %v3816_v33 = vadd.f32 %v8518_v18, %v3749_v39  ;;  %v3748_v50 = vadd.f32 %v3545_v55, %v2335_v23  ;;  %v9074_v39 = vld [vmem:[#allocation54_spill] sm:$0xff] }
 0x3bc   :  { %v4046_v2 = vmax.f32 %v4038_v13, %v4045_v20  ;;  %v5824_v47 = vpop.f32.mrf.mxu1  ;;  %v2355_v3 = vadd.f32 %v9069_v1, %v9068_v0  ;;  %v2365_v23 = vadd.f32 %v9073_v63, %v9072_v59  ;;  %v2380_v8 = vadd.f32 %v9075_v61, %v9074_v39  ;;  %v9082_v1 = vld [vmem:[#allocation58_spill] sm:$0xff] }
 0x3bd   :  { %v4043_v35 = vsel %vm4002_vm3, %v3873_v46, -inf  ;;  %v3876_v58 = vmax.f32 %v3816_v33, 0.0  ;;  %v3815_v53 = vadd.f32 %v8518_v18, %v3748_v50  ;;  %v3751_v5 = vadd.f32 %v5824_v47, %v2350_v51  ;;  %v9076_v50 = vld [vmem:[#allocation10_spill] sm:$0xff] }
 0x3be   :  { %v4044_v30 = vmax.f32 %v4036_v45, %v4043_v35  ;;  %v3555_v24 = vpop.f32.mrf.mxu1  ;;  %v2370_v45 = vadd.f32 %v9071_v37, %v9070_v48  ;;  %v2375_v32 = vadd.f32 %v9077_v29, %v9076_v50  ;;  %v9079_v35 = vld [vmem:[#allocation61_spill] sm:$0xff]  ;;  %v9086_v48 = vld [vmem:[#allocation15_spill] sm:$0xff] }
 0x3bf   :  { %v4049_v62 = vsel %vm4002_vm3, %v3876_v58, -inf  ;;  %v3875_v22 = vmax.f32 %v3815_v53, 0.0  ;;  %v3818_v7 = vadd.f32 %v8518_v18, %v3751_v5  ;;  %v3750_v52 = vadd.f32 %v3555_v24, %v2345_v25  ;;  %v9087_v37 = vld [vmem:[#allocation67_spill] sm:$0xff] }
 0x3c0   :  { %v4050_v40 = vmax.f32 %v4042_v56, %v4049_v62  ;;  %v5827_v16 = vpop.f32.mrf.mxu1  ;;  %v2390_v58 = vadd.f32 %v9079_v35, %v9078_v60  ;;  %v9093_v60 = vld [vmem:[#allocation72_spill] sm:$0xff] }
 0x3c1   :  { %v4047_v9 = vsel %vm4002_vm3, %v3875_v22, -inf  ;;  %v3878_v44 = vmax.f32 %v3818_v7, 0.0  ;;  %v3817_v42 = vadd.f32 %v8518_v18, %v3750_v52  ;;  %v3753_v13 = vadd.f32 %v5827_v16, %v2360_v57  ;;  %v9080_v57 = vld [vmem:[#allocation13_spill] sm:$0xff] }
 0x3c2   :  { %v4048_v12 = vmax.f32 %v4040_v28, %v4047_v9  ;;  %v3565_v6 = vpop.f32.mrf.mxu1 }
 0x3c3   :  { %v4053_v17 = vsel %vm4002_vm3, %v3878_v44, -inf  ;;  %v3877_v36 = vmax.f32 %v3817_v42, 0.0  ;;  %v3820_v15 = vadd.f32 %v8518_v18, %v3753_v13  ;;  %v3752_v14 = vadd.f32 %v3565_v6, %v2355_v3  ;;  %v9083_v3 = vld [vmem:[#allocation64_spill] sm:$0xff]  ;;  %v9085_v6 = vld [vmem:[#allocation66_spill] sm:$0xff] }
 0x3c4   :  { %v4054_v38 = vmax.f32 %v4046_v2, %v4053_v17  ;;  %v5830_v27 = vpop.f32.mrf.mxu1 }
 0x3c5   :  { %v4051_v43 = vsel %vm4002_vm3, %v3877_v36, -inf  ;;  %v3880_v21 = vmax.f32 %v3820_v15, 0.0  ;;  %v3819_v11 = vadd.f32 %v8518_v18, %v3752_v14  ;;  %v3755_v26 = vadd.f32 %v5830_v27, %v2370_v45 }
 0x3c6   :  { %v4052_v56 = vmax.f32 %v4044_v30, %v4051_v43  ;;  %v3575_v19 = vpop.f32.mrf.mxu1  ;;  %v9081_v30 = vld [vmem:[#allocation63_spill] sm:$0xff]  ;;  %v2410_v45 = vadd.f32 %v9087_v37, %v9086_v48  ;;  %v9099_v48 = vld [vmem:[#allocation76_spill] sm:$0xff] }
 0x3c7   :  { %v4001_v31 = vsel %vm3971_vm11, %v3880_v21, 0.0  ;;  %v3879_v41 = vmax.f32 %v3819_v11, 0.0  ;;  %v3754_v55 = vadd.f32 %v3575_v19, %v2365_v23  ;;  %v3822_v2 = vadd.f32 %v8518_v18, %v3755_v26  ;;  %v9088_v23 = vld [vmem:[#allocation14_spill] sm:$0xff] }
 0x3c8   :  { %v4060_v51 = vmax.f32 %v4052_v56, %v4054_v38  ;;  %v4057_v28 = vsel %vm4002_vm3, %v4001_v31, -inf  ;;  %v5833_v20 = vpop.f32.mrf.mxu1  ;;  %v2385_v24 = vadd.f32 %v9081_v30, %v9080_v57  ;;  %v9089_v56 = vld [vmem:[#allocation69_spill] sm:$0xff] }
 0x3c9   :  { %v4058_v46 = vmax.f32 %v4050_v40, %v4057_v28  ;;  %v4055_v33 = vsel %vm4002_vm3, %v3879_v41, -inf  ;;  %v3757_v47 = vadd.f32 %v5833_v20, %v2380_v8  ;;  %v3821_v5 = vadd.f32 %v8518_v18, %v3754_v55  ;;  %v9090_v55 = vld [vmem:[#allocation17_spill] sm:$0xff]  ;;  %v9091_v20 = vld [vmem:[#allocation70_spill] sm:$0xff] }
 0x3ca   :  { %v4056_v25 = vmax.f32 %v4048_v12, %v4055_v33  ;;  %v3585_v49 = vpop.f32.mrf.mxu1  ;;  %v3882_v7 = vmax.f32 %v3822_v2, 0.0  ;;  %v2400_v40 = vadd.f32 %v9083_v3, %v9082_v1  ;;  %v9084_v12 = vld [vmem:[#allocation12_spill] sm:$0xff]  ;;  %v2405_v26 = vadd.f32 %v9089_v56, %v9088_v23 }
 0x3cb   :  { %v3756_v34 = vadd.f32 %v3585_v49, %v2375_v32  ;;  %v3824_v52 = vadd.f32 %v8518_v18, %v3757_v47  ;;  %v3881_v44 = vmax.f32 %v3821_v5, 0.0  ;;  %v2395_v17 = vadd.f32 %v9085_v6, %v9084_v12  ;;  %v9092_v49 = vld [vmem:[#allocation16_spill] sm:$0xff] }
 0x3cc   :  { %v4059_v53 = vmax.f32 %v4056_v25, %v4058_v46  ;;  %v5836_v4 = vpop.f32.mrf.mxu1  ;;  %v4099_v38 = vsel %vm4002_vm3, %v3882_v7, -inf  ;;  %v2420_v46 = vadd.f32 %v9091_v20, %v9090_v55  ;;  %v2415_v35 = vadd.f32 %v9093_v60, %v9092_v49 }
 0x3cd   :  { %v3759_v62 = vadd.f32 %v5836_v4, %v2390_v58  ;;  %v3823_v42 = vadd.f32 %v8518_v18, %v3756_v34  ;;  %v3884_v27 = vmax.f32 %v3824_v52, 0.0  ;;  %v4098_v19 = vsel %vm4002_vm3, %v3881_v44, -inf  ;;  %v9097_v44 = vld [vmem:[#allocation75_spill] sm:$0xff] }
 0x3ce   :  { %v8647_v22 = vmax.f32 %v4059_v53, %v4060_v51  ;;  %v3595_v0 = vpop.f32.mrf.mxu1 }
 0x3cf   :  { %v3826_v16 = vadd.f32 %v8518_v18, %v3759_v62  ;;  %v3758_v9 = vadd.f32 %v3595_v0, %v2385_v24  ;;  %v3883_v31 = vmax.f32 %v3823_v42, 0.0  ;;  %v4101_v33 = vsel %vm4002_vm3, %v3884_v27, -inf  ;;  %v9094_v24 = vld [vmem:[#allocation19_spill] sm:$0xff]  ;;  %v9095_v62 = vld [vmem:[#allocation73_spill] sm:$0xff] }
 0x3d0   :  { %v5839_v13 = vpop.f32.mrf.mxu1  ;;  %v2430_v7 = vadd.f32 %v9095_v62, %v9094_v24 }
 0x3d1   :  { %v3886_v36 = vmax.f32 %v3826_v16, 0.0  ;;  %v3825_v15 = vadd.f32 %v8518_v18, %v3758_v9  ;;  %v3761_v14 = vadd.f32 %v5839_v13, %v2400_v40  ;;  %v4100_v58 = vsel %vm4002_vm3, %v3883_v31, -inf  ;;  %v9096_v9 = vld [vmem:[#allocation18_spill] sm:$0xff] }
 0x3d2   :  { %v3605_v43 = vpop.f32.mrf.mxu1  ;;  %v2425_v42 = vadd.f32 %v9097_v44, %v9096_v9 }
 0x3d3   :  { %v4104_v21 = vsel %vm4002_vm3, %v3886_v36, -inf  ;;  %v3885_v11 = vmax.f32 %v3825_v15, 0.0  ;;  %v3828_v59 = vadd.f32 %v8518_v18, %v3761_v14  ;;  %v3760_v63 = vadd.f32 %v3605_v43, %v2395_v17  ;;  %v9098_v14 = vld [vmem:[#allocation21_spill] sm:$0xff] }
 0x3d4   :  { %v4105_v41 = vmax.f32 %v4099_v38, %v4104_v21  ;;  %v5842_v39 = vpop.f32.mrf.mxu1  ;;  %v2440_v37 = vadd.f32 %v9099_v48, %v9098_v14 }
 0x3d5   :  { %v4102_v61 = vsel %vm4002_vm3, %v3885_v11, -inf  ;;  %v3888_v8 = vmax.f32 %v3828_v59, 0.0  ;;  %v3827_v51 = vadd.f32 %v8518_v18, %v3760_v63  ;;  %v3763_v28 = vadd.f32 %v5842_v39, %v2410_v45  ;;  %v9100_v59 = vld [vmem:[#allocation22_spill] sm:$0xff]  ;;  %v9101_v63 = vld [vmem:[#allocation77_spill] sm:$0xff] }
 0x3d6   :  { %v4103_v50 = vmax.f32 %v4098_v19, %v4102_v61  ;;  %v3615_v29 = vpop.f32.mrf.mxu1  ;;  %v2435_v23 = vadd.f32 %v9101_v63, %v9100_v59  ;;  %v9102_v61 = vld [vmem:[#allocation27_spill] sm:$0xff] }
 0x3d7   :  { %v4108_v32 = vsel %vm4002_vm3, %v3888_v8, -inf  ;;  %v3887_v25 = vmax.f32 %v3827_v51, 0.0  ;;  %v3830_v2 = vadd.f32 %v8518_v18, %v3763_v28  ;;  %v3762_v47 = vadd.f32 %v3615_v29, %v2405_v26  ;;  %v9103_v8 = vld [vmem:[#allocation78_spill] sm:$0xff]  ;;  %v9104_v29 = vld [vmem:[#allocation28_spill] sm:$0xff] }
 0x3d8   :  { %v4109_v53 = vmax.f32 %v4101_v33, %v4108_v32  ;;  %v5845_v5 = vpop.f32.mrf.mxu1  ;;  %v2450_v51 = vadd.f32 %v9103_v8, %v9102_v61  ;;  %v9105_v32 = vld [vmem:[#allocation79_spill] sm:$0xff] }
 0x3d9   :  { %v4106_v34 = vsel %vm4002_vm3, %v3887_v25, -inf  ;;  %v3890_v4 = vmax.f32 %v3830_v2, 0.0  ;;  %v3829_v57 = vadd.f32 %v8518_v18, %v3762_v47  ;;  %v3765_v30 = vadd.f32 %v5845_v5, %v2420_v46  ;;  %v9107_v5 = vld [vmem:[#allocation80_spill] sm:$0xff] }
 0x3da   :  { %v4107_v52 = vmax.f32 %v4100_v58, %v4106_v34  ;;  %v3625_v0 = vpop.f32.mrf.mxu1  ;;  %v2445_v25 = vadd.f32 %v9105_v32, %v9104_v29 }
 0x3db   :  { %v4112_v1 = vsel %vm4002_vm3, %v3890_v4, -inf  ;;  %v3889_v3 = vmax.f32 %v3829_v57, 0.0  ;;  %v3832_v40 = vadd.f32 %v8518_v18, %v3765_v30  ;;  %v3764_v16 = vadd.f32 %v3625_v0, %v2415_v35  ;;  %v9109_v0 = vld [vmem:[#allocation81_spill] sm:$0xff] }
 0x3dc   :  { %v4113_v13 = vmax.f32 %v4105_v41, %v4112_v1  ;;  %v5848_v12 = vpop.f32.mrf.mxu1 }
 0x3dd   :  { %v4110_v6 = vsel %vm4002_vm3, %v3889_v3, -inf  ;;  %v3892_v17 = vmax.f32 %v3832_v40, 0.0  ;;  %v3831_v36 = vadd.f32 %v8518_v18, %v3764_v16  ;;  %v3767_v15 = vadd.f32 %v5848_v12, %v2430_v7  ;;  %v9111_v12 = vld [vmem:[#allocation82_spill] sm:$0xff] }
 0x3de   :  { %v4111_v45 = vmax.f32 %v4103_v50, %v4110_v6  ;;  %v3635_v38 = vpop.f32.mrf.mxu1 }
 0x3df   :  { %v4116_v27 = vsel %vm4002_vm3, %v3892_v17, -inf  ;;  %v3891_v43 = vmax.f32 %v3831_v36, 0.0  ;;  %v3834_v21 = vadd.f32 %v8518_v18, %v3767_v15  ;;  %v3766_v11 = vadd.f32 %v3635_v38, %v2425_v42  ;;  %v9113_v38 = vld [vmem:[#allocation83_spill] sm:$0xff] }
 0x3e0   :  { %v4117_v56 = vmax.f32 %v4109_v53, %v4116_v27  ;;  %v5851_v26 = vpop.f32.mrf.mxu1  ;;  %v9106_v53 = vld [vmem:[#allocation32_spill] sm:$0xff] }
 0x3e1   :  { %v4114_v19 = vsel %vm4002_vm3, %v3891_v43, -inf  ;;  %v3894_v31 = vmax.f32 %v3834_v21, 0.0  ;;  %v3833_v41 = vadd.f32 %v8518_v18, %v3766_v11  ;;  %v3769_v39 = vadd.f32 %v5851_v26, %v2440_v37  ;;  %v9115_v26 = vld [vmem:[#allocation84_spill] sm:$0xff] }
 0x3e2   :  { %v4115_v28 = vmax.f32 %v4107_v52, %v4114_v19  ;;  %v3645_v55 = vpop.f32.mrf.mxu1  ;;  %v2460_v34 = vadd.f32 %v9107_v5, %v9106_v53  ;;  %v9108_v52 = vld [vmem:[#allocation35_spill] sm:$0xff] }
 0x3e3   :  { %v4120_v20 = vsel %vm4002_vm3, %v3894_v31, -inf  ;;  %v3893_v46 = vmax.f32 %v3833_v41, 0.0  ;;  %v3836_v33 = vadd.f32 %v8518_v18, %v3769_v39  ;;  %v3768_v50 = vadd.f32 %v3645_v55, %v2435_v23  ;;  %v9117_v55 = vld [vmem:[#allocation85_spill] sm:$0xff] }
 0x3e4   :  { %v4121_v2 = vmax.f32 %v4113_v13, %v4120_v20  ;;  %v5854_v47 = vpop.f32.mrf.mxu1  ;;  %v2455_v1 = vadd.f32 %v9109_v0, %v9108_v52  ;;  %v9110_v13 = vld [vmem:[#allocation39_spill] sm:$0xff] }
 0x3e5   :  { %v4118_v49 = vsel %vm4002_vm3, %v3893_v46, -inf  ;;  %v3896_v60 = vmax.f32 %v3836_v33, 0.0  ;;  %v3835_v35 = vadd.f32 %v8518_v18, %v3768_v50  ;;  %v3771_v58 = vadd.f32 %v5854_v47, %v2450_v51  ;;  %v9119_v47 = vld [vmem:[#allocation86_spill] sm:$0xff] }
 0x3e6   :  { %v4119_v4 = vmax.f32 %v4111_v45, %v4118_v49  ;;  %v3655_v57 = vpop.f32.mrf.mxu1  ;;  %v2470_v6 = vadd.f32 %v9111_v12, %v9110_v13  ;;  %v9112_v45 = vld [vmem:[#allocation42_spill] sm:$0xff] }
 0x3e7   :  { %v4124_v30 = vsel %vm4002_vm3, %v3896_v60, -inf  ;;  %v3895_v24 = vmax.f32 %v3835_v35, 0.0  ;;  %v3838_v62 = vadd.f32 %v8518_v18, %v3771_v58  ;;  %v3770_v7 = vadd.f32 %v3655_v57, %v2445_v25  ;;  %v9121_v57 = vld [vmem:[#allocation87_spill] sm:$0xff] }
 0x3e8   :  { %v4125_v3 = vmax.f32 %v4117_v56, %v4124_v30  ;;  %v5857_v40 = vpop.f32.mrf.mxu1  ;;  %v2465_v27 = vadd.f32 %v9113_v38, %v9112_v45  ;;  %v9114_v56 = vld [vmem:[#allocation47_spill] sm:$0xff] }
 0x3e9   :  { %v4122_v16 = vsel %vm4002_vm3, %v3895_v24, -inf  ;;  %v3898_v9 = vmax.f32 %v3838_v62, 0.0  ;;  %v3837_v44 = vadd.f32 %v8518_v18, %v3770_v7  ;;  %v3773_v42 = vadd.f32 %v5857_v40, %v2460_v34  ;;  %v9123_v40 = vld [vmem:[#allocation88_spill] sm:$0xff] }
 0x3ea   :  { %v4123_v17 = vmax.f32 %v4115_v28, %v4122_v16  ;;  %v3665_v36 = vpop.f32.mrf.mxu1  ;;  %v2480_v19 = vadd.f32 %v9115_v26, %v9114_v56  ;;  %v9116_v28 = vld [vmem:[#allocation53_spill] sm:$0xff] }
 0x3eb   :  { %v4128_v15 = vsel %vm4002_vm3, %v3898_v9, -inf  ;;  %v3897_v14 = vmax.f32 %v3837_v44, 0.0  ;;  %v3840_v48 = vadd.f32 %v8518_v18, %v3773_v42  ;;  %v3772_v37 = vadd.f32 %v3665_v36, %v2455_v1  ;;  %v9125_v36 = vld [vmem:[#allocation89_spill] sm:$0xff] }
 0x3ec   :  { %v4129_v43 = vmax.f32 %v4121_v2, %v4128_v15  ;;  %v5860_v21 = vpop.f32.mrf.mxu1  ;;  %v2475_v20 = vadd.f32 %v9117_v55, %v9116_v28  ;;  %v9118_v2 = vld [vmem:[#allocation59_spill] sm:$0xff] }
 0x3ed   :  { %v4126_v11 = vsel %vm4002_vm3, %v3897_v14, -inf  ;;  %v3900_v59 = vmax.f32 %v3840_v48, 0.0  ;;  %v3839_v63 = vadd.f32 %v8518_v18, %v3772_v37  ;;  %v3775_v23 = vadd.f32 %v5860_v21, %v2470_v6  ;;  %v9127_v21 = vld [vmem:[#allocation90_spill] sm:$0xff] }
 0x3ee   :  { %v4127_v31 = vmax.f32 %v4119_v4, %v4126_v11  ;;  %v3675_v41 = vpop.f32.mrf.mxu1  ;;  %v2490_v49 = vadd.f32 %v9119_v47, %v9118_v2  ;;  %v9120_v4 = vld [vmem:[#allocation62_spill] sm:$0xff] }
 0x3ef   :  { %v4132_v39 = vsel %vm4002_vm3, %v3900_v59, -inf  ;;  %v3899_v61 = vmax.f32 %v3839_v63, 0.0  ;;  %v3842_v8 = vadd.f32 %v8518_v18, %v3775_v23  ;;  %v3774_v51 = vadd.f32 %v3675_v41, %v2465_v27  ;;  %v9129_v41 = vld [vmem:[#allocation91_spill] sm:$0xff] }
 0x3f0   :  { %v4133_v46 = vmax.f32 %v4125_v3, %v4132_v39  ;;  %v5863_v33 = vpop.f32.mrf.mxu1  ;;  %v2485_v30 = vadd.f32 %v9121_v57, %v9120_v4  ;;  %v9122_v3 = vld [vmem:[#allocation65_spill] sm:$0xff] }
 0x3f1   :  { %v4130_v50 = vsel %vm4002_vm3, %v3899_v61, -inf  ;;  %v3902_v29 = vmax.f32 %v3842_v8, 0.0  ;;  %v3841_v32 = vadd.f32 %v8518_v18, %v3774_v51  ;;  %v3777_v25 = vadd.f32 %v5863_v33, %v2480_v19 }
 0x3f2   :  { %v4131_v60 = vmax.f32 %v4123_v17, %v4130_v50  ;;  %v3685_v35 = vpop.f32.mrf.mxu1  ;;  %v2500_v16 = vadd.f32 %v9123_v40, %v9122_v3  ;;  %v9124_v17 = vld [vmem:[#allocation68_spill] sm:$0xff] }
 0x3f3   :  { %v4136_v58 = vsel %vm4002_vm3, %v3902_v29, -inf  ;;  %v3901_v53 = vmax.f32 %v3841_v32, 0.0  ;;  %v3844_v5 = vadd.f32 %v8518_v18, %v3777_v25  ;;  %v3776_v34 = vadd.f32 %v3685_v35, %v2475_v20 }
 0x3f4   :  { %v4137_v24 = vmax.f32 %v4129_v43, %v4136_v58  ;;  %v5866_v62 = vpop.f32.mrf.mxu1  ;;  %v2495_v15 = vadd.f32 %v9125_v36, %v9124_v17  ;;  %v9126_v43 = vld [vmem:[#allocation71_spill] sm:$0xff]  ;;  %v4062_v35 = vrot.slane %v8647_v22, 4  ;;  %v4265_v36 = vld [vmem:[%s8826_s8 + $0x8] sm:$0xff] }
 0x3f5   :  { %v4134_v7 = vsel %vm4002_vm3, %v3901_v53, -inf  ;;  %v3904_v52 = vmax.f32 %v3844_v5, 0.0  ;;  %v3843_v0 = vadd.f32 %v8518_v18, %v3776_v34  ;;  %v3779_v1 = vadd.f32 %v5866_v62, %v2490_v49  ;;  %v4266_v17 = vld [vmem:[%s8826_s8 + $0x10] sm:$0xff] }
 0x3f6   :  { %v4135_v9 = vmax.f32 %v4127_v31, %v4134_v7  ;;  %v3695_v44 = vpop.f32.mrf.mxu1  ;;  %v2510_v11 = vadd.f32 %v9127_v21, %v9126_v43  ;;  %v9128_v31 = vld [vmem:[#allocation74_spill] sm:$0xff]  ;;  %v4361_v21 = vld [vmem:[%s8829_s11 + $0x18] sm:$0xff] }
 0x3f7   :  { %v4140_v42 = vsel %vm4002_vm3, %v3904_v52, -inf  ;;  %v3903_v13 = vmax.f32 %v3843_v0, 0.0  ;;  %v3846_v12 = vadd.f32 %v8518_v18, %v3779_v1  ;;  %v3778_v6 = vadd.f32 %v3695_v44, %v2485_v30 }
 0x3f8   :  { %v4141_v14 = vmax.f32 %v4133_v46, %v4140_v42  ;;  %v5869_v48 = vpop.f32.mrf.mxu1  ;;  %v2505_v39 = vadd.f32 %v9129_v41, %v9128_v31 }
 0x3f9   :  { %v4138_v37 = vsel %vm4002_vm3, %v3903_v13, -inf  ;;  %v3906_v45 = vmax.f32 %v3846_v12, 0.0  ;;  %v3845_v38 = vadd.f32 %v8518_v18, %v3778_v6  ;;  %v3781_v27 = vadd.f32 %v5869_v48, %v2500_v16  ;;  %v5041_v13 = vld [vmem:[%s8822_s4] ss:$0 sm:$0xff]  ;;  %v4267_v6 = vld [vmem:[%s8826_s8 + $0x18] sm:$0xff] }
 0x3fa   :  { %v4139_v59 = vmax.f32 %v4131_v60, %v4138_v37  ;;  %v3705_v63 = vpop.f32.mrf.mxu1 }
 0x3fb   :  { %v4144_v23 = vsel %vm4002_vm3, %v3906_v45, -inf  ;;  %v3905_v56 = vmax.f32 %v3845_v38, 0.0  ;;  %v3848_v26 = vadd.f32 %v8518_v18, %v3781_v27  ;;  %v3780_v19 = vadd.f32 %v3705_v63, %v2495_v15  ;;  %v4264_v15 = vld [vmem:[%s8826_s8] sm:$0xff] }
 0x3fc   :  { %v4145_v61 = vmax.f32 %v4137_v24, %v4144_v23  ;;  %v5872_v8 = vpop.f32.mrf.mxu1  ;;  %v4063_v24 = vmax.f32 %v8647_v22, %v4062_v35  ;;  %v5044_v45 = vld [vmem:[%s8825_s7] ss:$0 sm:$0xff] }
 0x3fd   :  { %v4142_v51 = vsel %vm4002_vm3, %v3905_v56, -inf  ;;  %v3908_v28 = vmax.f32 %v3848_v26, 0.0  ;;  %v3847_v55 = vadd.f32 %v8518_v18, %v3780_v19  ;;  %v3783_v20 = vadd.f32 %v5872_v8, %v2510_v11  ;;  %v4360_v11 = vld [vmem:[%s8829_s11 + $0x10] sm:$0xff]  ;;  %v4358_v63 = vld [vmem:[%s8829_s11] sm:$0xff] }
 0x3fe   :  { %v4143_v46 = vmax.f32 %v4135_v9, %v4142_v51  ;;  %v3715_v33 = vpop.f32.mrf.mxu1  ;;  %v4064_v52 = vrot.slane %v4063_v24, 2  ;;  %v5045_v23 = vld [vmem:[%s8827_s9] ss:$0 sm:$0xff]  ;;  %s5943_s9 = scalar_lea.vmem %s4450_s15, 32 }
 0x3ff   :  { %v4148_v50 = vsel %vm4002_vm3, %v3908_v28, -inf  ;;  %v3907_v29 = vmax.f32 %v3847_v55, 0.0  ;;  %v3850_v32 = vadd.f32 %v8518_v18, %v3783_v20  ;;  %v3782_v25 = vadd.f32 %v3715_v33, %v2505_v39  ;;  %v5047_v19 = vld [vmem:[%s8828_s10] ss:$0 sm:$0xff]  ;;  %p5944_p0 = scmp.ne.s32.totalorder %s4450_s15, %s5943_s9  ;;  %p5949_p2 = scmp.lt.s32.totalorder %s5943_s9, %s5943_s9 }
 0x400   :  { %v4149_v2 = vmax.f32 %v4141_v14, %v4148_v50  ;;  %v4065_v1 = vmax.f32 %v4063_v24, %v4064_v52  ;;  %v5042_v14 = vld [vmem:[%s8824_s6] ss:$0 sm:$0xff] }
 0x401   :  { %v4146_v47 = vsel %vm4002_vm3, %v3907_v29, -inf  ;;  %v3910_v49 = vmax.f32 %v3850_v32, 0.0  ;;  %v3849_v60 = vadd.f32 %v8518_v18, %v3782_v25  ;;  %p5950_p3 = por %p5949_p2, %p5948_p1 }
 0x402   :  { %v4147_v58 = vmax.f32 %v4139_v59, %v4146_v47  ;;  %v4066_v16 = vrot.slane %v4065_v1, 1  ;;  %v4359_v59 = vld [vmem:[%s8829_s11 + $0x8] sm:$0xff] }
 0x403   :  { %v4097_v53 = vsel %vm3971_vm11, %v3910_v49, 0.0  ;;  %v3909_v5 = vmax.f32 %v3849_v60, 0.0  ;;  %p5951_p4 = pnand %p5950_p3, %p5944_p0 }
 0x404   :  { %v4155_v34 = vmax.f32 %v4147_v58, %v4149_v2  ;;  %v4152_v4 = vsel %vm4002_vm3, %v4097_v53, -inf  ;;  %v4067_v44 = vmax.f32 %v4065_v1, %v4066_v16 }
 0x405   :  { %v4153_v57 = vmax.f32 %v4145_v61, %v4152_v4  ;;  %v4150_v30 = vsel %vm4002_vm3, %v3909_v5, -inf }
 0x406   :  { %v4151_v62 = vmax.f32 %v4143_v46, %v4150_v30 }
 0x408   :  { %v4154_v7 = vmax.f32 %v4151_v62, %v4153_v57 }
 0x40a   :  { %v4156_v0 = vmax.f32 %v4154_v7, %v4155_v34 }
 0x40c   :  { %v4157_v18 = vrot.slane %v4156_v0, 4 }
 0x40e   :  { %v4158_v3 = vmax.f32 %v4156_v0, %v4157_v18 }
 0x410   :  { %v4159_v40 = vrot.slane %v4158_v3, 2 }
 0x412   :  { %v4160_v54 = vmax.f32 %v4158_v3, %v4159_v40 }
 0x414   :  { %v4161_v9 = vrot.slane %v4160_v54, 1 }
 0x416   :  { %v4162_v42 = vmax.f32 %v4160_v54, %v4161_v9 }
 0x418   :  { %v4164_v12 = vsel %vm4163_vm0, %v4067_v44, %v4162_v42 }
 0x419   :  { %v4172_v22 = vmul.f32 %v5041_v13, %v4164_v12 }
 0x41b   :  { %5878 = vmatmul.mubr.msk.f32.vlgmr.msra.gmra.mxu0 %vm4002_vm3, %v4172_v22 }
 0x41c   :  { %5888 = vmatprep.mubr.msk.f32.mxu0 %vm5967_vm1, %v8899_v10  ;;  %5881 = vmatpush3.msra.mxu0 %v4267_v6 }
 0x41d   :  { %5882 = vmatprep.subr.mxu0 %v8899_v10 }
 0x41e   :  { %5883 = vmatpush3.msra.mxu0 %v4266_v17 }
 0x41f   :  { %5884 = vmatprep.subr.mxu0 %v8899_v10 }
 0x420   :  { %5885 = vmatpush3.msra.mxu0 %v4265_v36 }
 0x421   :  { %5886 = vmatprep.subr.mxu0 %v8899_v10 }
 0x422   :  { %5887 = vmatpush3.msra.mxu0 %v4264_v15 }
 0x423   :  { %5891 = vmatprep.subr.mxu0 %v8899_v10 }
 0x4db   :  { %v4251_v48 = vpop.f32.mrf.mxu0 }
 0x4dc   :  { %v4252_v37 = vadd.f32 %v5042_v14, %v4251_v48 }
 0x4dd   :  { %v5879_v38 = vpop.f32.mrf.mxu0 }
 0x4de   :  { %v4255_v27 = vmax.f32 %v4252_v37, 0.0 }
 0x4e0   :  { %v4263_v43 = vmul.f32 %v5044_v45, %v4255_v27 }
 0x4e2   :  { %5889 = vmatmul.mubr.msk.f32.vlgmr.msra.gmra.mxu0 %vm4275_vm12, %v4263_v43 }
 0x4e3   :  { %5899 = vmatprep.mubr.msk.f32.mxu0 %vm5967_vm1, %v8899_v10  ;;  %5892 = vmatpush3.msra.mxu0 %v4361_v21 }
 0x4e4   :  { %5893 = vmatprep.subr.mxu0 %v8899_v10 }
 0x4e5   :  { %5894 = vmatpush3.msra.mxu0 %v4360_v11 }
 0x4e6   :  { %5895 = vmatprep.subr.mxu0 %v8899_v10 }
 0x4e7   :  { %5896 = vmatpush3.msra.mxu0 %v4359_v59 }
 0x4e8   :  { %5897 = vmatprep.subr.mxu0 %v8899_v10  ;;  %v5048_v10 = vld [vmem:[%s8830_s12] ss:$0 sm:$0xff] }
 0x4e9   :  { %5898 = vmatpush3.msra.mxu0 %v4358_v63 }
 0x5a2   :  { %v4345_v56 = vpop.f32.mrf.mxu0 }
 0x5a3   :  { %v4346_v26 = vadd.f32 %v5045_v23, %v4345_v56 }
 0x5a4   :  { %v5890_v31 = vpop.f32.mrf.mxu0 }
 0x5a5   :  { %v4349_v41 = vmax.f32 %v4346_v26, 0.0 }
 0x5a7   :  { %v4357_v39 = vmul.f32 %v5047_v19, %v4349_v41 }
 0x5a9   :  { %5900 = vmatmul.mubr.msk.f32.vlgmr.msra.gmra.mxu0 %vm4275_vm12, %v4357_v39 }
 0x669   :  { %v4438_v61 = vpop.f32.mrf.mxu0 }
 0x66a   :  { %v4439_v8 = vadd.f32 %v5048_v10, %v4438_v61 }
 0x66b   :  { %v5901_v51 = vpop.f32.mrf.mxu0 }
 0x66c   :  { %4442 = vst [vmem:[#allocation2] sm:$0x3] %v4439_v8 }
 0x66d   :  { %5954 = shalt.err (!%p5951_p4)
}
 0x66e   :  { %4452 = dma.vmem_to_hbm [thread:$0]  %s4450_s15, 32, %s8831_s13, [#allocation3]  }
 0x66f   :  { %5963 = dma.done.wait [#allocation3], 32  }
 0x670   :  { %5964 = vsyncadd [#allocation3], 4294967264 }
 0x671   :  { %4456 = vsyncpa [#allocation3], 1 }

</bundles_post_ra>
